<compile_context>
chip_gen: v6e
topology: v6e:2x2x1
jax: 0.10.0
libtpu: 0.0.40
codegen_flags: <defaults>
</compile_context>

<pallas_src>
import functools

import numpy as np
import jax
import jax.numpy as jnp
from jax.experimental import pallas as pl
from jax.experimental.pallas import tpu as pltpu


# ----------------------------------------------------------------------------
# Host-side constant preprocessing of the registered spherical-grid buffer.
# gen_sph_grid() equivalent: per-voxel unit direction -> (theta, phi) ->
# nearest pixel of the margin-cropped spherical map -> flat pixel index.
# ----------------------------------------------------------------------------
def make_spherical_gather_indices(vox_res, crop_h, crop_w):
    lin = (np.arange(vox_res, dtype=np.float64) + 0.5) / vox_res * 2.0 - 1.0
    zc, yc, xc = np.meshgrid(lin, lin, lin, indexing="ij")
    r = np.sqrt(xc ** 2 + yc ** 2 + zc ** 2) + 1e-8
    theta = np.arctan2(yc, xc)
    theta = np.where(theta < 0.0, theta + 2.0 * np.pi, theta)
    phi = np.arccos(np.clip(zc / r, -1.0, 1.0))
    u = np.clip((theta / (2.0 * np.pi) * crop_w).astype(np.int64), 0, crop_w - 1)
    v = np.clip((phi / np.pi * crop_h).astype(np.int64), 0, crop_h - 1)
    return (v * crop_w + u).reshape(-1).astype(np.int32)      # (V^3,)


# ----------------------------------------------------------------------------
# Shared in-kernel helpers.
# ----------------------------------------------------------------------------
def _read_weights(w1_ref, b1_ref, w2_ref, b2_ref, hid):
    # Hoist all SMEM scalar reads out of the per-batch / per-hidden-unit loops.
    w1a = [w1_ref[2 * c] for c in range(hid)]
    w1b = [w1_ref[2 * c + 1] for c in range(hid)]
    b1 = [b1_ref[c] for c in range(hid)]
    w2 = [w2_ref[c] for c in range(hid)]
    return w1a, w1b, b1, w2, b2_ref[0]


def _backproject_refine(g, d_raw, weights, res):
    """Affine back-projection + depth clamp + (2 -> hid ReLU -> 1) MLP + sigmoid.

    All inputs/outputs are dense (TS, 128) f32 tiles (full vreg occupancy).
    """
    w1a, w1b, b1, w2, b2 = weights
    # cnt == 1 for the nearest-neighbour gather, so mask == 1 and
    # (-(1 - s[idx]) + 1/res) * res == (s[idx] - 1 + 1/res) * res.
    psph = (g - 1.0 + 1.0 / res) * res
    # torch.clamp(proj_depth / 50, 1e-5, 1 - 1e-5)
    d = jnp.clip(d_raw * (1.0 / 50.0), 1e-5, 1.0 - 1e-5)
    acc = jnp.full(d.shape, b2, jnp.float32)                  # fold b2 into init
    for c in range(len(w1a)):                                 # static unroll
        h = w1a[c] * psph + w1b[c] * d + b1[c]
        acc = acc + w2[c] * jnp.maximum(h, 0.0)
    vox = pl.reciprocal(1.0 + jnp.exp(-acc), approx=True)     # sigmoid
    return psph, d, vox


# ----------------------------------------------------------------------------
# Kernel A: fused back-projection with IN-KERNEL lane gather + refine MLP.
# ----------------------------------------------------------------------------
def _gather_fused_kernel(sph_ref, idx_ref, depth_ref,
                         w1_ref, b1_ref, w2_ref, b2_ref,
                         psph_ref, pdepth_ref, voxel_ref, *, res, hid, n_chunks):
    weights = _read_weights(w1_ref, b1_ref, w2_ref, b2_ref, hid)
    idx = idx_ref[...]                                        # (TS, 128) int32
    ts = idx.shape[0]
    if n_chunks > 1:
        lo = jnp.bitwise_and(idx, 127)                        # lane within window
        hi = jnp.right_shift(idx, 7)                          # window id
    else:
        lo, hi = idx, None

    for b in range(depth_ref.shape[0]):                       # static batch unroll
        # Chunked lane gather from the resident spherical map (row b):
        # per 128-entry window, broadcast the window across sublanes and do an
        # equal-shape take_along_axis (tpu.dynamic_gather along lanes).
        g = None
        for c in range(n_chunks):
            tab = sph_ref[b:b + 1, c * 128:(c + 1) * 128]     # (1, 128)
            tab = jnp.broadcast_to(tab, (ts, 128))            # sublane broadcast
            vals = jnp.take_along_axis(tab, lo, axis=1)       # (TS, 128)
            g = vals if g is None else jnp.where(hi == c, vals, g)

        psph, d, vox = _backproject_refine(g, depth_ref[b], weights, res)
        psph_ref[b] = psph
        pdepth_ref[b] = d
        voxel_ref[b] = vox


# ----------------------------------------------------------------------------
# Kernel B (fallback): same fused elementwise pipeline, gather done by XLA
# (constant indices) in the wrapper and streamed in as a dense input.
# ----------------------------------------------------------------------------
def _dense_fused_kernel(g_ref, depth_ref, w1_ref, b1_ref, w2_ref, b2_ref,
                        psph_ref, pdepth_ref, voxel_ref, *, res, hid):
    weights = _read_weights(w1_ref, b1_ref, w2_ref, b2_ref, hid)
    for b in range(depth_ref.shape[0]):
        psph, d, vox = _backproject_refine(g_ref[b], depth_ref[b], weights, res)
        psph_ref[b] = psph
        pdepth_ref[b] = d
        voxel_ref[b] = vox


# ----------------------------------------------------------------------------
# pallas_call plumbing.
# ----------------------------------------------------------------------------
def _pick_rows_per_tile(n_rows, target_steps=8, max_rows=512):
    """Largest multiple-of-8 divisor of n_rows <= max_rows leaving ~target steps."""
    assert n_rows % 8 == 0, "V^3 must be a multiple of 8*128"
    ts = min(max_rows, max(8, (n_rows // target_steps) // 8 * 8))
    while ts > 8 and n_rows % ts:
        ts -= 8
    return ts


def _run_fused(depth3, params, res, ts, *, sph_pad=None, idx2d=None, g3=None):
    b, n_rows, _ = depth3.shape
    hid = params[1].shape[0]
    n_elems = b * n_rows * 128

    vox_spec = pl.BlockSpec((b, ts, 128), lambda i: (0, i, 0))
    smem = pl.BlockSpec(memory_space=pltpu.MemorySpace.SMEM)

    if g3 is None:
        # In-kernel gather path.
        hw_pad = sph_pad.shape[1]
        n_chunks = hw_pad // 128
        kernel = functools.partial(_gather_fused_kernel, res=res, hid=hid,
                                   n_chunks=n_chunks)
        in_specs = [
            pl.BlockSpec((b, hw_pad), lambda i: (0, 0)),      # resident sph map
            pl.BlockSpec((ts, 128), lambda i: (i, 0)),        # voxel->pixel idx
            vox_spec,                                         # proj_depth tile
            smem, smem, smem, smem,                           # w1, b1, w2, b2
        ]
        operands = (sph_pad, idx2d, depth3) + params
        bytes_accessed = 4 * (sph_pad.size + idx2d.size + depth3.size + 3 * n_elems)
        flops = n_elems * (6 * hid + 4 * n_chunks + 10)
    else:
        # Pre-gathered (XLA gather) fallback path.
        kernel = functools.partial(_dense_fused_kernel, res=res, hid=hid)
        in_specs = [vox_spec, vox_spec, smem, smem, smem, smem]
        operands = (g3, depth3) + params
        bytes_accessed = 4 * (g3.size + depth3.size + 3 * n_elems)
        flops = n_elems * (6 * hid + 10)

    return pl.pallas_call(
        kernel,
        out_shape=(jax.ShapeDtypeStruct((b, n_rows, 128), jnp.float32),) * 3,
        grid=(n_rows // ts,),
        in_specs=in_specs,
        out_specs=(vox_spec, vox_spec, vox_spec),
        compiler_params=pltpu.CompilerParams(
            dimension_semantics=("parallel",)),
        cost_estimate=pl.CostEstimate(flops=int(flops),
                                      transcendentals=int(2 * n_elems),
                                      bytes_accessed=int(bytes_accessed)),
    )(*operands)


def net_forward(out_1, gather_idx, refine_params, margin, vox_res, *,
                in_kernel_gather="auto"):
    proj_depth = out_1["proj_depth"]                           # (B,1,V,V,V)
    pred_sph = out_1["pred_sph_full"]                          # (B,1,H,W)
    w1, b1, w2, b2 = refine_params
    params = (jnp.asarray(w1, jnp.float32).reshape(-1),        # 1-D SMEM layout
              jnp.asarray(b1, jnp.float32).reshape(-1),
              jnp.asarray(w2, jnp.float32).reshape(-1),
              jnp.asarray(b2, jnp.float32).reshape(-1))

    b, _, h, w = pred_sph.shape
    crop = pred_sph[:, 0, margin:h - margin, margin:w - margin]
    hw = crop.shape[1] * crop.shape[2]
    sph_flat = crop.reshape(b, hw).astype(jnp.float32)
    hw_pad = ((hw + 127) // 128) * 128
    sph_pad = jnp.pad(sph_flat, ((0, 0), (0, hw_pad - hw)))    # pad lanes unused

    n_vox = vox_res ** 3
    assert n_vox % (8 * 128) == 0
    n_rows = n_vox // 128
    depth3 = proj_depth.reshape(b, n_rows, 128).astype(jnp.float32)
    idx_flat = jnp.asarray(gather_idx, jnp.int32).reshape(-1)
    idx2d = idx_flat.reshape(n_rows, 128)
    ts = _pick_rows_per_tile(n_rows)
    res = float(vox_res)

    def run_gather():
        return _run_fused(depth3, params, res, ts, sph_pad=sph_pad, idx2d=idx2d)

    def run_dense():
        g3 = jnp.take(sph_flat, idx_flat, axis=1).reshape(b, n_rows, 128)
        return _run_fused(depth3, params, res, ts, g3=g3)

    if in_kernel_gather == "auto":
        # Prefer the in-kernel lane gather; self-check its output and silently
        # fall back to the XLA-gather-fed kernel if the gather form does not
        # lower (or misbehaves) on this jax/libtpu combination.
        try:
            psph3, pd3, vox3 = run_gather()
            ref = (jnp.take(sph_flat, idx_flat, axis=1).reshape(b, n_rows, 128)
                   - 1.0 + 1.0 / res) * res
            if not bool(jnp.allclose(psph3, ref, rtol=1e-4, atol=1e-4)):
                raise ValueError("in-kernel gather self-check failed")
        except Exception:                                      # noqa: BLE001
            psph3, pd3, vox3 = run_dense()
    elif in_kernel_gather:
        psph3, pd3, vox3 = run_gather()
    else:
        psph3, pd3, vox3 = run_dense()

    shape5 = (b, 1, vox_res, vox_res, vox_res)
    out = dict(out_1)
    out["pred_proj_sph_full"] = psph3.reshape(shape5)
    out["pred_proj_depth"] = pd3.reshape(shape5)
    out["pred_voxel"] = vox3.reshape(shape5)
    return out


# ----------------------------------------------------------------------------
# Pure-JAX reference for the fused path (sanity check).
# ----------------------------------------------------------------------------
def _reference(out_1, gather_idx, params, margin, vox_res):
    w1, b1, w2, b2 = params
    pred_sph = out_1["pred_sph_full"]
    proj_depth = out_1["proj_depth"]
    b, _, h, w = pred_sph.shape
    crop = pred_sph[:, 0, margin:h - margin, margin:w - margin].reshape(b, -1)
    s = jnp.take(crop, jnp.asarray(gather_idx, jnp.int32), axis=1)   # (B, V^3)
    psph = (s - 1.0 + 1.0 / vox_res) * vox_res
    d = jnp.clip(proj_depth.reshape(b, -1) / 50.0, 1e-5, 1.0 - 1e-5)
    x2 = jnp.stack([psph, d], axis=0)                                # (2, B, N)
    h1 = jnp.einsum("hc,cbn->hbn", w1, x2) + b1[:, None, None]
    y = jnp.einsum("h,hbn->bn", w2, jnp.maximum(h1, 0.0)) + b2[0]
    return psph, d, jax.nn.sigmoid(y)


if __name__ == "__main__":
    B = 2
    V = 32          # voxel resolution (original model uses 128)
    MARGIN = 4      # opt.padding_margin
    HS = WS = 24    # full spherical map (crops to 16x16 -> HW = 256, 2 windows)
    HID = 8

    key = jax.random.PRNGKey(0)
    k_sph, k_depth, k_w1, k_b1, k_w2, k_b2 = jax.random.split(key, 6)

    # Outputs of depth_and_inpaint (definition not provided) -> inputs here.
    out_1 = {
        "pred_sph_full": jax.random.uniform(k_sph, (B, 1, HS, WS), jnp.float32),
        "proj_depth": jax.random.uniform(k_depth, (B, 1, V, V, V), jnp.float32) * 50.0,
    }

    # Deterministic refine-net parameters (stand-in for Unet_3D).
    w1 = jax.random.normal(k_w1, (HID, 2), jnp.float32) * 0.5
    b1 = jax.random.normal(k_b1, (HID,), jnp.float32) * 0.1
    w2 = jax.random.normal(k_w2, (HID,), jnp.float32) * 0.5
    b2 = jax.random.normal(k_b2, (1,), jnp.float32) * 0.1
    refine_params = (w1, b1, w2, b2)

    # Constant voxel -> spherical-pixel index map (gen_sph_grid equivalent).
    flat_pix = make_spherical_gather_indices(V, HS - 2 * MARGIN, WS - 2 * MARGIN)

    out = net_forward(out_1, flat_pix, refine_params, MARGIN, V)
    out = jax.tree_util.tree_map(jax.block_until_ready, out)

    assert out["pred_voxel"].shape == (B, 1, V, V, V)
    assert out["pred_proj_sph_full"].shape == (B, 1, V, V, V)
    assert out["pred_proj_depth"].shape == (B, 1, V, V, V)

    psph_ref, d_ref, vox_ref = _reference(out_1, flat_pix, refine_params, MARGIN, V)
    np.testing.assert_allclose(
        np.asarray(out["pred_proj_sph_full"]).reshape(B, -1), np.asarray(psph_ref),
        rtol=1e-5, atol=1e-5)
    np.testing.assert_allclose(
        np.asarray(out["pred_proj_depth"]).reshape(B, -1), np.asarray(d_ref),
        rtol=1e-5, atol=1e-6)
    np.testing.assert_allclose(
        np.asarray(out["pred_voxel"]).reshape(B, -1), np.asarray(vox_ref),
        rtol=1e-2, atol=1e-2)
    assert bool(jnp.all(jnp.isfinite(out["pred_voxel"])))
    print("KERNEL_OK")
</pallas_src>

<mosaic_0001>
module attributes {stable_mosaic.version = 11 : i64} {
  func.func @_gather_fused_kernel(%arg0: i32, %arg1: memref<2x256xf32, #tpu.memory_space<vmem>>, %arg2: memref<32x128xi32, #tpu.memory_space<vmem>>, %arg3: memref<2x32x128xf32, #tpu.memory_space<vmem>>, %arg4: memref<16xf32, #tpu.memory_space<smem>>, %arg5: memref<8xf32, #tpu.memory_space<smem>>, %arg6: memref<8xf32, #tpu.memory_space<smem>>, %arg7: memref<1xf32, #tpu.memory_space<smem>>, %arg8: memref<2x32x128xf32, #tpu.memory_space<vmem>>, %arg9: memref<2x32x128xf32, #tpu.memory_space<vmem>>, %arg10: memref<2x32x128xf32, #tpu.memory_space<vmem>>) attributes {dimension_semantics = [#tpu.dimension_semantics<parallel>], iteration_bounds = array<i64: 8>, scalar_prefetch = 0 : i64, scratch_operands = 0 : i64, tpu.core_type = #tpu.core_type<tc>, window_params = [{pipeline_mode = #tpu.pipeline_mode<synchronous>, transform_indices = @transform_0, window_bounds = array<i64: 2, 256>}, {transform_indices = @transform_1, window_bounds = array<i64: 32, 128>}, {transform_indices = @transform_2, window_bounds = array<i64: 2, 32, 128>}, {transform_indices = @transform_3, window_bounds = array<i64: 16>}, {transform_indices = @transform_4, window_bounds = array<i64: 8>}, {transform_indices = @transform_5, window_bounds = array<i64: 8>}, {transform_indices = @transform_6, window_bounds = array<i64: 1>}, {transform_indices = @transform_7, window_bounds = array<i64: 2, 32, 128>}, {transform_indices = @transform_8, window_bounds = array<i64: 2, 32, 128>}, {transform_indices = @transform_9, window_bounds = array<i64: 2, 32, 128>}]} {
    %c0 = arith.constant 0 : index
    %0 = memref.load %arg4[%c0] : memref<16xf32, #tpu.memory_space<smem>>
    %c2 = arith.constant 2 : index
    %1 = memref.load %arg4[%c2] : memref<16xf32, #tpu.memory_space<smem>>
    %c4 = arith.constant 4 : index
    %2 = memref.load %arg4[%c4] : memref<16xf32, #tpu.memory_space<smem>>
    %c6 = arith.constant 6 : index
    %3 = memref.load %arg4[%c6] : memref<16xf32, #tpu.memory_space<smem>>
    %c8 = arith.constant 8 : index
    %4 = memref.load %arg4[%c8] : memref<16xf32, #tpu.memory_space<smem>>
    %c10 = arith.constant 10 : index
    %5 = memref.load %arg4[%c10] : memref<16xf32, #tpu.memory_space<smem>>
    %c12 = arith.constant 12 : index
    %6 = memref.load %arg4[%c12] : memref<16xf32, #tpu.memory_space<smem>>
    %c14 = arith.constant 14 : index
    %7 = memref.load %arg4[%c14] : memref<16xf32, #tpu.memory_space<smem>>
    %c1 = arith.constant 1 : index
    %8 = memref.load %arg4[%c1] : memref<16xf32, #tpu.memory_space<smem>>
    %c3 = arith.constant 3 : index
    %9 = memref.load %arg4[%c3] : memref<16xf32, #tpu.memory_space<smem>>
    %c5 = arith.constant 5 : index
    %10 = memref.load %arg4[%c5] : memref<16xf32, #tpu.memory_space<smem>>
    %c7 = arith.constant 7 : index
    %11 = memref.load %arg4[%c7] : memref<16xf32, #tpu.memory_space<smem>>
    %c9 = arith.constant 9 : index
    %12 = memref.load %arg4[%c9] : memref<16xf32, #tpu.memory_space<smem>>
    %c11 = arith.constant 11 : index
    %13 = memref.load %arg4[%c11] : memref<16xf32, #tpu.memory_space<smem>>
    %c13 = arith.constant 13 : index
    %14 = memref.load %arg4[%c13] : memref<16xf32, #tpu.memory_space<smem>>
    %c15 = arith.constant 15 : index
    %15 = memref.load %arg4[%c15] : memref<16xf32, #tpu.memory_space<smem>>
    %c0_0 = arith.constant 0 : index
    %16 = memref.load %arg5[%c0_0] : memref<8xf32, #tpu.memory_space<smem>>
    %c1_1 = arith.constant 1 : index
    %17 = memref.load %arg5[%c1_1] : memref<8xf32, #tpu.memory_space<smem>>
    %c2_2 = arith.constant 2 : index
    %18 = memref.load %arg5[%c2_2] : memref<8xf32, #tpu.memory_space<smem>>
    %c3_3 = arith.constant 3 : index
    %19 = memref.load %arg5[%c3_3] : memref<8xf32, #tpu.memory_space<smem>>
    %c4_4 = arith.constant 4 : index
    %20 = memref.load %arg5[%c4_4] : memref<8xf32, #tpu.memory_space<smem>>
    %c5_5 = arith.constant 5 : index
    %21 = memref.load %arg5[%c5_5] : memref<8xf32, #tpu.memory_space<smem>>
    %c6_6 = arith.constant 6 : index
    %22 = memref.load %arg5[%c6_6] : memref<8xf32, #tpu.memory_space<smem>>
    %c7_7 = arith.constant 7 : index
    %23 = memref.load %arg5[%c7_7] : memref<8xf32, #tpu.memory_space<smem>>
    %c0_8 = arith.constant 0 : index
    %24 = memref.load %arg6[%c0_8] : memref<8xf32, #tpu.memory_space<smem>>
    %c1_9 = arith.constant 1 : index
    %25 = memref.load %arg6[%c1_9] : memref<8xf32, #tpu.memory_space<smem>>
    %c2_10 = arith.constant 2 : index
    %26 = memref.load %arg6[%c2_10] : memref<8xf32, #tpu.memory_space<smem>>
    %c3_11 = arith.constant 3 : index
    %27 = memref.load %arg6[%c3_11] : memref<8xf32, #tpu.memory_space<smem>>
    %c4_12 = arith.constant 4 : index
    %28 = memref.load %arg6[%c4_12] : memref<8xf32, #tpu.memory_space<smem>>
    %c5_13 = arith.constant 5 : index
    %29 = memref.load %arg6[%c5_13] : memref<8xf32, #tpu.memory_space<smem>>
    %c6_14 = arith.constant 6 : index
    %30 = memref.load %arg6[%c6_14] : memref<8xf32, #tpu.memory_space<smem>>
    %c7_15 = arith.constant 7 : index
    %31 = memref.load %arg6[%c7_15] : memref<8xf32, #tpu.memory_space<smem>>
    %c0_16 = arith.constant 0 : index
    %32 = memref.load %arg7[%c0_16] : memref<1xf32, #tpu.memory_space<smem>>
    %c0_17 = arith.constant 0 : index
    %c0_18 = arith.constant 0 : index
    %33 = vector.load %arg2[%c0_17, %c0_18] : memref<32x128xi32, #tpu.memory_space<vmem>>, vector<32x128xi32>
    %c127_i32 = arith.constant 127 : i32
    %34 = vector.broadcast %c127_i32 : i32 to vector<32x128xi32>
    %35 = arith.andi %33, %34 : vector<32x128xi32>
    %c7_i32 = arith.constant 7 : i32
    %36 = vector.broadcast %c7_i32 : i32 to vector<32x128xi32>
    %37 = arith.shrsi %33, %36 : vector<32x128xi32>
    %c0_19 = arith.constant 0 : index
    %c0_20 = arith.constant 0 : index
    %38 = vector.load %arg1[%c0_19, %c0_20] : memref<2x256xf32, #tpu.memory_space<vmem>>, vector<1x128xf32>
    %39 = vector.shape_cast %38 : vector<1x128xf32> to vector<1x128xf32>
    %40 = vector.broadcast %39 : vector<1x128xf32> to vector<32x128xf32>
    %c0_i32 = arith.constant 0 : i32
    %41 = vector.broadcast %c0_i32 : i32 to vector<32x128xi32>
    %42 = arith.cmpi slt, %35, %41 : vector<32x128xi32>
    %c128_i32 = arith.constant 128 : i32
    %43 = vector.broadcast %c128_i32 : i32 to vector<32x128xi32>
    %44 = arith.addi %35, %43 : vector<32x128xi32>
    %45 = arith.select %42, %44, %35 : vector<32x128xi1>, vector<32x128xi32>
    %46 = vector.shape_cast %45 : vector<32x128xi32> to vector<32x128x1xi32>
    %47 = vector.shape_cast %46 : vector<32x128x1xi32> to vector<32x128xi32>
    %48 = tpu.dynamic_gather %40[%47] in [1] : vector<32x128xf32>, vector<32x128xi32> -> vector<32x128xf32>
    %c0_21 = arith.constant 0 : index
    %c128 = arith.constant 128 : index
    %49 = vector.load %arg1[%c0_21, %c128] : memref<2x256xf32, #tpu.memory_space<vmem>>, vector<1x128xf32>
    %50 = vector.shape_cast %49 : vector<1x128xf32> to vector<1x128xf32>
    %51 = vector.broadcast %50 : vector<1x128xf32> to vector<32x128xf32>
    %c0_i32_22 = arith.constant 0 : i32
    %52 = vector.broadcast %c0_i32_22 : i32 to vector<32x128xi32>
    %53 = arith.cmpi slt, %35, %52 : vector<32x128xi32>
    %c128_i32_23 = arith.constant 128 : i32
    %54 = vector.broadcast %c128_i32_23 : i32 to vector<32x128xi32>
    %55 = arith.addi %35, %54 : vector<32x128xi32>
    %56 = arith.select %53, %55, %35 : vector<32x128xi1>, vector<32x128xi32>
    %57 = vector.shape_cast %56 : vector<32x128xi32> to vector<32x128x1xi32>
    %58 = vector.shape_cast %57 : vector<32x128x1xi32> to vector<32x128xi32>
    %59 = tpu.dynamic_gather %51[%58] in [1] : vector<32x128xf32>, vector<32x128xi32> -> vector<32x128xf32>
    %c1_i32 = arith.constant 1 : i32
    %60 = vector.broadcast %c1_i32 : i32 to vector<32x128xi32>
    %61 = arith.cmpi eq, %37, %60 : vector<32x128xi32>
    %62 = arith.select %61, %59, %48 : vector<32x128xi1>, vector<32x128xf32>
    %c0_24 = arith.constant 0 : index
    %c0_25 = arith.constant 0 : index
    %c0_26 = arith.constant 0 : index
    %63 = vector.load %arg3[%c0_24, %c0_25, %c0_26] : memref<2x32x128xf32, #tpu.memory_space<vmem>>, vector<1x32x128xf32>
    %64 = vector.shape_cast %63 : vector<1x32x128xf32> to vector<32x128xf32>
    %cst = arith.constant 1.000000e+00 : f32
    %65 = vector.broadcast %cst : f32 to vector<32x128xf32>
    %66 = arith.subf %62, %65 : vector<32x128xf32>
    %cst_27 = arith.constant 3.125000e-02 : f32
    %67 = vector.broadcast %cst_27 : f32 to vector<32x128xf32>
    %68 = arith.addf %66, %67 : vector<32x128xf32>
    %cst_28 = arith.constant 3.200000e+01 : f32
    %69 = vector.broadcast %cst_28 : f32 to vector<32x128xf32>
    %70 = arith.mulf %68, %69 : vector<32x128xf32>
    %cst_29 = arith.constant 2.000000e-02 : f32
    %71 = vector.broadcast %cst_29 : f32 to vector<32x128xf32>
    %72 = arith.mulf %64, %71 : vector<32x128xf32>
    %cst_30 = arith.constant 9.99999974E-6 : f32
    %cst_31 = arith.constant 0.999989986 : f32
    %73 = vector.broadcast %cst_30 : f32 to vector<32x128xf32>
    %74 = arith.maximumf %73, %72 : vector<32x128xf32>
    %75 = vector.broadcast %cst_31 : f32 to vector<32x128xf32>
    %76 = arith.minimumf %75, %74 : vector<32x128xf32>
    %77 = vector.broadcast %32 : f32 to vector<32x128xf32>
    %78 = vector.broadcast %0 : f32 to vector<32x128xf32>
    %79 = arith.mulf %78, %70 : vector<32x128xf32>
    %80 = vector.broadcast %8 : f32 to vector<32x128xf32>
    %81 = arith.mulf %80, %76 : vector<32x128xf32>
    %82 = arith.addf %79, %81 : vector<32x128xf32>
    %83 = vector.broadcast %16 : f32 to vector<32x128xf32>
    %84 = arith.addf %82, %83 : vector<32x128xf32>
    %cst_32 = arith.constant 0.000000e+00 : f32
    %85 = vector.broadcast %cst_32 : f32 to vector<32x128xf32>
    %86 = arith.maximumf %84, %85 : vector<32x128xf32>
    %87 = vector.broadcast %24 : f32 to vector<32x128xf32>
    %88 = arith.mulf %87, %86 : vector<32x128xf32>
    %89 = arith.addf %77, %88 : vector<32x128xf32>
    %90 = vector.broadcast %1 : f32 to vector<32x128xf32>
    %91 = arith.mulf %90, %70 : vector<32x128xf32>
    %92 = vector.broadcast %9 : f32 to vector<32x128xf32>
    %93 = arith.mulf %92, %76 : vector<32x128xf32>
    %94 = arith.addf %91, %93 : vector<32x128xf32>
    %95 = vector.broadcast %17 : f32 to vector<32x128xf32>
    %96 = arith.addf %94, %95 : vector<32x128xf32>
    %cst_33 = arith.constant 0.000000e+00 : f32
    %97 = vector.broadcast %cst_33 : f32 to vector<32x128xf32>
    %98 = arith.maximumf %96, %97 : vector<32x128xf32>
    %99 = vector.broadcast %25 : f32 to vector<32x128xf32>
    %100 = arith.mulf %99, %98 : vector<32x128xf32>
    %101 = arith.addf %89, %100 : vector<32x128xf32>
    %102 = vector.broadcast %2 : f32 to vector<32x128xf32>
    %103 = arith.mulf %102, %70 : vector<32x128xf32>
    %104 = vector.broadcast %10 : f32 to vector<32x128xf32>
    %105 = arith.mulf %104, %76 : vector<32x128xf32>
    %106 = arith.addf %103, %105 : vector<32x128xf32>
    %107 = vector.broadcast %18 : f32 to vector<32x128xf32>
    %108 = arith.addf %106, %107 : vector<32x128xf32>
    %cst_34 = arith.constant 0.000000e+00 : f32
    %109 = vector.broadcast %cst_34 : f32 to vector<32x128xf32>
    %110 = arith.maximumf %108, %109 : vector<32x128xf32>
    %111 = vector.broadcast %26 : f32 to vector<32x128xf32>
    %112 = arith.mulf %111, %110 : vector<32x128xf32>
    %113 = arith.addf %101, %112 : vector<32x128xf32>
    %114 = vector.broadcast %3 : f32 to vector<32x128xf32>
    %115 = arith.mulf %114, %70 : vector<32x128xf32>
    %116 = vector.broadcast %11 : f32 to vector<32x128xf32>
    %117 = arith.mulf %116, %76 : vector<32x128xf32>
    %118 = arith.addf %115, %117 : vector<32x128xf32>
    %119 = vector.broadcast %19 : f32 to vector<32x128xf32>
    %120 = arith.addf %118, %119 : vector<32x128xf32>
    %cst_35 = arith.constant 0.000000e+00 : f32
    %121 = vector.broadcast %cst_35 : f32 to vector<32x128xf32>
    %122 = arith.maximumf %120, %121 : vector<32x128xf32>
    %123 = vector.broadcast %27 : f32 to vector<32x128xf32>
    %124 = arith.mulf %123, %122 : vector<32x128xf32>
    %125 = arith.addf %113, %124 : vector<32x128xf32>
    %126 = vector.broadcast %4 : f32 to vector<32x128xf32>
    %127 = arith.mulf %126, %70 : vector<32x128xf32>
    %128 = vector.broadcast %12 : f32 to vector<32x128xf32>
    %129 = arith.mulf %128, %76 : vector<32x128xf32>
    %130 = arith.addf %127, %129 : vector<32x128xf32>
    %131 = vector.broadcast %20 : f32 to vector<32x128xf32>
    %132 = arith.addf %130, %131 : vector<32x128xf32>
    %cst_36 = arith.constant 0.000000e+00 : f32
    %133 = vector.broadcast %cst_36 : f32 to vector<32x128xf32>
    %134 = arith.maximumf %132, %133 : vector<32x128xf32>
    %135 = vector.broadcast %28 : f32 to vector<32x128xf32>
    %136 = arith.mulf %135, %134 : vector<32x128xf32>
    %137 = arith.addf %125, %136 : vector<32x128xf32>
    %138 = vector.broadcast %5 : f32 to vector<32x128xf32>
    %139 = arith.mulf %138, %70 : vector<32x128xf32>
    %140 = vector.broadcast %13 : f32 to vector<32x128xf32>
    %141 = arith.mulf %140, %76 : vector<32x128xf32>
    %142 = arith.addf %139, %141 : vector<32x128xf32>
    %143 = vector.broadcast %21 : f32 to vector<32x128xf32>
    %144 = arith.addf %142, %143 : vector<32x128xf32>
    %cst_37 = arith.constant 0.000000e+00 : f32
    %145 = vector.broadcast %cst_37 : f32 to vector<32x128xf32>
    %146 = arith.maximumf %144, %145 : vector<32x128xf32>
    %147 = vector.broadcast %29 : f32 to vector<32x128xf32>
    %148 = arith.mulf %147, %146 : vector<32x128xf32>
    %149 = arith.addf %137, %148 : vector<32x128xf32>
    %150 = vector.broadcast %6 : f32 to vector<32x128xf32>
    %151 = arith.mulf %150, %70 : vector<32x128xf32>
    %152 = vector.broadcast %14 : f32 to vector<32x128xf32>
    %153 = arith.mulf %152, %76 : vector<32x128xf32>
    %154 = arith.addf %151, %153 : vector<32x128xf32>
    %155 = vector.broadcast %22 : f32 to vector<32x128xf32>
    %156 = arith.addf %154, %155 : vector<32x128xf32>
    %cst_38 = arith.constant 0.000000e+00 : f32
    %157 = vector.broadcast %cst_38 : f32 to vector<32x128xf32>
    %158 = arith.maximumf %156, %157 : vector<32x128xf32>
    %159 = vector.broadcast %30 : f32 to vector<32x128xf32>
    %160 = arith.mulf %159, %158 : vector<32x128xf32>
    %161 = arith.addf %149, %160 : vector<32x128xf32>
    %162 = vector.broadcast %7 : f32 to vector<32x128xf32>
    %163 = arith.mulf %162, %70 : vector<32x128xf32>
    %164 = vector.broadcast %15 : f32 to vector<32x128xf32>
    %165 = arith.mulf %164, %76 : vector<32x128xf32>
    %166 = arith.addf %163, %165 : vector<32x128xf32>
    %167 = vector.broadcast %23 : f32 to vector<32x128xf32>
    %168 = arith.addf %166, %167 : vector<32x128xf32>
    %cst_39 = arith.constant 0.000000e+00 : f32
    %169 = vector.broadcast %cst_39 : f32 to vector<32x128xf32>
    %170 = arith.maximumf %168, %169 : vector<32x128xf32>
    %171 = vector.broadcast %31 : f32 to vector<32x128xf32>
    %172 = arith.mulf %171, %170 : vector<32x128xf32>
    %173 = arith.addf %161, %172 : vector<32x128xf32>
    %cst_40 = arith.constant 0.000000e+00 : f32
    %174 = vector.broadcast %cst_40 : f32 to vector<32x128xf32>
    %175 = arith.subf %174, %173 : vector<32x128xf32>
    %176 = math.exp %175 : vector<32x128xf32>
    %cst_41 = arith.constant 1.000000e+00 : f32
    %177 = vector.broadcast %cst_41 : f32 to vector<32x128xf32>
    %178 = arith.addf %177, %176 : vector<32x128xf32>
    %179 = tpu.reciprocal %178 {approx = true} : vector<32x128xf32> -> vector<32x128xf32>
    %c0_42 = arith.constant 0 : index
    %c0_43 = arith.constant 0 : index
    %c0_44 = arith.constant 0 : index
    %180 = vector.load %arg8[%c0_42, %c0_43, %c0_44] : memref<2x32x128xf32, #tpu.memory_space<vmem>>, vector<1x32x128xf32>
    %181 = vector.shape_cast %180 : vector<1x32x128xf32> to vector<32x128xf32>
    %182 = vector.shape_cast %70 : vector<32x128xf32> to vector<1x32x128xf32>
    tpu.vector_store %arg8[%c0_42, %c0_43, %c0_44], %182 {strides = array<i32>} : memref<2x32x128xf32, #tpu.memory_space<vmem>>, vector<1x32x128xf32>,
    %c0_45 = arith.constant 0 : index
    %c0_46 = arith.constant 0 : index
    %c0_47 = arith.constant 0 : index
    %183 = vector.load %arg9[%c0_45, %c0_46, %c0_47] : memref<2x32x128xf32, #tpu.memory_space<vmem>>, vector<1x32x128xf32>
    %184 = vector.shape_cast %183 : vector<1x32x128xf32> to vector<32x128xf32>
    %185 = vector.shape_cast %76 : vector<32x128xf32> to vector<1x32x128xf32>
    tpu.vector_store %arg9[%c0_45, %c0_46, %c0_47], %185 {strides = array<i32>} : memref<2x32x128xf32, #tpu.memory_space<vmem>>, vector<1x32x128xf32>,
    %c0_48 = arith.constant 0 : index
    %c0_49 = arith.constant 0 : index
    %c0_50 = arith.constant 0 : index
    %186 = vector.load %arg10[%c0_48, %c0_49, %c0_50] : memref<2x32x128xf32, #tpu.memory_space<vmem>>, vector<1x32x128xf32>
    %187 = vector.shape_cast %186 : vector<1x32x128xf32> to vector<32x128xf32>
    %188 = vector.shape_cast %179 : vector<32x128xf32> to vector<1x32x128xf32>
    tpu.vector_store %arg10[%c0_48, %c0_49, %c0_50], %188 {strides = array<i32>} : memref<2x32x128xf32, #tpu.memory_space<vmem>>, vector<1x32x128xf32>,
    %c1_51 = arith.constant 1 : index
    %c0_52 = arith.constant 0 : index
    %189 = vector.load %arg1[%c1_51, %c0_52] : memref<2x256xf32, #tpu.memory_space<vmem>>, vector<1x128xf32>
    %190 = vector.shape_cast %189 : vector<1x128xf32> to vector<1x128xf32>
    %191 = vector.broadcast %190 : vector<1x128xf32> to vector<32x128xf32>
    %c0_i32_53 = arith.constant 0 : i32
    %192 = vector.broadcast %c0_i32_53 : i32 to vector<32x128xi32>
    %193 = arith.cmpi slt, %35, %192 : vector<32x128xi32>
    %c128_i32_54 = arith.constant 128 : i32
    %194 = vector.broadcast %c128_i32_54 : i32 to vector<32x128xi32>
    %195 = arith.addi %35, %194 : vector<32x128xi32>
    %196 = arith.select %193, %195, %35 : vector<32x128xi1>, vector<32x128xi32>
    %197 = vector.shape_cast %196 : vector<32x128xi32> to vector<32x128x1xi32>
    %198 = vector.shape_cast %197 : vector<32x128x1xi32> to vector<32x128xi32>
    %199 = tpu.dynamic_gather %191[%198] in [1] : vector<32x128xf32>, vector<32x128xi32> -> vector<32x128xf32>
    %c1_55 = arith.constant 1 : index
    %c128_56 = arith.constant 128 : index
    %200 = vector.load %arg1[%c1_55, %c128_56] : memref<2x256xf32, #tpu.memory_space<vmem>>, vector<1x128xf32>
    %201 = vector.shape_cast %200 : vector<1x128xf32> to vector<1x128xf32>
    %202 = vector.broadcast %201 : vector<1x128xf32> to vector<32x128xf32>
    %c0_i32_57 = arith.constant 0 : i32
    %203 = vector.broadcast %c0_i32_57 : i32 to vector<32x128xi32>
    %204 = arith.cmpi slt, %35, %203 : vector<32x128xi32>
    %c128_i32_58 = arith.constant 128 : i32
    %205 = vector.broadcast %c128_i32_58 : i32 to vector<32x128xi32>
    %206 = arith.addi %35, %205 : vector<32x128xi32>
    %207 = arith.select %204, %206, %35 : vector<32x128xi1>, vector<32x128xi32>
    %208 = vector.shape_cast %207 : vector<32x128xi32> to vector<32x128x1xi32>
    %209 = vector.shape_cast %208 : vector<32x128x1xi32> to vector<32x128xi32>
    %210 = tpu.dynamic_gather %202[%209] in [1] : vector<32x128xf32>, vector<32x128xi32> -> vector<32x128xf32>
    %c1_i32_59 = arith.constant 1 : i32
    %211 = vector.broadcast %c1_i32_59 : i32 to vector<32x128xi32>
    %212 = arith.cmpi eq, %37, %211 : vector<32x128xi32>
    %213 = arith.select %212, %210, %199 : vector<32x128xi1>, vector<32x128xf32>
    %c1_60 = arith.constant 1 : index
    %c0_61 = arith.constant 0 : index
    %c0_62 = arith.constant 0 : index
    %214 = vector.load %arg3[%c1_60, %c0_61, %c0_62] : memref<2x32x128xf32, #tpu.memory_space<vmem>>, vector<1x32x128xf32>
    %215 = vector.shape_cast %214 : vector<1x32x128xf32> to vector<32x128xf32>
    %cst_63 = arith.constant 1.000000e+00 : f32
    %216 = vector.broadcast %cst_63 : f32 to vector<32x128xf32>
    %217 = arith.subf %213, %216 : vector<32x128xf32>
    %cst_64 = arith.constant 3.125000e-02 : f32
    %218 = vector.broadcast %cst_64 : f32 to vector<32x128xf32>
    %219 = arith.addf %217, %218 : vector<32x128xf32>
    %cst_65 = arith.constant 3.200000e+01 : f32
    %220 = vector.broadcast %cst_65 : f32 to vector<32x128xf32>
    %221 = arith.mulf %219, %220 : vector<32x128xf32>
    %cst_66 = arith.constant 2.000000e-02 : f32
    %222 = vector.broadcast %cst_66 : f32 to vector<32x128xf32>
    %223 = arith.mulf %215, %222 : vector<32x128xf32>
    %cst_67 = arith.constant 9.99999974E-6 : f32
    %cst_68 = arith.constant 0.999989986 : f32
    %224 = vector.broadcast %cst_67 : f32 to vector<32x128xf32>
    %225 = arith.maximumf %224, %223 : vector<32x128xf32>
    %226 = vector.broadcast %cst_68 : f32 to vector<32x128xf32>
    %227 = arith.minimumf %226, %225 : vector<32x128xf32>
    %228 = vector.broadcast %32 : f32 to vector<32x128xf32>
    %229 = vector.broadcast %0 : f32 to vector<32x128xf32>
    %230 = arith.mulf %229, %221 : vector<32x128xf32>
    %231 = vector.broadcast %8 : f32 to vector<32x128xf32>
    %232 = arith.mulf %231, %227 : vector<32x128xf32>
    %233 = arith.addf %230, %232 : vector<32x128xf32>
    %234 = vector.broadcast %16 : f32 to vector<32x128xf32>
    %235 = arith.addf %233, %234 : vector<32x128xf32>
    %cst_69 = arith.constant 0.000000e+00 : f32
    %236 = vector.broadcast %cst_69 : f32 to vector<32x128xf32>
    %237 = arith.maximumf %235, %236 : vector<32x128xf32>
    %238 = vector.broadcast %24 : f32 to vector<32x128xf32>
    %239 = arith.mulf %238, %237 : vector<32x128xf32>
    %240 = arith.addf %228, %239 : vector<32x128xf32>
    %241 = vector.broadcast %1 : f32 to vector<32x128xf32>
    %242 = arith.mulf %241, %221 : vector<32x128xf32>
    %243 = vector.broadcast %9 : f32 to vector<32x128xf32>
    %244 = arith.mulf %243, %227 : vector<32x128xf32>
    %245 = arith.addf %242, %244 : vector<32x128xf32>
    %246 = vector.broadcast %17 : f32 to vector<32x128xf32>
    %247 = arith.addf %245, %246 : vector<32x128xf32>
    %cst_70 = arith.constant 0.000000e+00 : f32
    %248 = vector.broadcast %cst_70 : f32 to vector<32x128xf32>
    %249 = arith.maximumf %247, %248 : vector<32x128xf32>
    %250 = vector.broadcast %25 : f32 to vector<32x128xf32>
    %251 = arith.mulf %250, %249 : vector<32x128xf32>
    %252 = arith.addf %240, %251 : vector<32x128xf32>
    %253 = vector.broadcast %2 : f32 to vector<32x128xf32>
    %254 = arith.mulf %253, %221 : vector<32x128xf32>
    %255 = vector.broadcast %10 : f32 to vector<32x128xf32>
    %256 = arith.mulf %255, %227 : vector<32x128xf32>
    %257 = arith.addf %254, %256 : vector<32x128xf32>
    %258 = vector.broadcast %18 : f32 to vector<32x128xf32>
    %259 = arith.addf %257, %258 : vector<32x128xf32>
    %cst_71 = arith.constant 0.000000e+00 : f32
    %260 = vector.broadcast %cst_71 : f32 to vector<32x128xf32>
    %261 = arith.maximumf %259, %260 : vector<32x128xf32>
    %262 = vector.broadcast %26 : f32 to vector<32x128xf32>
    %263 = arith.mulf %262, %261 : vector<32x128xf32>
    %264 = arith.addf %252, %263 : vector<32x128xf32>
    %265 = vector.broadcast %3 : f32 to vector<32x128xf32>
    %266 = arith.mulf %265, %221 : vector<32x128xf32>
    %267 = vector.broadcast %11 : f32 to vector<32x128xf32>
    %268 = arith.mulf %267, %227 : vector<32x128xf32>
    %269 = arith.addf %266, %268 : vector<32x128xf32>
    %270 = vector.broadcast %19 : f32 to vector<32x128xf32>
    %271 = arith.addf %269, %270 : vector<32x128xf32>
    %cst_72 = arith.constant 0.000000e+00 : f32
    %272 = vector.broadcast %cst_72 : f32 to vector<32x128xf32>
    %273 = arith.maximumf %271, %272 : vector<32x128xf32>
    %274 = vector.broadcast %27 : f32 to vector<32x128xf32>
    %275 = arith.mulf %274, %273 : vector<32x128xf32>
    %276 = arith.addf %264, %275 : vector<32x128xf32>
    %277 = vector.broadcast %4 : f32 to vector<32x128xf32>
    %278 = arith.mulf %277, %221 : vector<32x128xf32>
    %279 = vector.broadcast %12 : f32 to vector<32x128xf32>
    %280 = arith.mulf %279, %227 : vector<32x128xf32>
    %281 = arith.addf %278, %280 : vector<32x128xf32>
    %282 = vector.broadcast %20 : f32 to vector<32x128xf32>
    %283 = arith.addf %281, %282 : vector<32x128xf32>
    %cst_73 = arith.constant 0.000000e+00 : f32
    %284 = vector.broadcast %cst_73 : f32 to vector<32x128xf32>
    %285 = arith.maximumf %283, %284 : vector<32x128xf32>
    %286 = vector.broadcast %28 : f32 to vector<32x128xf32>
    %287 = arith.mulf %286, %285 : vector<32x128xf32>
    %288 = arith.addf %276, %287 : vector<32x128xf32>
    %289 = vector.broadcast %5 : f32 to vector<32x128xf32>
    %290 = arith.mulf %289, %221 : vector<32x128xf32>
    %291 = vector.broadcast %13 : f32 to vector<32x128xf32>
    %292 = arith.mulf %291, %227 : vector<32x128xf32>
    %293 = arith.addf %290, %292 : vector<32x128xf32>
    %294 = vector.broadcast %21 : f32 to vector<32x128xf32>
    %295 = arith.addf %293, %294 : vector<32x128xf32>
    %cst_74 = arith.constant 0.000000e+00 : f32
    %296 = vector.broadcast %cst_74 : f32 to vector<32x128xf32>
    %297 = arith.maximumf %295, %296 : vector<32x128xf32>
    %298 = vector.broadcast %29 : f32 to vector<32x128xf32>
    %299 = arith.mulf %298, %297 : vector<32x128xf32>
    %300 = arith.addf %288, %299 : vector<32x128xf32>
    %301 = vector.broadcast %6 : f32 to vector<32x128xf32>
    %302 = arith.mulf %301, %221 : vector<32x128xf32>
    %303 = vector.broadcast %14 : f32 to vector<32x128xf32>
    %304 = arith.mulf %303, %227 : vector<32x128xf32>
    %305 = arith.addf %302, %304 : vector<32x128xf32>
    %306 = vector.broadcast %22 : f32 to vector<32x128xf32>
    %307 = arith.addf %305, %306 : vector<32x128xf32>
    %cst_75 = arith.constant 0.000000e+00 : f32
    %308 = vector.broadcast %cst_75 : f32 to vector<32x128xf32>
    %309 = arith.maximumf %307, %308 : vector<32x128xf32>
    %310 = vector.broadcast %30 : f32 to vector<32x128xf32>
    %311 = arith.mulf %310, %309 : vector<32x128xf32>
    %312 = arith.addf %300, %311 : vector<32x128xf32>
    %313 = vector.broadcast %7 : f32 to vector<32x128xf32>
    %314 = arith.mulf %313, %221 : vector<32x128xf32>
    %315 = vector.broadcast %15 : f32 to vector<32x128xf32>
    %316 = arith.mulf %315, %227 : vector<32x128xf32>
    %317 = arith.addf %314, %316 : vector<32x128xf32>
    %318 = vector.broadcast %23 : f32 to vector<32x128xf32>
    %319 = arith.addf %317, %318 : vector<32x128xf32>
    %cst_76 = arith.constant 0.000000e+00 : f32
    %320 = vector.broadcast %cst_76 : f32 to vector<32x128xf32>
    %321 = arith.maximumf %319, %320 : vector<32x128xf32>
    %322 = vector.broadcast %31 : f32 to vector<32x128xf32>
    %323 = arith.mulf %322, %321 : vector<32x128xf32>
    %324 = arith.addf %312, %323 : vector<32x128xf32>
    %cst_77 = arith.constant 0.000000e+00 : f32
    %325 = vector.broadcast %cst_77 : f32 to vector<32x128xf32>
    %326 = arith.subf %325, %324 : vector<32x128xf32>
    %327 = math.exp %326 : vector<32x128xf32>
    %cst_78 = arith.constant 1.000000e+00 : f32
    %328 = vector.broadcast %cst_78 : f32 to vector<32x128xf32>
    %329 = arith.addf %328, %327 : vector<32x128xf32>
    %330 = tpu.reciprocal %329 {approx = true} : vector<32x128xf32> -> vector<32x128xf32>
    %c1_79 = arith.constant 1 : index
    %c0_80 = arith.constant 0 : index
    %c0_81 = arith.constant 0 : index
    %331 = vector.load %arg8[%c1_79, %c0_80, %c0_81] : memref<2x32x128xf32, #tpu.memory_space<vmem>>, vector<1x32x128xf32>
    %332 = vector.shape_cast %331 : vector<1x32x128xf32> to vector<32x128xf32>
    %333 = vector.shape_cast %221 : vector<32x128xf32> to vector<1x32x128xf32>
    tpu.vector_store %arg8[%c1_79, %c0_80, %c0_81], %333 {strides = array<i32>} : memref<2x32x128xf32, #tpu.memory_space<vmem>>, vector<1x32x128xf32>,
    %c1_82 = arith.constant 1 : index
    %c0_83 = arith.constant 0 : index
    %c0_84 = arith.constant 0 : index
    %334 = vector.load %arg9[%c1_82, %c0_83, %c0_84] : memref<2x32x128xf32, #tpu.memory_space<vmem>>, vector<1x32x128xf32>
    %335 = vector.shape_cast %334 : vector<1x32x128xf32> to vector<32x128xf32>
    %336 = vector.shape_cast %227 : vector<32x128xf32> to vector<1x32x128xf32>
    tpu.vector_store %arg9[%c1_82, %c0_83, %c0_84], %336 {strides = array<i32>} : memref<2x32x128xf32, #tpu.memory_space<vmem>>, vector<1x32x128xf32>,
    %c1_85 = arith.constant 1 : index
    %c0_86 = arith.constant 0 : index
    %c0_87 = arith.constant 0 : index
    %337 = vector.load %arg10[%c1_85, %c0_86, %c0_87] : memref<2x32x128xf32, #tpu.memory_space<vmem>>, vector<1x32x128xf32>
    %338 = vector.shape_cast %337 : vector<1x32x128xf32> to vector<32x128xf32>
    %339 = vector.shape_cast %330 : vector<32x128xf32> to vector<1x32x128xf32>
    tpu.vector_store %arg10[%c1_85, %c0_86, %c0_87], %339 {strides = array<i32>} : memref<2x32x128xf32, #tpu.memory_space<vmem>>, vector<1x32x128xf32>,
    return
  }
  func.func @transform_0(%arg0: i32) -> (i32, i32) {
    %c0_i32 = arith.constant 0 : i32
    %c0_i32_0 = arith.constant 0 : i32
    %c0_i32_1 = arith.constant 0 : i32
    return %c0_i32, %c0_i32_0 : i32, i32
  }
  func.func @transform_1(%arg0: i32) -> (i32, i32) {
    %c0_i32 = arith.constant 0 : i32
    %c0_i32_0 = arith.constant 0 : i32
    return %arg0, %c0_i32 : i32, i32
  }
  func.func @transform_2(%arg0: i32) -> (i32, i32, i32) {
    %c0_i32 = arith.constant 0 : i32
    %c0_i32_0 = arith.constant 0 : i32
    %c0_i32_1 = arith.constant 0 : i32
    return %c0_i32, %arg0, %c0_i32_0 : i32, i32, i32
  }
  func.func @transform_3(%arg0: i32) -> i32 {
    %c0_i32 = arith.constant 0 : i32
    %c0_i32_0 = arith.constant 0 : i32
    return %c0_i32 : i32
  }
  func.func @transform_4(%arg0: i32) -> i32 {
    %c0_i32 = arith.constant 0 : i32
    %c0_i32_0 = arith.constant 0 : i32
    return %c0_i32 : i32
  }
  func.func @transform_5(%arg0: i32) -> i32 {
    %c0_i32 = arith.constant 0 : i32
    %c0_i32_0 = arith.constant 0 : i32
    return %c0_i32 : i32
  }
  func.func @transform_6(%arg0: i32) -> i32 {
    %c0_i32 = arith.constant 0 : i32
    %c0_i32_0 = arith.constant 0 : i32
    return %c0_i32 : i32
  }
  func.func @transform_7(%arg0: i32) -> (i32, i32, i32) {
    %c0_i32 = arith.constant 0 : i32
    %c0_i32_0 = arith.constant 0 : i32
    %c0_i32_1 = arith.constant 0 : i32
    return %c0_i32, %arg0, %c0_i32_0 : i32, i32, i32
  }
  func.func @transform_8(%arg0: i32) -> (i32, i32, i32) {
    %c0_i32 = arith.constant 0 : i32
    %c0_i32_0 = arith.constant 0 : i32
    %c0_i32_1 = arith.constant 0 : i32
    return %c0_i32, %arg0, %c0_i32_0 : i32, i32, i32
  }
  func.func @transform_9(%arg0: i32) -> (i32, i32, i32) {
    %c0_i32 = arith.constant 0 : i32
    %c0_i32_0 = arith.constant 0 : i32
    %c0_i32_1 = arith.constant 0 : i32
    return %c0_i32, %arg0, %c0_i32_0 : i32, i32, i32
  }
}

module attributes {stable_mosaic.version = 11 : i64} {
  func.func @_dense_fused_kernel(%arg0: i32, %arg1: memref<2x32x128xf32, #tpu.memory_space<vmem>>, %arg2: memref<2x32x128xf32, #tpu.memory_space<vmem>>, %arg3: memref<16xf32, #tpu.memory_space<smem>>, %arg4: memref<8xf32, #tpu.memory_space<smem>>, %arg5: memref<8xf32, #tpu.memory_space<smem>>, %arg6: memref<1xf32, #tpu.memory_space<smem>>, %arg7: memref<2x32x128xf32, #tpu.memory_space<vmem>>, %arg8: memref<2x32x128xf32, #tpu.memory_space<vmem>>, %arg9: memref<2x32x128xf32, #tpu.memory_space<vmem>>) attributes {dimension_semantics = [#tpu.dimension_semantics<parallel>], iteration_bounds = array<i64: 8>, scalar_prefetch = 0 : i64, scratch_operands = 0 : i64, tpu.core_type = #tpu.core_type<tc>, window_params = [{transform_indices = @transform_0, window_bounds = array<i64: 2, 32, 128>}, {transform_indices = @transform_1, window_bounds = array<i64: 2, 32, 128>}, {transform_indices = @transform_2, window_bounds = array<i64: 16>}, {transform_indices = @transform_3, window_bounds = array<i64: 8>}, {transform_indices = @transform_4, window_bounds = array<i64: 8>}, {transform_indices = @transform_5, window_bounds = array<i64: 1>}, {transform_indices = @transform_6, window_bounds = array<i64: 2, 32, 128>}, {transform_indices = @transform_7, window_bounds = array<i64: 2, 32, 128>}, {transform_indices = @transform_8, window_bounds = array<i64: 2, 32, 128>}]} {
    %c0 = arith.constant 0 : index
    %0 = memref.load %arg3[%c0] : memref<16xf32, #tpu.memory_space<smem>>
    %c2 = arith.constant 2 : index
    %1 = memref.load %arg3[%c2] : memref<16xf32, #tpu.memory_space<smem>>
    %c4 = arith.constant 4 : index
    %2 = memref.load %arg3[%c4] : memref<16xf32, #tpu.memory_space<smem>>
    %c6 = arith.constant 6 : index
    %3 = memref.load %arg3[%c6] : memref<16xf32, #tpu.memory_space<smem>>
    %c8 = arith.constant 8 : index
    %4 = memref.load %arg3[%c8] : memref<16xf32, #tpu.memory_space<smem>>
    %c10 = arith.constant 10 : index
    %5 = memref.load %arg3[%c10] : memref<16xf32, #tpu.memory_space<smem>>
    %c12 = arith.constant 12 : index
    %6 = memref.load %arg3[%c12] : memref<16xf32, #tpu.memory_space<smem>>
    %c14 = arith.constant 14 : index
    %7 = memref.load %arg3[%c14] : memref<16xf32, #tpu.memory_space<smem>>
    %c1 = arith.constant 1 : index
    %8 = memref.load %arg3[%c1] : memref<16xf32, #tpu.memory_space<smem>>
    %c3 = arith.constant 3 : index
    %9 = memref.load %arg3[%c3] : memref<16xf32, #tpu.memory_space<smem>>
    %c5 = arith.constant 5 : index
    %10 = memref.load %arg3[%c5] : memref<16xf32, #tpu.memory_space<smem>>
    %c7 = arith.constant 7 : index
    %11 = memref.load %arg3[%c7] : memref<16xf32, #tpu.memory_space<smem>>
    %c9 = arith.constant 9 : index
    %12 = memref.load %arg3[%c9] : memref<16xf32, #tpu.memory_space<smem>>
    %c11 = arith.constant 11 : index
    %13 = memref.load %arg3[%c11] : memref<16xf32, #tpu.memory_space<smem>>
    %c13 = arith.constant 13 : index
    %14 = memref.load %arg3[%c13] : memref<16xf32, #tpu.memory_space<smem>>
    %c15 = arith.constant 15 : index
    %15 = memref.load %arg3[%c15] : memref<16xf32, #tpu.memory_space<smem>>
    %c0_0 = arith.constant 0 : index
    %16 = memref.load %arg4[%c0_0] : memref<8xf32, #tpu.memory_space<smem>>
    %c1_1 = arith.constant 1 : index
    %17 = memref.load %arg4[%c1_1] : memref<8xf32, #tpu.memory_space<smem>>
    %c2_2 = arith.constant 2 : index
    %18 = memref.load %arg4[%c2_2] : memref<8xf32, #tpu.memory_space<smem>>
    %c3_3 = arith.constant 3 : index
    %19 = memref.load %arg4[%c3_3] : memref<8xf32, #tpu.memory_space<smem>>
    %c4_4 = arith.constant 4 : index
    %20 = memref.load %arg4[%c4_4] : memref<8xf32, #tpu.memory_space<smem>>
    %c5_5 = arith.constant 5 : index
    %21 = memref.load %arg4[%c5_5] : memref<8xf32, #tpu.memory_space<smem>>
    %c6_6 = arith.constant 6 : index
    %22 = memref.load %arg4[%c6_6] : memref<8xf32, #tpu.memory_space<smem>>
    %c7_7 = arith.constant 7 : index
    %23 = memref.load %arg4[%c7_7] : memref<8xf32, #tpu.memory_space<smem>>
    %c0_8 = arith.constant 0 : index
    %24 = memref.load %arg5[%c0_8] : memref<8xf32, #tpu.memory_space<smem>>
    %c1_9 = arith.constant 1 : index
    %25 = memref.load %arg5[%c1_9] : memref<8xf32, #tpu.memory_space<smem>>
    %c2_10 = arith.constant 2 : index
    %26 = memref.load %arg5[%c2_10] : memref<8xf32, #tpu.memory_space<smem>>
    %c3_11 = arith.constant 3 : index
    %27 = memref.load %arg5[%c3_11] : memref<8xf32, #tpu.memory_space<smem>>
    %c4_12 = arith.constant 4 : index
    %28 = memref.load %arg5[%c4_12] : memref<8xf32, #tpu.memory_space<smem>>
    %c5_13 = arith.constant 5 : index
    %29 = memref.load %arg5[%c5_13] : memref<8xf32, #tpu.memory_space<smem>>
    %c6_14 = arith.constant 6 : index
    %30 = memref.load %arg5[%c6_14] : memref<8xf32, #tpu.memory_space<smem>>
    %c7_15 = arith.constant 7 : index
    %31 = memref.load %arg5[%c7_15] : memref<8xf32, #tpu.memory_space<smem>>
    %c0_16 = arith.constant 0 : index
    %32 = memref.load %arg6[%c0_16] : memref<1xf32, #tpu.memory_space<smem>>
    %c0_17 = arith.constant 0 : index
    %c0_18 = arith.constant 0 : index
    %c0_19 = arith.constant 0 : index
    %33 = vector.load %arg1[%c0_17, %c0_18, %c0_19] : memref<2x32x128xf32, #tpu.memory_space<vmem>>, vector<1x32x128xf32>
    %34 = vector.shape_cast %33 : vector<1x32x128xf32> to vector<32x128xf32>
    %c0_20 = arith.constant 0 : index
    %c0_21 = arith.constant 0 : index
    %c0_22 = arith.constant 0 : index
    %35 = vector.load %arg2[%c0_20, %c0_21, %c0_22] : memref<2x32x128xf32, #tpu.memory_space<vmem>>, vector<1x32x128xf32>
    %36 = vector.shape_cast %35 : vector<1x32x128xf32> to vector<32x128xf32>
    %cst = arith.constant 1.000000e+00 : f32
    %37 = vector.broadcast %cst : f32 to vector<32x128xf32>
    %38 = arith.subf %34, %37 : vector<32x128xf32>
    %cst_23 = arith.constant 3.125000e-02 : f32
    %39 = vector.broadcast %cst_23 : f32 to vector<32x128xf32>
    %40 = arith.addf %38, %39 : vector<32x128xf32>
    %cst_24 = arith.constant 3.200000e+01 : f32
    %41 = vector.broadcast %cst_24 : f32 to vector<32x128xf32>
    %42 = arith.mulf %40, %41 : vector<32x128xf32>
    %cst_25 = arith.constant 2.000000e-02 : f32
    %43 = vector.broadcast %cst_25 : f32 to vector<32x128xf32>
    %44 = arith.mulf %36, %43 : vector<32x128xf32>
    %cst_26 = arith.constant 9.99999974E-6 : f32
    %cst_27 = arith.constant 0.999989986 : f32
    %45 = vector.broadcast %cst_26 : f32 to vector<32x128xf32>
    %46 = arith.maximumf %45, %44 : vector<32x128xf32>
    %47 = vector.broadcast %cst_27 : f32 to vector<32x128xf32>
    %48 = arith.minimumf %47, %46 : vector<32x128xf32>
    %49 = vector.broadcast %32 : f32 to vector<32x128xf32>
    %50 = vector.broadcast %0 : f32 to vector<32x128xf32>
    %51 = arith.mulf %50, %42 : vector<32x128xf32>
    %52 = vector.broadcast %8 : f32 to vector<32x128xf32>
    %53 = arith.mulf %52, %48 : vector<32x128xf32>
    %54 = arith.addf %51, %53 : vector<32x128xf32>
    %55 = vector.broadcast %16 : f32 to vector<32x128xf32>
    %56 = arith.addf %54, %55 : vector<32x128xf32>
    %cst_28 = arith.constant 0.000000e+00 : f32
    %57 = vector.broadcast %cst_28 : f32 to vector<32x128xf32>
    %58 = arith.maximumf %56, %57 : vector<32x128xf32>
    %59 = vector.broadcast %24 : f32 to vector<32x128xf32>
    %60 = arith.mulf %59, %58 : vector<32x128xf32>
    %61 = arith.addf %49, %60 : vector<32x128xf32>
    %62 = vector.broadcast %1 : f32 to vector<32x128xf32>
    %63 = arith.mulf %62, %42 : vector<32x128xf32>
    %64 = vector.broadcast %9 : f32 to vector<32x128xf32>
    %65 = arith.mulf %64, %48 : vector<32x128xf32>
    %66 = arith.addf %63, %65 : vector<32x128xf32>
    %67 = vector.broadcast %17 : f32 to vector<32x128xf32>
    %68 = arith.addf %66, %67 : vector<32x128xf32>
    %cst_29 = arith.constant 0.000000e+00 : f32
    %69 = vector.broadcast %cst_29 : f32 to vector<32x128xf32>
    %70 = arith.maximumf %68, %69 : vector<32x128xf32>
    %71 = vector.broadcast %25 : f32 to vector<32x128xf32>
    %72 = arith.mulf %71, %70 : vector<32x128xf32>
    %73 = arith.addf %61, %72 : vector<32x128xf32>
    %74 = vector.broadcast %2 : f32 to vector<32x128xf32>
    %75 = arith.mulf %74, %42 : vector<32x128xf32>
    %76 = vector.broadcast %10 : f32 to vector<32x128xf32>
    %77 = arith.mulf %76, %48 : vector<32x128xf32>
    %78 = arith.addf %75, %77 : vector<32x128xf32>
    %79 = vector.broadcast %18 : f32 to vector<32x128xf32>
    %80 = arith.addf %78, %79 : vector<32x128xf32>
    %cst_30 = arith.constant 0.000000e+00 : f32
    %81 = vector.broadcast %cst_30 : f32 to vector<32x128xf32>
    %82 = arith.maximumf %80, %81 : vector<32x128xf32>
    %83 = vector.broadcast %26 : f32 to vector<32x128xf32>
    %84 = arith.mulf %83, %82 : vector<32x128xf32>
    %85 = arith.addf %73, %84 : vector<32x128xf32>
    %86 = vector.broadcast %3 : f32 to vector<32x128xf32>
    %87 = arith.mulf %86, %42 : vector<32x128xf32>
    %88 = vector.broadcast %11 : f32 to vector<32x128xf32>
    %89 = arith.mulf %88, %48 : vector<32x128xf32>
    %90 = arith.addf %87, %89 : vector<32x128xf32>
    %91 = vector.broadcast %19 : f32 to vector<32x128xf32>
    %92 = arith.addf %90, %91 : vector<32x128xf32>
    %cst_31 = arith.constant 0.000000e+00 : f32
    %93 = vector.broadcast %cst_31 : f32 to vector<32x128xf32>
    %94 = arith.maximumf %92, %93 : vector<32x128xf32>
    %95 = vector.broadcast %27 : f32 to vector<32x128xf32>
    %96 = arith.mulf %95, %94 : vector<32x128xf32>
    %97 = arith.addf %85, %96 : vector<32x128xf32>
    %98 = vector.broadcast %4 : f32 to vector<32x128xf32>
    %99 = arith.mulf %98, %42 : vector<32x128xf32>
    %100 = vector.broadcast %12 : f32 to vector<32x128xf32>
    %101 = arith.mulf %100, %48 : vector<32x128xf32>
    %102 = arith.addf %99, %101 : vector<32x128xf32>
    %103 = vector.broadcast %20 : f32 to vector<32x128xf32>
    %104 = arith.addf %102, %103 : vector<32x128xf32>
    %cst_32 = arith.constant 0.000000e+00 : f32
    %105 = vector.broadcast %cst_32 : f32 to vector<32x128xf32>
    %106 = arith.maximumf %104, %105 : vector<32x128xf32>
    %107 = vector.broadcast %28 : f32 to vector<32x128xf32>
    %108 = arith.mulf %107, %106 : vector<32x128xf32>
    %109 = arith.addf %97, %108 : vector<32x128xf32>
    %110 = vector.broadcast %5 : f32 to vector<32x128xf32>
    %111 = arith.mulf %110, %42 : vector<32x128xf32>
    %112 = vector.broadcast %13 : f32 to vector<32x128xf32>
    %113 = arith.mulf %112, %48 : vector<32x128xf32>
    %114 = arith.addf %111, %113 : vector<32x128xf32>
    %115 = vector.broadcast %21 : f32 to vector<32x128xf32>
    %116 = arith.addf %114, %115 : vector<32x128xf32>
    %cst_33 = arith.constant 0.000000e+00 : f32
    %117 = vector.broadcast %cst_33 : f32 to vector<32x128xf32>
    %118 = arith.maximumf %116, %117 : vector<32x128xf32>
    %119 = vector.broadcast %29 : f32 to vector<32x128xf32>
    %120 = arith.mulf %119, %118 : vector<32x128xf32>
    %121 = arith.addf %109, %120 : vector<32x128xf32>
    %122 = vector.broadcast %6 : f32 to vector<32x128xf32>
    %123 = arith.mulf %122, %42 : vector<32x128xf32>
    %124 = vector.broadcast %14 : f32 to vector<32x128xf32>
    %125 = arith.mulf %124, %48 : vector<32x128xf32>
    %126 = arith.addf %123, %125 : vector<32x128xf32>
    %127 = vector.broadcast %22 : f32 to vector<32x128xf32>
    %128 = arith.addf %126, %127 : vector<32x128xf32>
    %cst_34 = arith.constant 0.000000e+00 : f32
    %129 = vector.broadcast %cst_34 : f32 to vector<32x128xf32>
    %130 = arith.maximumf %128, %129 : vector<32x128xf32>
    %131 = vector.broadcast %30 : f32 to vector<32x128xf32>
    %132 = arith.mulf %131, %130 : vector<32x128xf32>
    %133 = arith.addf %121, %132 : vector<32x128xf32>
    %134 = vector.broadcast %7 : f32 to vector<32x128xf32>
    %135 = arith.mulf %134, %42 : vector<32x128xf32>
    %136 = vector.broadcast %15 : f32 to vector<32x128xf32>
    %137 = arith.mulf %136, %48 : vector<32x128xf32>
    %138 = arith.addf %135, %137 : vector<32x128xf32>
    %139 = vector.broadcast %23 : f32 to vector<32x128xf32>
    %140 = arith.addf %138, %139 : vector<32x128xf32>
    %cst_35 = arith.constant 0.000000e+00 : f32
    %141 = vector.broadcast %cst_35 : f32 to vector<32x128xf32>
    %142 = arith.maximumf %140, %141 : vector<32x128xf32>
    %143 = vector.broadcast %31 : f32 to vector<32x128xf32>
    %144 = arith.mulf %143, %142 : vector<32x128xf32>
    %145 = arith.addf %133, %144 : vector<32x128xf32>
    %cst_36 = arith.constant 0.000000e+00 : f32
    %146 = vector.broadcast %cst_36 : f32 to vector<32x128xf32>
    %147 = arith.subf %146, %145 : vector<32x128xf32>
    %148 = math.exp %147 : vector<32x128xf32>
    %cst_37 = arith.constant 1.000000e+00 : f32
    %149 = vector.broadcast %cst_37 : f32 to vector<32x128xf32>
    %150 = arith.addf %149, %148 : vector<32x128xf32>
    %151 = tpu.reciprocal %150 {approx = true} : vector<32x128xf32> -> vector<32x128xf32>
    %c0_38 = arith.constant 0 : index
    %c0_39 = arith.constant 0 : index
    %c0_40 = arith.constant 0 : index
    %152 = vector.load %arg7[%c0_38, %c0_39, %c0_40] : memref<2x32x128xf32, #tpu.memory_space<vmem>>, vector<1x32x128xf32>
    %153 = vector.shape_cast %152 : vector<1x32x128xf32> to vector<32x128xf32>
    %154 = vector.shape_cast %42 : vector<32x128xf32> to vector<1x32x128xf32>
    tpu.vector_store %arg7[%c0_38, %c0_39, %c0_40], %154 {strides = array<i32>} : memref<2x32x128xf32, #tpu.memory_space<vmem>>, vector<1x32x128xf32>,
    %c0_41 = arith.constant 0 : index
    %c0_42 = arith.constant 0 : index
    %c0_43 = arith.constant 0 : index
    %155 = vector.load %arg8[%c0_41, %c0_42, %c0_43] : memref<2x32x128xf32, #tpu.memory_space<vmem>>, vector<1x32x128xf32>
    %156 = vector.shape_cast %155 : vector<1x32x128xf32> to vector<32x128xf32>
    %157 = vector.shape_cast %48 : vector<32x128xf32> to vector<1x32x128xf32>
    tpu.vector_store %arg8[%c0_41, %c0_42, %c0_43], %157 {strides = array<i32>} : memref<2x32x128xf32, #tpu.memory_space<vmem>>, vector<1x32x128xf32>,
    %c0_44 = arith.constant 0 : index
    %c0_45 = arith.constant 0 : index
    %c0_46 = arith.constant 0 : index
    %158 = vector.load %arg9[%c0_44, %c0_45, %c0_46] : memref<2x32x128xf32, #tpu.memory_space<vmem>>, vector<1x32x128xf32>
    %159 = vector.shape_cast %158 : vector<1x32x128xf32> to vector<32x128xf32>
    %160 = vector.shape_cast %151 : vector<32x128xf32> to vector<1x32x128xf32>
    tpu.vector_store %arg9[%c0_44, %c0_45, %c0_46], %160 {strides = array<i32>} : memref<2x32x128xf32, #tpu.memory_space<vmem>>, vector<1x32x128xf32>,
    %c1_47 = arith.constant 1 : index
    %c0_48 = arith.constant 0 : index
    %c0_49 = arith.constant 0 : index
    %161 = vector.load %arg1[%c1_47, %c0_48, %c0_49] : memref<2x32x128xf32, #tpu.memory_space<vmem>>, vector<1x32x128xf32>
    %162 = vector.shape_cast %161 : vector<1x32x128xf32> to vector<32x128xf32>
    %c1_50 = arith.constant 1 : index
    %c0_51 = arith.constant 0 : index
    %c0_52 = arith.constant 0 : index
    %163 = vector.load %arg2[%c1_50, %c0_51, %c0_52] : memref<2x32x128xf32, #tpu.memory_space<vmem>>, vector<1x32x128xf32>
    %164 = vector.shape_cast %163 : vector<1x32x128xf32> to vector<32x128xf32>
    %cst_53 = arith.constant 1.000000e+00 : f32
    %165 = vector.broadcast %cst_53 : f32 to vector<32x128xf32>
    %166 = arith.subf %162, %165 : vector<32x128xf32>
    %cst_54 = arith.constant 3.125000e-02 : f32
    %167 = vector.broadcast %cst_54 : f32 to vector<32x128xf32>
    %168 = arith.addf %166, %167 : vector<32x128xf32>
    %cst_55 = arith.constant 3.200000e+01 : f32
    %169 = vector.broadcast %cst_55 : f32 to vector<32x128xf32>
    %170 = arith.mulf %168, %169 : vector<32x128xf32>
    %cst_56 = arith.constant 2.000000e-02 : f32
    %171 = vector.broadcast %cst_56 : f32 to vector<32x128xf32>
    %172 = arith.mulf %164, %171 : vector<32x128xf32>
    %cst_57 = arith.constant 9.99999974E-6 : f32
    %cst_58 = arith.constant 0.999989986 : f32
    %173 = vector.broadcast %cst_57 : f32 to vector<32x128xf32>
    %174 = arith.maximumf %173, %172 : vector<32x128xf32>
    %175 = vector.broadcast %cst_58 : f32 to vector<32x128xf32>
    %176 = arith.minimumf %175, %174 : vector<32x128xf32>
    %177 = vector.broadcast %32 : f32 to vector<32x128xf32>
    %178 = vector.broadcast %0 : f32 to vector<32x128xf32>
    %179 = arith.mulf %178, %170 : vector<32x128xf32>
    %180 = vector.broadcast %8 : f32 to vector<32x128xf32>
    %181 = arith.mulf %180, %176 : vector<32x128xf32>
    %182 = arith.addf %179, %181 : vector<32x128xf32>
    %183 = vector.broadcast %16 : f32 to vector<32x128xf32>
    %184 = arith.addf %182, %183 : vector<32x128xf32>
    %cst_59 = arith.constant 0.000000e+00 : f32
    %185 = vector.broadcast %cst_59 : f32 to vector<32x128xf32>
    %186 = arith.maximumf %184, %185 : vector<32x128xf32>
    %187 = vector.broadcast %24 : f32 to vector<32x128xf32>
    %188 = arith.mulf %187, %186 : vector<32x128xf32>
    %189 = arith.addf %177, %188 : vector<32x128xf32>
    %190 = vector.broadcast %1 : f32 to vector<32x128xf32>
    %191 = arith.mulf %190, %170 : vector<32x128xf32>
    %192 = vector.broadcast %9 : f32 to vector<32x128xf32>
    %193 = arith.mulf %192, %176 : vector<32x128xf32>
    %194 = arith.addf %191, %193 : vector<32x128xf32>
    %195 = vector.broadcast %17 : f32 to vector<32x128xf32>
    %196 = arith.addf %194, %195 : vector<32x128xf32>
    %cst_60 = arith.constant 0.000000e+00 : f32
    %197 = vector.broadcast %cst_60 : f32 to vector<32x128xf32>
    %198 = arith.maximumf %196, %197 : vector<32x128xf32>
    %199 = vector.broadcast %25 : f32 to vector<32x128xf32>
    %200 = arith.mulf %199, %198 : vector<32x128xf32>
    %201 = arith.addf %189, %200 : vector<32x128xf32>
    %202 = vector.broadcast %2 : f32 to vector<32x128xf32>
    %203 = arith.mulf %202, %170 : vector<32x128xf32>
    %204 = vector.broadcast %10 : f32 to vector<32x128xf32>
    %205 = arith.mulf %204, %176 : vector<32x128xf32>
    %206 = arith.addf %203, %205 : vector<32x128xf32>
    %207 = vector.broadcast %18 : f32 to vector<32x128xf32>
    %208 = arith.addf %206, %207 : vector<32x128xf32>
    %cst_61 = arith.constant 0.000000e+00 : f32
    %209 = vector.broadcast %cst_61 : f32 to vector<32x128xf32>
    %210 = arith.maximumf %208, %209 : vector<32x128xf32>
    %211 = vector.broadcast %26 : f32 to vector<32x128xf32>
    %212 = arith.mulf %211, %210 : vector<32x128xf32>
    %213 = arith.addf %201, %212 : vector<32x128xf32>
    %214 = vector.broadcast %3 : f32 to vector<32x128xf32>
    %215 = arith.mulf %214, %170 : vector<32x128xf32>
    %216 = vector.broadcast %11 : f32 to vector<32x128xf32>
    %217 = arith.mulf %216, %176 : vector<32x128xf32>
    %218 = arith.addf %215, %217 : vector<32x128xf32>
    %219 = vector.broadcast %19 : f32 to vector<32x128xf32>
    %220 = arith.addf %218, %219 : vector<32x128xf32>
    %cst_62 = arith.constant 0.000000e+00 : f32
    %221 = vector.broadcast %cst_62 : f32 to vector<32x128xf32>
    %222 = arith.maximumf %220, %221 : vector<32x128xf32>
    %223 = vector.broadcast %27 : f32 to vector<32x128xf32>
    %224 = arith.mulf %223, %222 : vector<32x128xf32>
    %225 = arith.addf %213, %224 : vector<32x128xf32>
    %226 = vector.broadcast %4 : f32 to vector<32x128xf32>
    %227 = arith.mulf %226, %170 : vector<32x128xf32>
    %228 = vector.broadcast %12 : f32 to vector<32x128xf32>
    %229 = arith.mulf %228, %176 : vector<32x128xf32>
    %230 = arith.addf %227, %229 : vector<32x128xf32>
    %231 = vector.broadcast %20 : f32 to vector<32x128xf32>
    %232 = arith.addf %230, %231 : vector<32x128xf32>
    %cst_63 = arith.constant 0.000000e+00 : f32
    %233 = vector.broadcast %cst_63 : f32 to vector<32x128xf32>
    %234 = arith.maximumf %232, %233 : vector<32x128xf32>
    %235 = vector.broadcast %28 : f32 to vector<32x128xf32>
    %236 = arith.mulf %235, %234 : vector<32x128xf32>
    %237 = arith.addf %225, %236 : vector<32x128xf32>
    %238 = vector.broadcast %5 : f32 to vector<32x128xf32>
    %239 = arith.mulf %238, %170 : vector<32x128xf32>
    %240 = vector.broadcast %13 : f32 to vector<32x128xf32>
    %241 = arith.mulf %240, %176 : vector<32x128xf32>
    %242 = arith.addf %239, %241 : vector<32x128xf32>
    %243 = vector.broadcast %21 : f32 to vector<32x128xf32>
    %244 = arith.addf %242, %243 : vector<32x128xf32>
    %cst_64 = arith.constant 0.000000e+00 : f32
    %245 = vector.broadcast %cst_64 : f32 to vector<32x128xf32>
    %246 = arith.maximumf %244, %245 : vector<32x128xf32>
    %247 = vector.broadcast %29 : f32 to vector<32x128xf32>
    %248 = arith.mulf %247, %246 : vector<32x128xf32>
    %249 = arith.addf %237, %248 : vector<32x128xf32>
    %250 = vector.broadcast %6 : f32 to vector<32x128xf32>
    %251 = arith.mulf %250, %170 : vector<32x128xf32>
    %252 = vector.broadcast %14 : f32 to vector<32x128xf32>
    %253 = arith.mulf %252, %176 : vector<32x128xf32>
    %254 = arith.addf %251, %253 : vector<32x128xf32>
    %255 = vector.broadcast %22 : f32 to vector<32x128xf32>
    %256 = arith.addf %254, %255 : vector<32x128xf32>
    %cst_65 = arith.constant 0.000000e+00 : f32
    %257 = vector.broadcast %cst_65 : f32 to vector<32x128xf32>
    %258 = arith.maximumf %256, %257 : vector<32x128xf32>
    %259 = vector.broadcast %30 : f32 to vector<32x128xf32>
    %260 = arith.mulf %259, %258 : vector<32x128xf32>
    %261 = arith.addf %249, %260 : vector<32x128xf32>
    %262 = vector.broadcast %7 : f32 to vector<32x128xf32>
    %263 = arith.mulf %262, %170 : vector<32x128xf32>
    %264 = vector.broadcast %15 : f32 to vector<32x128xf32>
    %265 = arith.mulf %264, %176 : vector<32x128xf32>
    %266 = arith.addf %263, %265 : vector<32x128xf32>
    %267 = vector.broadcast %23 : f32 to vector<32x128xf32>
    %268 = arith.addf %266, %267 : vector<32x128xf32>
    %cst_66 = arith.constant 0.000000e+00 : f32
    %269 = vector.broadcast %cst_66 : f32 to vector<32x128xf32>
    %270 = arith.maximumf %268, %269 : vector<32x128xf32>
    %271 = vector.broadcast %31 : f32 to vector<32x128xf32>
    %272 = arith.mulf %271, %270 : vector<32x128xf32>
    %273 = arith.addf %261, %272 : vector<32x128xf32>
    %cst_67 = arith.constant 0.000000e+00 : f32
    %274 = vector.broadcast %cst_67 : f32 to vector<32x128xf32>
    %275 = arith.subf %274, %273 : vector<32x128xf32>
    %276 = math.exp %275 : vector<32x128xf32>
    %cst_68 = arith.constant 1.000000e+00 : f32
    %277 = vector.broadcast %cst_68 : f32 to vector<32x128xf32>
    %278 = arith.addf %277, %276 : vector<32x128xf32>
    %279 = tpu.reciprocal %278 {approx = true} : vector<32x128xf32> -> vector<32x128xf32>
    %c1_69 = arith.constant 1 : index
    %c0_70 = arith.constant 0 : index
    %c0_71 = arith.constant 0 : index
    %280 = vector.load %arg7[%c1_69, %c0_70, %c0_71] : memref<2x32x128xf32, #tpu.memory_space<vmem>>, vector<1x32x128xf32>
    %281 = vector.shape_cast %280 : vector<1x32x128xf32> to vector<32x128xf32>
    %282 = vector.shape_cast %170 : vector<32x128xf32> to vector<1x32x128xf32>
    tpu.vector_store %arg7[%c1_69, %c0_70, %c0_71], %282 {strides = array<i32>} : memref<2x32x128xf32, #tpu.memory_space<vmem>>, vector<1x32x128xf32>,
    %c1_72 = arith.constant 1 : index
    %c0_73 = arith.constant 0 : index
    %c0_74 = arith.constant 0 : index
    %283 = vector.load %arg8[%c1_72, %c0_73, %c0_74] : memref<2x32x128xf32, #tpu.memory_space<vmem>>, vector<1x32x128xf32>
    %284 = vector.shape_cast %283 : vector<1x32x128xf32> to vector<32x128xf32>
    %285 = vector.shape_cast %176 : vector<32x128xf32> to vector<1x32x128xf32>
    tpu.vector_store %arg8[%c1_72, %c0_73, %c0_74], %285 {strides = array<i32>} : memref<2x32x128xf32, #tpu.memory_space<vmem>>, vector<1x32x128xf32>,
    %c1_75 = arith.constant 1 : index
    %c0_76 = arith.constant 0 : index
    %c0_77 = arith.constant 0 : index
    %286 = vector.load %arg9[%c1_75, %c0_76, %c0_77] : memref<2x32x128xf32, #tpu.memory_space<vmem>>, vector<1x32x128xf32>
    %287 = vector.shape_cast %286 : vector<1x32x128xf32> to vector<32x128xf32>
    %288 = vector.shape_cast %279 : vector<32x128xf32> to vector<1x32x128xf32>
    tpu.vector_store %arg9[%c1_75, %c0_76, %c0_77], %288 {strides = array<i32>} : memref<2x32x128xf32, #tpu.memory_space<vmem>>, vector<1x32x128xf32>,
    return
  }
  func.func @transform_0(%arg0: i32) -> (i32, i32, i32) {
    %c0_i32 = arith.constant 0 : i32
    %c0_i32_0 = arith.constant 0 : i32
    %c0_i32_1 = arith.constant 0 : i32
    return %c0_i32, %arg0, %c0_i32_0 : i32, i32, i32
  }
  func.func @transform_1(%arg0: i32) -> (i32, i32, i32) {
    %c0_i32 = arith.constant 0 : i32
    %c0_i32_0 = arith.constant 0 : i32
    %c0_i32_1 = arith.constant 0 : i32
    return %c0_i32, %arg0, %c0_i32_0 : i32, i32, i32
  }
  func.func @transform_2(%arg0: i32) -> i32 {
    %c0_i32 = arith.constant 0 : i32
    %c0_i32_0 = arith.constant 0 : i32
    return %c0_i32 : i32
  }
  func.func @transform_3(%arg0: i32) -> i32 {
    %c0_i32 = arith.constant 0 : i32
    %c0_i32_0 = arith.constant 0 : i32
    return %c0_i32 : i32
  }
  func.func @transform_4(%arg0: i32) -> i32 {
    %c0_i32 = arith.constant 0 : i32
    %c0_i32_0 = arith.constant 0 : i32
    return %c0_i32 : i32
  }
  func.func @transform_5(%arg0: i32) -> i32 {
    %c0_i32 = arith.constant 0 : i32
    %c0_i32_0 = arith.constant 0 : i32
    return %c0_i32 : i32
  }
  func.func @transform_6(%arg0: i32) -> (i32, i32, i32) {
    %c0_i32 = arith.constant 0 : i32
    %c0_i32_0 = arith.constant 0 : i32
    %c0_i32_1 = arith.constant 0 : i32
    return %c0_i32, %arg0, %c0_i32_0 : i32, i32, i32
  }
  func.func @transform_7(%arg0: i32) -> (i32, i32, i32) {
    %c0_i32 = arith.constant 0 : i32
    %c0_i32_0 = arith.constant 0 : i32
    %c0_i32_1 = arith.constant 0 : i32
    return %c0_i32, %arg0, %c0_i32_0 : i32, i32, i32
  }
  func.func @transform_8(%arg0: i32) -> (i32, i32, i32) {
    %c0_i32 = arith.constant 0 : i32
    %c0_i32_0 = arith.constant 0 : i32
    %c0_i32_1 = arith.constant 0 : i32
    return %c0_i32, %arg0, %c0_i32_0 : i32, i32, i32
  }
}

</mosaic_0001>

<bundles_post_ra>
// kernel: tpu_custom_call.1
= control target key start
LH: loop header
LB: loop body
LE: loop exit
PB: predicated region body
PF: predicated region fallthrough
CT: control target
= control target key end

     0   :  { %s3216_s0 = inlined_call_operand.hbm [shape: f32[2,256], index: 0, kind: input, shape index: {}]   ;;  %s3217_s1 = inlined_call_operand.hbm [shape: s32[256,128], index: 1, kind: input, shape index: {}]   ;;  %s3218_s2 = inlined_call_operand.hbm [shape: f32[2,256,128], index: 2, kind: input, shape index: {}]   ;;  %s3219_s3 = inlined_call_operand.vmem [shape: f32[16], index: 3, kind: input, shape index: {}]   ;;  %s3220_s4 = inlined_call_operand.vmem [shape: f32[8], index: 4, kind: input, shape index: {}]   ;;  %s3221_s5 = inlined_call_operand.vmem [shape: f32[8], index: 5, kind: input, shape index: {}]   ;;  %s3222_s6 = inlined_call_operand.<no memory space> [shape: f32[1], index: 6, kind: input, shape index: {}]   ;;  %s3223_s7 = inlined_call_operand.hbm [shape: f32[2,256,128], index: 7, kind: output, shape index: {0}]   ;;  %s3224_s8 = inlined_call_operand.hbm [shape: f32[2,256,128], index: 8, kind: output, shape index: {1}]   ;;  %s3225_s9 = inlined_call_operand.hbm [shape: f32[2,256,128], index: 9, kind: output, shape index: {2}]  }
   0x1   :  { %3260 = sst [smem:[#allocation102_spill]] %s3216_s0 }
   0x2   :  { %3261 = sst [smem:[#allocation103_spill]] %s3217_s1 }
   0x3   :  { %3262 = sst [smem:[#allocation104_spill]] %s3218_s2 }
   0x4   :  { %3263 = sst [smem:[#allocation105_spill]] %s3219_s3 }
   0x5   :  { %3264 = sst [smem:[#allocation106_spill]] %s3220_s4 }
   0x6   :  { %3265 = sst [smem:[#allocation107_spill]] %s3221_s5 }
   0x7   :  { %3266 = sst [smem:[#allocation108_spill]] %s3223_s7 }
   0x8   :  { %3267 = sst [smem:[#allocation109_spill]] %s3224_s8 }
   0x9   :  { %3268 = sst [smem:[#allocation110_spill]] %s3225_s9 }
   0xa   :  { %15 = sst [smem:[#allocation2]] %s3222_s6 }
   0xb   :  { %16 = vsyncpa [#allocation4], 0 }
   0xc   :  { %17 = vsyncpa [#allocation8], 0 }
   0xd   :  { %19 = vsyncpa [#allocation8 + $0x1], 0 }
   0xe   :  { %20 = vsyncpa [#allocation6], 0 }
   0xf   :  { %21 = vsyncpa [#allocation12], 0 }
  0x10   :  { %22 = vsyncpa [#allocation5], 0 }
  0x11   :  { %24 = vsyncpa [#allocation5 + $0x1], 0 }
  0x12   :  { %25 = vsyncpa [#allocation16], 0 }
  0x13   :  { %27 = vsyncpa [#allocation16 + $0x1], 0  ;;  %s2087_s11 = smov 0   ;;  %s2089_s12 = smov 0  }
  0x14   :  { %s2091_s13 = smov 0   ;;  %s2093_s14 = smov 0  }
  0x15 LB: > { %3269 = sst [smem:[#allocation33_spill]] %s1986_s11  ;;  %s2108_s6 = sadd.s32 4294967295, %s1998_s14   ;;  %s1998_s14 = sphi %s2093_s14, %s3442_s14   ;;  %s1994_s13 = sphi %s2091_s13, %s3445_s13   ;;  %s1990_s12 = sphi %s2089_s12, %s3444_s12   ;;  %s1986_s11 = sphi %s2087_s11, %s3443_s11  }
  0x16   : > { %3270 = sst [smem:[#allocation34_spill]] %s1990_s12  ;;  %s3231_s15 = sadd.s32 4294967294, %s1998_s14  }
  0x17   : > { %3271 = sst [smem:[#allocation35_spill]] %s1994_s13  ;;  %s2112_s16 = sadd.s32 1, %s1998_s14  }
  0x18   : > { %3272 = sst [smem:[#allocation36_spill]] %s1998_s14  ;;  %s61_s17 = sadd.s32 1, %s1994_s13 }
  0x19   : > { %3273 = sst [smem:[#allocation37_spill]] %s2108_s6  ;;  %s58_s18 = ssub.s32 %s1998_s14, %s2112_s16 }
  0x1a   : > { %3274 = sst [smem:[#allocation38_spill]] %s2112_s16  ;;  %p68_p0 = scmp.ne.s32.totalorder %s1994_s13, %s1990_s12 }
  0x1b   : > { %p59_p1 = scmp.eq.s32.totalorder %s58_s18, 0  ;;  %p69_p2 = scmp.eq.s32.totalorder %s1998_s14, 0 }
  0x1c   : > { %p74_p3 = scmp.ne.s32.totalorder %s1990_s12, %s1986_s11  ;;  %p3226_p4 = scmp.eq.s32.totalorder %s2108_s6, 0 }
  0x1d   : > { %s2124_s19 = scalar_select %p59_p1, %s1994_s13, %s61_s17  }
  0x1e   : > { %p2126_p5 = por %p69_p2, %p68_p0  ;;  %p2132_p6 = por %p3226_p4, %p74_p3 }
  0x1f   : > { %3275 = sst [smem:[#allocation39_spill]] %s2124_s19  ;;  %p208_p7 = scmp.eq.s32.totalorder %s2108_s6, 7 }
  0x20   : > { %s3276_s20 = scalar_select %p2126_p5, 1, 0 }
  0x21   : > { %s3277_s21 = scalar_select %p2132_p6, 1, 0 }
  0x22   : > { %p214_p8 = scmp.eq.s32.totalorder %s3231_s15, 7  ;;  %p1554_p9 = scmp.ge.s32.totalorder %s1998_s14, 1 }
  0x23   : > { %p273_p10 = scmp.lt.s32.totalorder %s1998_s14, 9  ;;  %p2141_p11 = por %p208_p7, %p68_p0 }
  0x24   : > { %p2145_p12 = por %p214_p8, %p74_p3  ;;  %s3283_s4 = sld [smem:[#allocation106_spill]] }
  0x25   : > { %s3278_s22 = scalar_select %p2141_p11, 1, 0 }
  0x26   : > { %s3280_s23 = scalar_select %p2145_p12, 1, 0 }
  0x27   : > { %3279 = sst [smem:[#allocation40_spill]] %s3278_s22  ;;  %p2149_p13 = pnand %p1554_p9, %p273_p10 }
  0x28   : > { %3281 = sst [smem:[#allocation41_spill]] %s3280_s23  ;;  %s2000_s17 = smov [#allocation3]  }
  0x29   : > { %s3282_s24 = scalar_select %p2149_p13, 1, 0 }
  0x2a   : > { %s308_s27 = sshll.u32 %s3283_s4, 4  ;;  %p1702_p1 = pneg %p2149_p13  ;;  %s309_s27 = int_to_ptr.vmem [resolvable:$true] %s308_s27 }
  0x2b   : > { %s3284_s3 = sld [smem:[#allocation105_spill]]  ;;  %s286_s18 = sshll.u32 %s2000_s17, 4  ;;  %s287_s18 = int_to_ptr.vmem [resolvable:$true] %s286_s18 }
  0x2c   : > { %p2163_p0 = pnand %p1702_p1, %p3226_p4  ;;  %s1847_s25 = scalar_lea.vmem %s309_s27, 16 }
  0x2d   : > { %p1848_p2 = scmp.ne.s32.totalorder %s309_s27, %s1847_s25  ;;  %p1855_p9 = scmp.lt.s32.totalorder %s309_s27, %s309_s27 }
  0x2e   : > { %p1849_p3 = pneg %p2163_p0  ;;  %p1856_p10 = scmp.lt.s32.totalorder %s1847_s25, %s1847_s25 }
  0x30   : > { %p1850_p7 = pnand %p1849_p3, %p1848_p2  ;;  %p1857_p1 = por %p1856_p10, %p1855_p9 }
  0x31   : > { %s297_s30 = sshll.u32 %s3284_s3, 4  ;;  %s2167_s30 = int_to_ptr.vmem [resolvable:$true] %s297_s30 }
  0x32   : > { %p1851_p8 = pneg %p1850_p7 }
  0x34   : > { %p1858_p4 = pnand %p1857_p1, %p1851_p8 }
  0x36   : > { %1861 = shalt.err (!%p1858_p4)
}
  0x37   : > { %s2001_s26 = smov [#allocation11]   ;;  %s1873_s28 = scalar_lea.vmem %s287_s18, 64 }
  0x38   : > { %1711 = dma.vmem_to_smem (!%p2163_p0), %s309_s27, 16, %s2001_s26, [#allocation12]  }
  0x39   : > { %p1874_p12 = scmp.ne.s32.totalorder %s287_s18, %s1873_s28  ;;  %p1881_p13 = scmp.lt.s32.totalorder %s287_s18, %s287_s18 }
  0x3a   : > { %p1882_p5 = scmp.lt.s32.totalorder %s1873_s28, %s1873_s28 }
  0x3b   : > { %p1876_p11 = pnand %p1874_p12, %p1849_p3 }
  0x3c   : > { %p1883_p2 = por %p1882_p5, %p1881_p13 }
  0x3d   : > { %p1877_p6 = pneg %p1876_p11 }
  0x3f   : > { %p1884_p7 = pnand %p1883_p2, %p1877_p6 }
  0x41   : > { %1887 = shalt.err (!%p1884_p7)
}
  0x42   : > { %s3286_s0 = sld [smem:[#allocation102_spill]]  ;;  %s1888_s27 = scalar_lea.vmem %s2167_s30, 16 }
  0x43   : > { %p1889_p4 = scmp.ne.s32.totalorder %s2167_s30, %s1888_s27  ;;  %p1896_p5 = scmp.lt.s32.totalorder %s2167_s30, %s2167_s30 }
  0x44   : > { %p1897_p6 = scmp.lt.s32.totalorder %s1888_s27, %s1888_s27 }
  0x45   : > { %p1891_p11 = pnand %p1889_p4, %p1849_p3 }
  0x46   : > { %p1898_p13 = por %p1897_p6, %p1896_p5 }
  0x47   : > { %p1892_p12 = pneg %p1891_p11 }
  0x48   : > { %1705 = dma.hbm_to_vmem [thread:$0]  (!%p2163_p0), %s3286_s0, 64, %s287_s18, [#allocation4]  }
  0x49   : > { %p1899_p8 = pnand %p1898_p13, %p1892_p12 }
  0x4b   : > { %1902 = shalt.err (!%p1899_p8)
}
  0x4c   : > { %s2002_s25 = smov [#allocation10]   ;;  %s3287_s5 = sld [smem:[#allocation107_spill]] }
  0x4d   : > { %1708 = dma.vmem_to_smem (!%p2163_p0), %s2167_s30, 16, %s2002_s25, [#allocation6]  }
  0x52   : > { %s319_s28 = sshll.u32 %s3287_s5, 4  ;;  %s320_s28 = int_to_ptr.vmem [resolvable:$true] %s319_s28 }
  0x53   : > { %s1903_s29 = scalar_lea.vmem %s320_s28, 16  ;;  %p1911_p2 = scmp.lt.s32.totalorder %s320_s28, %s320_s28 }
  0x54   : > { %p1904_p9 = scmp.ne.s32.totalorder %s320_s28, %s1903_s29  ;;  %p1912_p7 = scmp.lt.s32.totalorder %s1903_s29, %s1903_s29 }
  0x56   : > { %p1906_p10 = pnand %p1904_p9, %p1849_p3  ;;  %p1913_p4 = por %p1912_p7, %p1911_p2 }
  0x58   : > { %p1907_p1 = pneg %p1906_p10 }
  0x5a   : > { %p1914_p11 = pnand %p1913_p4, %p1907_p1 }
  0x5c   : > { %1917 = shalt.err (!%p1914_p11)
}
  0x5d   : > { %s2003_s17 = smov [#allocation13]   ;;  %p1559_p12 = scmp.ge.s32.totalorder %s1998_s14, 8 }
  0x5e   : > { %1714 = dma.vmem_to_smem (!%p2163_p0), %s320_s28, 16, %s2003_s17, [#allocation12]  }
  0x5f   : > { %329 = sbr.rel (%p1559_p12) target bundleno = 140 (0x8c), region = 36  ;;  %s333_s30 = sand.u32 (!%p1559_p12), 1, %s1998_s14  }
  0x60   : > { %s3232_s27 = sand.u32 (!%p1559_p12), 1, %s1994_s13   ;;  %s3233_s26 = sshll.u32 (!%p1559_p12), %s1998_s14, 9 }
  0x61   : > { %s1560_s25 = sshll.u32 (!%p1559_p12), %s3232_s27, 5  ;;  %s3288_s1 = sld [smem:[#allocation103_spill]] (!%p1559_p12) }
  0x62   : > { %s337_s28 = scalar_lea.vmem (!%p1559_p12), [#allocation7], %s1560_s25  ;;  %s2217_s15 = scalar_lea.sflag (!%p1559_p12), [#allocation8], %s333_s30 }
  0x63   : > { %s344_s17 = sshll.u32 (!%p1559_p12), %s337_s28, 4  ;;  %p3289_p3 = scmp.ne.s32.totalorder (!%p1559_p12), %s3276_s20, 0  ;;  %s2215_s17 = int_to_ptr.vmem [resolvable:$true] %s344_s17 }
  0x67   : > { %s2213_s10 = scalar_lea.hbm %s3288_s1, %s3233_s26  ;;  %s1922_s18 = scalar_lea.hbm %s3288_s1, 4096 }
  0x68   : > { %s1918_s0 = scalar_lea.hbm %s2213_s10, 512  ;;  %p1923_p13 = scmp.lt.s32.totalorder %s2213_s10, %s3288_s1 }
  0x69   : > { %p1919_p0 = scmp.ne.s32.totalorder %s2213_s10, %s1918_s0  ;;  %p1924_p8 = scmp.lt.s32.totalorder %s1922_s18, %s1918_s0 }
  0x6b   : > { %p1920_p5 = pnand %p1919_p0, %p3289_p3  ;;  %p1925_p9 = por %p1924_p8, %p1923_p13 }
  0x6d   : > { %p1921_p6 = pneg %p1920_p5 }
  0x6f   : > { %p1926_p10 = pnand %p1925_p9, %p1921_p6 }
  0x71   : > { %1929 = shalt.err (!%p1926_p10)
}
  0x72   : > { %s1930_s30 = scalar_lea.vmem %s2215_s17, 512  ;;  %s2004_s25 = smov [#allocation7]  }
  0x73   : > { %p1931_p1 = scmp.ne.s32.totalorder %s2215_s17, %s1930_s30  ;;  %s1934_s3 = sshll.u32 %s2004_s25, 4  ;;  %s1935_s3 = int_to_ptr.vmem [resolvable:$false] %s1934_s3 }
  0x74   : > { %s1936_s27 = scalar_lea.vmem %s1935_s3, 1024  ;;  %p1937_p4 = scmp.lt.s32.totalorder %s2215_s17, %s1935_s3 }
  0x75   : > { %p1932_p2 = pnand %p1931_p1, %p3289_p3  ;;  %p1938_p11 = scmp.lt.s32.totalorder %s1936_s27, %s1930_s30 }
  0x77   : > { %p1933_p7 = pneg %p1932_p2  ;;  %p1939_p12 = por %p1938_p11, %p1937_p4 }
  0x79   : > { %p1940_p0 = pnand %p1939_p12, %p1933_p7 }
  0x7b   : > { %1943 = shalt.err (!%p1940_p0)
}
  0x7c   : > { %s2005_s0 = smov 128   ;;  %s2006_s26 = smov 8  }
  0x7d   : > { %1659 = dma.hbm_to_vmem [thread:$0]  (%p3289_p3), %s2213_s10, 512, %s2215_s17, %s2217_s15, %s2005_s0, %s2005_s0, %s2006_s26  }
  0x7e   : > { %s3290_s28 = sand.u32 1, %s1994_s13   ;;  %s3291_s30 = sshll.u32 %s1998_s14, 9 }
  0x7f   : > { %s1563_s18 = sshll.u32 %s3290_s28, 6  ;;  %s3292_s2 = sld [smem:[#allocation104_spill]] }
  0x80   : > { %s1660_s29 = scalar_select %p3289_p3, [#allocation0], [#allocation26] }
  0x81   : > { %s2007_s1 = smov 4096   ;;  %s358_s17 = scalar_lea.vmem [#allocation9], %s1563_s18 }
  0x82   : > { %1661 = sst [smem:[#allocation19]] (%p3289_p3), %s2007_s1  ;;  %s377_s0 = sshll.u32 %s358_s17, 4  ;;  %s378_s0 = int_to_ptr.vmem [resolvable:$true] %s377_s0 }
  0x83   : > { %s369_s10 = sld [smem:[%s1660_s29]]   ;;  %s2008_s26 = smov 512  }
  0x84   : > { %1662 = sst [smem:[#allocation19 + $0x1]] (%p3289_p3), %s2008_s26  ;;  %s2009_s28 = smov 4  }
  0x85   : > { %s364_s27 = scalar_lea.hbm %s3292_s2, %s3291_s30  ;;  %1663 = sst [smem:[#allocation19 + $0x2]] (%p3289_p3), %s2009_s28 }
  0x86   : > { %s2010_s4 = smov 128   ;;  %s2011_s25 = smov 8  }
  0x87   : > { %1664 = sst [smem:[#allocation19 + $0x3]] (%p3289_p3), %s2010_s4  ;;  %s2012_s29 = smov 131072  }
  0x88   : > { %1665 = sst [smem:[#allocation19 + $0x4]] (%p3289_p3), %s2010_s4 }
  0x89   : > { %s1566_s30 = sshll.u32 %s369_s10, 26  ;;  %1666 = sst [smem:[#allocation19 + $0x5]] (%p3289_p3), %s2011_s25 }
  0x8a   : > { %s1567_s1 = sadd.s32 134217728, %s1566_s30 }
  0x8b   : > { %1667 = dma.general (%p3289_p3), %s364_s27, 1024, %s378_s0, %s2217_s15, %s2012_s29, [#allocation19], %s1567_s1, 0  }
  0x8c PF: > { %p3293_p5 = scmp.ne.s32.totalorder %s3282_s24, 0 }
  0x8e   : > { %402 = sbr.rel (%p3293_p5) target bundleno = 507 (0x1fb), region = 48 }
  0x93   : > { %p3294_p6 = scmp.eq.s32.totalorder %s2108_s6, 0 }
  0x95   : > { %1961 = dma.done.wait (%p3294_p6), [#allocation4], 64   ;;  %p3295_p13 = pmov %p3294_p6 }
  0x96   : > { %s3234_s4 = sand.u32 1, %s2108_s6   ;;  %s2272_s18 = sand.u32 1, %s1990_s12  }
  0x97   : > { %1963 = vsyncadd (%p3295_p13), [#allocation4], 4294967232  ;;  %3296 = sst [smem:[#allocation42_spill]] %s2272_s18  ;;  %s1570_s20 = sshll.u32 %s2272_s18, 5 }
  0x98   : > { %s409_s15 = scalar_lea.sflag [#allocation8], %s3234_s4  ;;  %s2277_s3 = scalar_lea.vmem [#allocation7], %s1570_s20 }
  0x99   : > { %p3297_p3 = scmp.ne.s32.totalorder %s3277_s21, 0 }
  0x9b   : > { %1965 = dma.done.wait (%p3297_p3), %s409_s15, 1536  }
  0x9c   : > { %1967 = vsyncadd (%p3297_p3), %s409_s15, 4294965760  ;;  %s2284_s24 = sshll.u32 %s2272_s18, 6  ;;  %p3298_p8 = pmov %p3294_p6 }
  0x9d   : > { %s2287_s27 = scalar_lea.vmem [#allocation9], %s2284_s24 }
  0x9e   : > { %1969 = dma.done.wait (%p3298_p8), [#allocation6], 16   ;;  %p3299_p9 = pmov %p3294_p6 }
  0x9f   : > { %p3300_p10 = pmov %p3294_p6 }
  0xa0   : > { %1971 = vsyncadd (%p3299_p9), [#allocation6], 4294967280 }
  0xa1   : > { %1973 = dma.done.wait (%p3300_p10), [#allocation12], 32   ;;  %p3301_p1 = pmov %p3294_p6 }
  0xa3   : > { %1975 = vsyncadd (%p3301_p1), [#allocation12], 4294967264 }
  0xa4   : > { %438 = sfence }
  0xa5   : > { %v2298_v0 = vld [vmem:[%s2277_s3 + $0x10] sm:$0xff]  ;;  %v2301_v1 = vld [vmem:[%s2277_s3] sm:$0xff]  ;;  %v2306_v4 = vld [vmem:[%s2277_s3 + $0x18] sm:$0xff]  ;;  %s2317_s21 = scalar_lea.vmem [#allocation15], %s2284_s24  ;;  %s2342_s10 = sld [smem:[#allocation10]] }
  0xa6   : > { %v528_v2 = vand.u32 127, %v2298_v0  ;;  %v526_v3 = vand.u32 127, %v2301_v1  ;;  %v529_v5 = vand.u32 127, %v2306_v4  ;;  %v1607_v10 = vld [vmem:[#allocation3] ss:$0 sm:$0xff]  ;;  %v2311_v16 = vld [vmem:[%s2277_s3 + $0x8] sm:$0xff] }
  0xa7   : > { %v591_v13 = vld [vmem:[%s2287_s27 + $0x18] sm:$0xff]  ;;  %v527_v19 = vand.u32 127, %v2311_v16  ;;  %3302 = sst [smem:[#allocation43_spill]] %s2317_s21  ;;  %v588_v22 = vld [vmem:[%s2287_s27] sm:$0xff]  ;;  %v590_v28 = vld [vmem:[%s2287_s27 + $0x10] sm:$0xff]  ;;  %v533_v52 = vshra.s32 %v2306_v4, 7 }
  0xa8   : > { %vm541_vm0 = vcmp.lt.s32.totalorder %v528_v2, 0  ;;  %v545_v6 = vadd.s32 128, %v528_v2  ;;  %vm539_vm1 = vcmp.lt.s32.totalorder %v526_v3, 0  ;;  %v543_v7 = vadd.s32 128, %v526_v3  ;;  %v1608_v15 = vld [vmem:[#allocation3 + $0x2] ss:$0 sm:$0xff] }
  0xa9   : > { %v546_v11 = vadd.s32 128, %v529_v5  ;;  %vm542_vm2 = vcmp.lt.s32.totalorder %v529_v5, 0  ;;  %v607_v14 = vmul.f32 0.02, %v591_v13  ;;  %v1613_v20 = vld [vmem:[#allocation3 + $0x1] ss:$0 sm:$0xff] }
  0xaa   : > { %v549_v8 = vsel %vm541_vm0, %v545_v6, %v528_v2  ;;  %v547_v9 = vsel %vm539_vm1, %v543_v7, %v526_v3  ;;  %v544_v21 = vadd.s32 128, %v527_v19  ;;  %vm540_vm3 = vcmp.lt.s32.totalorder %v527_v19, 0  ;;  %v1614_v27 = vld [vmem:[#allocation3 + $0x3] ss:$0 sm:$0xff]  ;;  %v1616_v32 = vld [vmem:[%s2287_s27 + $0x28] sm:$0xff]  ;;  %v1615_v40 = vld [vmem:[%s2287_s27 + $0x20] sm:$0xff] }
  0xab   : > { %1800 = vset.pattern.permute.xlu1 %v549_v8  ;;  %1799 = vset.pattern.permute.xlu0 %v547_v9  ;;  %v550_v12 = vsel %vm542_vm2, %v546_v11, %v529_v5  ;;  %v611_v17 = vmax.f32 %v607_v14, 1e-05  ;;  %v604_v23 = vmul.f32 0.02, %v588_v22  ;;  %v606_v29 = vmul.f32 0.02, %v590_v28 }
  0xac   : > { %v548_v25 = vsel %vm540_vm3, %v544_v21, %v527_v19  ;;  %v961_v33 = vmul.f32 0.02, %v1616_v32  ;;  %v589_v36 = vld [vmem:[%s2287_s27 + $0x8] sm:$0xff]  ;;  %v960_v41 = vmul.f32 0.02, %v1615_v40  ;;  %s2344_s17 = sld [smem:[#allocation10 + $0x2]]  ;;  %v2414_v53 = vstv %s2342_s10 }
  0xad   : > { %v2313_v18 = vmin.f32 %v611_v17, 0.99999  ;;  %v608_v24 = vmax.f32 %v604_v23, 1e-05  ;;  %v610_v30 = vmax.f32 %v606_v29, 1e-05 }
  0xae   : > { %v965_v34 = vmax.f32 %v961_v33, 1e-05  ;;  %v605_v37 = vmul.f32 0.02, %v589_v36  ;;  %v964_v42 = vmax.f32 %v960_v41, 1e-05 }
  0xaf   : > { %558 = vperm.xlu1 %1800, %v1607_v10   ;;  %552 = vperm.xlu0 %1799, %v1607_v10   ;;  %900 = vst [vmem:[%s2317_s21 + $0x18] sm:$0xff] %v2313_v18  ;;  %v2322_v26 = vmin.f32 %v608_v24, 0.99999  ;;  %v2327_v31 = vmin.f32 %v610_v30, 0.99999  ;;  %s2346_s0 = sld [smem:[#allocation10 + $0x4]] }
  0xb0   : > { %v2332_v35 = vmin.f32 %v965_v34, 0.99999  ;;  %v609_v38 = vmax.f32 %v605_v37, 1e-05  ;;  %v2348_v43 = vmin.f32 %v964_v42, 0.99999 }
  0xb1   : > { %897 = vst [vmem:[%s2317_s21] sm:$0xff] %v2322_v26  ;;  %899 = vst [vmem:[%s2317_s21 + $0x10] sm:$0xff] %v2327_v31  ;;  %s2350_s26 = sld [smem:[#allocation10 + $0x6]]  ;;  %v1617_v44 = vld [vmem:[%s2287_s27 + $0x30] sm:$0xff]  ;;  %v1618_v48 = vld [vmem:[%s2287_s27 + $0x38] sm:$0xff]  ;;  %vm2456_vm4 = vcmp.eq.s32.totalorder %v533_v52, 1  ;;  %v3305_v4 = vmov 0 }
  0xb2   : > { %1628 = vst [vmem:[%s2317_s21 + $0x28] sm:$0xff] %v2332_v35  ;;  %v2337_v39 = vmin.f32 %v609_v38, 0.99999  ;;  %s2352_s28 = sld [smem:[#allocation10 + $0x8]]  ;;  %1627 = vst [vmem:[%s2317_s21 + $0x20] sm:$0xff] %v2348_v43  ;;  %v2419_v54 = vstv %s2344_s17  ;;  %v3306_v4 = vsel %vm2456_vm4, 4294967295, %v3305_v4 }
  0xb3   : > { %1801 = vset.pattern.permute.xlu1 %v550_v12  ;;  %1804 = vset.pattern.permute.xlu0 %v550_v12  ;;  %s2356_s30 = sld [smem:[#allocation10 + $0xa]]  ;;  %v962_v45 = vmul.f32 0.02, %v1617_v44  ;;  %v963_v49 = vmul.f32 0.02, %v1618_v48  ;;  %3307 = vst [vmem:[#allocation46_spill] sm:$0xff] %v3306_v4 }
  0xb4   : > { %898 = vst [vmem:[%s2317_s21 + $0x8] sm:$0xff] %v2337_v39  ;;  %s2359_s25 = sld [smem:[#allocation10 + $0xc]]  ;;  %v532_v44 = vshra.s32 %v2298_v0, 7 }
  0xb5   : > { %s2361_s1 = sld [smem:[#allocation10 + $0xe]]  ;;  %v966_v46 = vmax.f32 %v962_v45, 1e-05  ;;  %v967_v50 = vmax.f32 %v963_v49, 1e-05  ;;  %v2422_v55 = vstv %s2346_s0 }
  0xb6   : > { %s2363_s29 = sld [smem:[#allocation10 + $0x1]]  ;;  %vm2705_vm6 = vcmp.eq.s32.totalorder %v532_v44, 1 }
  0xb7   : > { %561 = vperm.xlu1 %1801, %v1607_v10   ;;  %578 = vperm.xlu0 %1804, %v1608_v15   ;;  %s2365_s20 = sld [smem:[#allocation10 + $0x3]]  ;;  %v2369_v47 = vmin.f32 %v966_v46, 0.99999  ;;  %v2400_v51 = vmin.f32 %v967_v50, 0.99999  ;;  %v2425_v56 = vstv %s2350_s26 }
  0xb8   : > { %s2367_s15 = sld [smem:[#allocation10 + $0x5]]  ;;  %v2445_v62 = vstv %s2352_s28 }
  0xb9   : > { %s2371_s3 = sld [smem:[#allocation10 + $0x7]]  ;;  %1629 = vst [vmem:[%s2317_s21 + $0x30] sm:$0xff] %v2369_v47  ;;  %1630 = vst [vmem:[%s2317_s21 + $0x38] sm:$0xff] %v2400_v51  ;;  %v2463_v5 = vstv %s2356_s30 }
  0xba   : > { %s2373_s4 = sld [smem:[#allocation10 + $0x9]]  ;;  %3303 = vst [vmem:[#allocation44_spill] sm:$0xff] %v2445_v62  ;;  %3308 = vst [vmem:[#allocation47_spill] sm:$0xff] %v2463_v5  ;;  %v2466_v6 = vstv %s2359_s25 }
  0xbb   : > { %1802 = vset.pattern.permute.xlu1 %v547_v9  ;;  %1807 = vset.pattern.permute.xlu0 %v549_v8  ;;  %s2377_s2 = sld [smem:[#allocation10 + $0xb]]  ;;  %3309 = vst [vmem:[#allocation48_spill] sm:$0xff] %v2466_v6  ;;  %v2469_v7 = vstv %s2361_s1 }
  0xbc   : > { %s2379_s5 = sld [smem:[#allocation10 + $0xd]]  ;;  %v2431_v58 = vstv %s2363_s29 }
  0xbd   : > { %s2381_s19 = sld [smem:[#allocation10 + $0xf]]  ;;  %v2434_v59 = vstv %s2365_s20  ;;  %v2519_v22 = vmul.f32 %v2431_v58, %v2322_v26  ;;  %v2598_v57 = vmul.f32 %v2431_v58, %v2327_v31 }
  0xbe   : > { %s2383_s13 = sld [smem:[#allocation11]]  ;;  %v2437_v60 = vstv %s2367_s15  ;;  %v2602_v0 = vmul.f32 %v2434_v59, %v2327_v31 }
  0xbf   : > { %569 = vperm.xlu1 %1802, %v1608_v15   ;;  %917 = vperm.xlu0 %1807, %v1613_v20   ;;  %s2385_s12 = sld [smem:[#allocation11 + $0x1]]  ;;  %v2440_v61 = vstv %s2371_s3  ;;  %v2486_v11 = vmul.f32 %v2437_v60, %v2313_v18  ;;  %3311 = vst [vmem:[#allocation50_spill] sm:$0xff] %v2519_v22  ;;  %3319 = vst [vmem:[#allocation58_spill] sm:$0xff] %v2598_v57 }
  0xc0   : > { %s2387_s16 = sld [smem:[#allocation11 + $0x2]]  ;;  %v2448_v63 = vstv %s2373_s4  ;;  %3320 = vst [vmem:[#allocation59_spill] sm:$0xff] %v2602_v0 }
  0xc1   : > { %s2390_s23 = sld [smem:[#allocation11 + $0x3]]  ;;  %v2451_v2 = vstv %s2377_s2  ;;  %v2497_v14 = vmul.f32 %v2448_v63, %v2313_v18  ;;  %v2543_v29 = vmul.f32 %v2448_v63, %v2322_v26 }
  0xc2   : > { %s2392_s11 = sld [smem:[#allocation11 + $0x4]]  ;;  %v2454_v3 = vstv %s2379_s5  ;;  %v2547_v30 = vmul.f32 %v2451_v2, %v2322_v26  ;;  %v2618_v57 = vmul.f32 %v2451_v2, %v2327_v31  ;;  %s2730_s5 = scalar_lea.vmem [#allocation14], %s2284_s24 }
  0xc3   : > { %1803 = vset.pattern.permute.xlu1 %v549_v8  ;;  %1808 = vset.pattern.permute.xlu0 %v548_v25  ;;  %s2394_s14 = sld [smem:[#allocation11 + $0x5]]  ;;  %3304 = vst [vmem:[#allocation45_spill] sm:$0xff] %v2454_v3  ;;  %v2505_v17 = vmul.f32 %v2454_v3, %v2313_v18  ;;  %3315 = vst [vmem:[#allocation54_spill] sm:$0xff] %v2543_v29  ;;  %v2551_v32 = vmul.f32 %v2454_v3, %v2322_v26 }
  0xc4   : > { %s2396_s9 = sld [smem:[#allocation11 + $0x6]]  ;;  %v2493_v13 = vstv %s2383_s13  ;;  %3316 = vst [vmem:[#allocation55_spill] sm:$0xff] %v2547_v30  ;;  %v2606_v29 = vmul.f32 %v2437_v60, %v2327_v31  ;;  %3324 = vst [vmem:[#allocation63_spill] sm:$0xff] %v2618_v57  ;;  %v2637_v57 = vmul.f32 %v2332_v35, %v2434_v59 }
  0xc5   : > { %s2398_s8 = sld [smem:[#allocation11 + $0x7]]  ;;  %v2508_v19 = vstv %s2385_s12  ;;  %3317 = vst [vmem:[#allocation56_spill] sm:$0xff] %v2551_v32 }
  0xc6   : > { %s2402_s27 = sld [smem:[#allocation13]]  ;;  %3321 = vst [vmem:[#allocation60_spill] sm:$0xff] %v2606_v29  ;;  %3328 = vst [vmem:[#allocation67_spill] sm:$0xff] %v2637_v57 }
  0xc7   : > { %575 = vperm.xlu1 %1803, %v1608_v15   ;;  %555 = vperm.xlu0 %1808, %v1607_v10   ;;  %s2404_s7 = sld [smem:[#allocation13 + $0x1]]  ;;  %v2482_v10 = vmul.f32 %v2434_v59, %v2313_v18  ;;  %v2524_v24 = vstv %s2390_s23 }
  0xc8   : > { %s2408_s22 = sld [smem:[#allocation13 + $0x2]]  ;;  %v2539_v28 = vstv %s2392_s11 }
  0xc9   : > { %s2411_s6 = sld [smem:[#allocation13 + $0x3]]  ;;  %v2559_v36 = vstv %s2394_s14 }
  0xca   : > { %s2416_s18 = sld [smem:[#allocation13 + $0x4]]  ;;  %v2562_v37 = vstv %s2396_s9 }
  0xcb   : > { %1805 = vset.pattern.permute.xlu1 %v547_v9  ;;  %572 = vperm.xlu0 %1808, %v1608_v15   ;;  %s2428_s21 = sld [smem:[#allocation13 + $0x5]]  ;;  %v2501_v15 = vmul.f32 %v2451_v2, %v2313_v18  ;;  %v2565_v38 = vstv %s2398_s8 }
  0xcc   : > { %s2442_s10 = sld [smem:[#allocation13 + $0x6]]  ;;  %v2556_v34 = vstv %s2402_s27 }
  0xcd   : > { %s2460_s17 = sld [smem:[#allocation13 + $0x7]]  ;;  %v2568_v40 = vstv %s2404_s7  ;;  %s2969_s7 = scalar_lea.vmem [#allocation17], %s2284_s24 }
  0xce   : > { %s2474_s2 = sld [smem:[#allocation2]]  ;;  %v2571_v41 = vstv %s2408_s22 }
  0xcf   : > { %911 = vperm.xlu1 %1805, %v1613_v20   ;;  %931 = vperm.xlu0 %1808, %v1614_v27   ;;  %v2574_v42 = vstv %s2411_s6  ;;  %s3421_s8 = sld [smem:[#allocation43_spill]] }
  0xd0   : > { %v2578_v45 = vstv %s2416_s18  ;;  %s3429_s9 = sld [smem:[#allocation42_spill]] }
  0xd1   : > { %v2581_v46 = vstv %s2428_s21  ;;  %s3430_s11 = sld [smem:[#allocation37_spill]] }
  0xd2   : > { %v2584_v48 = vstv %s2442_s10 }
  0xd3   : > { %1806 = vset.pattern.permute.xlu1 %v548_v25  ;;  %1813 = vset.pattern.permute.xlu0 %v550_v12  ;;  %v2528_v25 = vmul.f32 %v2434_v59, %v2322_v26  ;;  %v2594_v52 = vstv %s2460_s17 }
  0xd4   : > { %v2591_v50 = vstv %s2474_s2 }
  0xd5   : > { %3312 = vst [vmem:[#allocation51_spill] sm:$0xff] %v2528_v25 }
  0xd6   : > { %s1232_s12 = scalar_lea.sflag [#allocation5], %s3429_s9 }
  0xd7   : > { %914 = vperm.xlu1 %1806, %v1613_v20   ;;  %s3431_s13 = sand.u32 1, %s3430_s11  }
  0xd8   : > { %s3133_s14 = scalar_lea.sflag [#allocation16], %s3431_s13 }
  0xdb   : > { %1809 = vset.pattern.permute.xlu1 %v550_v12 }
  0xdf   : > { %920 = vperm.xlu1 %1809, %v1613_v20   ;;  %v2511_v20 = vstv %s2387_s16 }
  0xe3   : > { %1810 = vset.pattern.permute.xlu1 %v547_v9  ;;  %v2478_v9 = vmul.f32 %v2431_v58, %v2313_v18 }
  0xe7   : > { %928 = vperm.xlu1 %1810, %v1614_v27  }
  0xeb   : > { %1811 = vset.pattern.permute.xlu1 %v549_v8  ;;  %v2472_v8 = vstv %s2381_s19 }
  0xec   : > { %3310 = vst [vmem:[#allocation49_spill] sm:$0xff] %v2472_v8  ;;  %v2515_v21 = vmul.f32 %v2472_v8, %v2313_v18  ;;  %v2588_v49 = vmul.f32 %v2472_v8, %v2322_v26  ;;  %v2628_v29 = vmul.f32 %v2472_v8, %v2327_v31  ;;  %v2685_v57 = vmul.f32 %v2332_v35, %v2472_v8 }
  0xee   : > { %3318 = vst [vmem:[#allocation57_spill] sm:$0xff] %v2588_v49  ;;  %v2614_v49 = vmul.f32 %v2448_v63, %v2327_v31  ;;  %3326 = vst [vmem:[#allocation65_spill] sm:$0xff] %v2628_v29 }
  0xef   : > { %934 = vperm.xlu1 %1811, %v1614_v27   ;;  %3340 = vst [vmem:[#allocation79_spill] sm:$0xff] %v2685_v57 }
  0xf0   : > { %3323 = vst [vmem:[#allocation62_spill] sm:$0xff] %v2614_v49  ;;  %v2633_v49 = vmul.f32 %v2332_v35, %v2431_v58 }
  0xf2   : > { %3327 = vst [vmem:[#allocation66_spill] sm:$0xff] %v2633_v49 }
  0xf3   : > { %1812 = vset.pattern.permute.xlu1 %v550_v12  ;;  %v2490_v12 = vmul.f32 %v2440_v61, %v2313_v18  ;;  %v2532_v18 = vmul.f32 %v2437_v60, %v2322_v26 }
  0xf5   : > { %3313 = vst [vmem:[#allocation52_spill] sm:$0xff] %v2532_v18 }
  0xf7   : > { %937 = vperm.xlu1 %1812, %v1614_v27   ;;  %v2536_v27 = vmul.f32 %v2440_v61, %v2322_v26  ;;  %v2610_v26 = vmul.f32 %v2440_v61, %v2327_v31 }
  0xf9   : > { %3314 = vst [vmem:[#allocation53_spill] sm:$0xff] %v2536_v27  ;;  %3322 = vst [vmem:[#allocation61_spill] sm:$0xff] %v2610_v26  ;;  %v2624_v27 = vmul.f32 %v2454_v3, %v2327_v31  ;;  %v531_v26 = vshra.s32 %v2311_v16, 7  ;;  %v2649_v16 = vmul.f32 %v2332_v35, %v2448_v63  ;;  %v2653_v31 = vmul.f32 %v2332_v35, %v2451_v2 }
  0xfb   : > { %3325 = vst [vmem:[#allocation64_spill] sm:$0xff] %v2624_v27  ;;  %3331 = vst [vmem:[#allocation70_spill] sm:$0xff] %v2649_v16  ;;  %v2669_v16 = vmul.f32 %v2437_v60, %v2337_v39  ;;  %vm2754_vm7 = vcmp.eq.s32.totalorder %v531_v26, 1  ;;  %v2773_v26 = vmul.f32 %v2369_v47, %v2434_v59 }
  0xfc   : > { %3332 = vst [vmem:[#allocation71_spill] sm:$0xff] %v2653_v31  ;;  %v2673_v31 = vmul.f32 %v2440_v61, %v2337_v39 }
  0xfd   : > { %3336 = vst [vmem:[#allocation75_spill] sm:$0xff] %v2669_v16  ;;  %v2689_v16 = vmul.f32 %v2454_v3, %v2337_v39  ;;  %3360 = vst [vmem:[#allocation92_spill] sm:$0xff] %v2773_v26 }
  0xfe   : > { %3337 = vst [vmem:[#allocation76_spill] sm:$0xff] %v2673_v31  ;;  %v2693_v31 = vmul.f32 %v2472_v8, %v2337_v39 }
  0xff   : > { %3341 = vst [vmem:[#allocation80_spill] sm:$0xff] %v2689_v16 }
 0x100   : > { %3342 = vst [vmem:[#allocation81_spill] sm:$0xff] %v2693_v31 }
 0x12a   : > { %v2521_v23 = vpop.permute.xlu0 %552  ;;  %v2553_v33 = vpop.permute.xlu1 %558 }
 0x132   : > { %v562_v32 = vpop.permute.xlu1 %561  ;;  %v579_v30 = vpop.permute.xlu0 %578 }
 0x133   : > { %v587_v0 = vsel %vm2456_vm4, %v579_v30, %v562_v32  ;;  %v2641_v30 = vmul.f32 %v2332_v35, %v2437_v60  ;;  %v2645_v32 = vmul.f32 %v2332_v35, %v2440_v61 }
 0x134   : > { %v1612_v18 = vadd.f32 -1.0, %v587_v0  ;;  %v2657_v0 = vmul.f32 %v2332_v35, %v2454_v3  ;;  %v3347_v35 = vmov 0 }
 0x135   : > { %3329 = vst [vmem:[#allocation68_spill] sm:$0xff] %v2641_v30  ;;  %3330 = vst [vmem:[#allocation69_spill] sm:$0xff] %v2645_v32  ;;  %v2661_v30 = vmul.f32 %v2431_v58, %v2337_v39  ;;  %v2665_v32 = vmul.f32 %v2434_v59, %v2337_v39  ;;  %v3348_v35 = vsel %vm2705_vm6, 4294967295, %v3347_v35 }
 0x136   : > { %3333 = vst [vmem:[#allocation72_spill] sm:$0xff] %v2657_v0  ;;  %v599_v4 = vadd.f32 0.03125, %v1612_v18  ;;  %v2677_v0 = vmul.f32 %v2448_v63, %v2337_v39  ;;  %v2681_v18 = vmul.f32 %v2451_v2, %v2337_v39  ;;  %3349 = vst [vmem:[#allocation83_spill] sm:$0xff] %v3348_v35  ;;  %v2715_v39 = vmul.f32 %v2348_v43, %v2437_v60 }
 0x137   : > { %3334 = vst [vmem:[#allocation73_spill] sm:$0xff] %v2661_v30  ;;  %3335 = vst [vmem:[#allocation74_spill] sm:$0xff] %v2665_v32 }
 0x138   : > { %3338 = vst [vmem:[#allocation77_spill] sm:$0xff] %v2677_v0  ;;  %3339 = vst [vmem:[#allocation78_spill] sm:$0xff] %v2681_v18  ;;  %v603_v49 = vmul.f32 32.0, %v599_v4  ;;  %v2697_v0 = vmul.f32 %v2348_v43, %v2431_v58  ;;  %v3344_v18 = vshra.s32 %v2301_v1, 7  ;;  %v2711_v4 = vmul.f32 %v2348_v43, %v2434_v59 }
 0x139   : > { %3351 = vst [vmem:[#allocation85_spill] sm:$0xff] %v2715_v39  ;;  %v2723_v1 = vmul.f32 %v2348_v43, %v2448_v63 }
 0x13a   : > { %3343 = vst [vmem:[#allocation82_spill] sm:$0xff] %v2697_v0  ;;  %vm2701_vm5 = vcmp.eq.s32.totalorder %v3344_v18, 1  ;;  %3350 = vst [vmem:[#allocation84_spill] sm:$0xff] %v2711_v4  ;;  %v2719_v0 = vmul.f32 %v2348_v43, %v2440_v61  ;;  %v621_v44 = vmul.f32 %v2414_v53, %v603_v49  ;;  %v653_v18 = vmul.f32 %v2419_v54, %v603_v49  ;;  %v2741_v25 = vpop.permute.xlu0 %917 }
 0x13b   : > { %3353 = vst [vmem:[#allocation87_spill] sm:$0xff] %v2723_v1  ;;  %v685_v57 = vmul.f32 %v2422_v55, %v603_v49  ;;  %v717_v4 = vmul.f32 %v2425_v56, %v603_v49  ;;  %896 = vst [vmem:[%s2730_s5 + $0x18] sm:$0xff] %v603_v49  ;;  %v749_v39 = vmul.f32 %v2445_v62, %v603_v49 }
 0x13c   : > { %3352 = vst [vmem:[#allocation86_spill] sm:$0xff] %v2719_v0  ;;  %v781_v0 = vmul.f32 %v2463_v5, %v603_v49  ;;  %v813_v31 = vmul.f32 %v2466_v6, %v603_v49  ;;  %v845_v1 = vmul.f32 %v2469_v7, %v603_v49  ;;  %v630_v16 = vadd.f32 %v2478_v9, %v621_v44 }
 0x13d   : > { %v662_v30 = vadd.f32 %v2482_v10, %v653_v18  ;;  %v694_v29 = vadd.f32 %v2486_v11, %v685_v57  ;;  %v726_v27 = vadd.f32 %v2490_v12, %v717_v4  ;;  %v758_v22 = vadd.f32 %v2497_v14, %v749_v39  ;;  %v570_v12 = vpop.permute.xlu1 %569 }
 0x13e   : > { %v790_v62 = vadd.f32 %v2501_v15, %v781_v0  ;;  %v822_v5 = vadd.f32 %v2505_v17, %v813_v31  ;;  %v2748_v6 = vmul.f32 %v2348_v43, %v2451_v2  ;;  %v635_v9 = vadd.f32 %v2493_v13, %v630_v16 }
 0x13f   : > { %v667_v10 = vadd.f32 %v2508_v19, %v662_v30  ;;  %v699_v57 = vadd.f32 %v2511_v20, %v694_v29  ;;  %v854_v11 = vadd.f32 %v2515_v21, %v845_v1  ;;  %v731_v14 = vadd.f32 %v2524_v24, %v726_v27 }
 0x140   : > { %3354 = vst [vmem:[#allocation88_spill] sm:$0xff] %v2748_v6  ;;  %v2761_v15 = vmul.f32 %v2348_v43, %v2454_v3  ;;  %v2765_v17 = vmul.f32 %v2348_v43, %v2472_v8  ;;  %v2769_v29 = vmul.f32 %v2369_v47, %v2431_v58  ;;  %v639_v21 = vmax.f32 %v635_v9, 0.0 }
 0x141   : > { %v671_v30 = vmax.f32 %v667_v10, 0.0  ;;  %v2777_v27 = vmul.f32 %v2369_v47, %v2437_v60  ;;  %v763_v16 = vadd.f32 %v2539_v28, %v758_v22  ;;  %v795_v31 = vadd.f32 %v2559_v36, %v790_v62 }
 0x142   : > { %3357 = vst [vmem:[#allocation89_spill] sm:$0xff] %v2761_v15  ;;  %3358 = vst [vmem:[#allocation90_spill] sm:$0xff] %v2765_v17  ;;  %v2783_v43 = vmul.f32 %v2369_v47, %v2440_v61  ;;  %v2787_v0 = vmul.f32 %v2369_v47, %v2448_v63  ;;  %v644_v4 = vmul.f32 %v2556_v34, %v639_v21  ;;  %v703_v39 = vmax.f32 %v699_v57, 0.0  ;;  %v576_v18 = vpop.permute.xlu1 %575  ;;  %v556_v9 = vpop.permute.xlu0 %555  ;;  %v3378_v17 = vld [vmem:[#allocation55_spill] sm:$0xff] }
 0x143   : > { %3359 = vst [vmem:[#allocation91_spill] sm:$0xff] %v2769_v29  ;;  %3361 = vst [vmem:[#allocation93_spill] sm:$0xff] %v2777_v27  ;;  %v827_v1 = vadd.f32 %v2562_v37, %v822_v5  ;;  %v859_v44 = vadd.f32 %v2565_v38, %v854_v11  ;;  %v735_v22 = vmax.f32 %v731_v14, 0.0  ;;  %v2794_v62 = vmul.f32 %v2369_v47, %v2451_v2 }
 0x144   : > { %3362 = vst [vmem:[#allocation94_spill] sm:$0xff] %v2783_v43  ;;  %3363 = vst [vmem:[#allocation95_spill] sm:$0xff] %v2787_v0  ;;  %v2798_v10 = vmul.f32 %v2369_v47, %v2454_v3  ;;  %v2802_v0 = vmul.f32 %v2369_v47, %v2472_v8  ;;  %v648_v57 = vadd.f32 %v644_v4, %v2591_v50  ;;  %v767_v21 = vmax.f32 %v763_v16, 0.0 }
 0x145   : > { %3364 = vst [vmem:[#allocation96_spill] sm:$0xff] %v2794_v62  ;;  %v676_v5 = vmul.f32 %v2568_v40, %v671_v30  ;;  %v584_v11 = vsel %vm2701_vm5, %v570_v12, %v2521_v23  ;;  %v586_v14 = vsel %vm2705_vm6, %v576_v18, %v2553_v33  ;;  %v799_v62 = vmax.f32 %v795_v31, 0.0 }
 0x146   : > { %3365 = vst [vmem:[#allocation97_spill] sm:$0xff] %v2798_v10  ;;  %3366 = vst [vmem:[#allocation98_spill] sm:$0xff] %v2802_v0  ;;  %v1609_v43 = vadd.f32 -1.0, %v584_v11  ;;  %v1611_v10 = vadd.f32 -1.0, %v586_v14  ;;  %v708_v47 = vmul.f32 %v2571_v41, %v703_v39  ;;  %v831_v0 = vmax.f32 %v827_v1, 0.0  ;;  %v573_v4 = vpop.permute.xlu0 %572 }
 0x147   : > { %v680_v27 = vadd.f32 %v676_v5, %v648_v57  ;;  %v863_v8 = vmax.f32 %v859_v44, 0.0  ;;  %v585_v29 = vsel %vm2754_vm7, %v573_v4, %v556_v9  ;;  %v2817_v23 = vmul.f32 %v2400_v51, %v2431_v58  ;;  %v3371_v5 = vld [vmem:[#allocation47_spill] sm:$0xff]  ;;  %v3375_v4 = vld [vmem:[#allocation52_spill] sm:$0xff] }
 0x148   : > { %v596_v26 = vadd.f32 0.03125, %v1609_v43  ;;  %v598_v30 = vadd.f32 0.03125, %v1611_v10  ;;  %v740_v12 = vmul.f32 %v2574_v42, %v735_v22  ;;  %v2822_v16 = vmul.f32 %v2400_v51, %v2434_v59 }
 0x149   : > { %3367 = vst [vmem:[#allocation99_spill] sm:$0xff] %v2817_v23  ;;  %v712_v33 = vadd.f32 %v708_v47, %v680_v27  ;;  %v2826_v31 = vmul.f32 %v2400_v51, %v2437_v60  ;;  %v772_v43 = vmul.f32 %v2578_v45, %v767_v21  ;;  %v804_v39 = vmul.f32 %v2581_v46, %v799_v62  ;;  %v3370_v62 = vld [vmem:[#allocation44_spill] sm:$0xff]  ;;  %v3374_v21 = vld [vmem:[#allocation51_spill] sm:$0xff] }
 0x14a   : > { %3368 = vst [vmem:[#allocation100_spill] sm:$0xff] %v2822_v16  ;;  %v600_v1 = vmul.f32 32.0, %v596_v26  ;;  %v2830_v58 = vmul.f32 32.0, %v598_v30  ;;  %v836_v44 = vmul.f32 %v2584_v48, %v831_v0  ;;  %v868_v18 = vmul.f32 %v2594_v52, %v863_v8  ;;  %v3372_v0 = vld [vmem:[#allocation48_spill] sm:$0xff]  ;;  %v3373_v8 = vld [vmem:[#allocation50_spill] sm:$0xff] }
 0x14b   : > { %3369 = vst [vmem:[#allocation101_spill] sm:$0xff] %v2826_v31  ;;  %v744_v27 = vadd.f32 %v740_v12, %v712_v33  ;;  %v1610_v9 = vadd.f32 -1.0, %v585_v29  ;;  %v3376_v33 = vld [vmem:[#allocation53_spill] sm:$0xff]  ;;  %v3377_v16 = vld [vmem:[#allocation54_spill] sm:$0xff] }
 0x14c   : > { %v618_v59 = vmul.f32 %v2414_v53, %v600_v1  ;;  %v650_v22 = vmul.f32 %v2419_v54, %v600_v1  ;;  %v682_v60 = vmul.f32 %v2422_v55, %v600_v1  ;;  %v714_v10 = vmul.f32 %v2425_v56, %v600_v1  ;;  %893 = vst [vmem:[%s2730_s5] sm:$0xff] %v600_v1 }
 0x14d   : > { %895 = vst [vmem:[%s2730_s5 + $0x10] sm:$0xff] %v2830_v58  ;;  %v776_v26 = vadd.f32 %v772_v43, %v744_v27  ;;  %v746_v57 = vmul.f32 %v3370_v62, %v600_v1  ;;  %v778_v11 = vmul.f32 %v3371_v5, %v600_v1  ;;  %v810_v14 = vmul.f32 %v3372_v0, %v600_v1  ;;  %v3379_v43 = vld [vmem:[#allocation56_spill] sm:$0xff] }
 0x14e   : > { %v627_v29 = vadd.f32 %v3373_v8, %v618_v59  ;;  %v659_v47 = vadd.f32 %v3374_v21, %v650_v22  ;;  %v691_v30 = vadd.f32 %v3375_v4, %v682_v60  ;;  %v723_v12 = vadd.f32 %v3376_v33, %v714_v10 }
 0x14f   : > { %v808_v31 = vadd.f32 %v804_v39, %v776_v26  ;;  %v755_v23 = vadd.f32 %v3377_v16, %v746_v57  ;;  %v787_v3 = vadd.f32 %v3378_v17, %v778_v11  ;;  %v819_v27 = vadd.f32 %v3379_v43, %v810_v14 }
 0x150   : > { %v632_v15 = vadd.f32 %v2493_v13, %v627_v29  ;;  %v664_v6 = vadd.f32 %v2508_v19, %v659_v47  ;;  %v696_v35 = vadd.f32 %v2511_v20, %v691_v30  ;;  %v728_v59 = vadd.f32 %v2524_v24, %v723_v12 }
 0x151   : > { %v840_v22 = vadd.f32 %v836_v44, %v808_v31  ;;  %v760_v60 = vadd.f32 %v2539_v28, %v755_v23  ;;  %v792_v10 = vadd.f32 %v2559_v36, %v787_v3  ;;  %v824_v39 = vadd.f32 %v2562_v37, %v819_v27 }
 0x152   : > { %v636_v16 = vmax.f32 %v632_v15, 0.0  ;;  %v668_v26 = vmax.f32 %v664_v6, 0.0  ;;  %v700_v17 = vmax.f32 %v696_v35, 0.0  ;;  %v732_v57 = vmax.f32 %v728_v59, 0.0  ;;  %v3380_v59 = vld [vmem:[#allocation57_spill] sm:$0xff] }
 0x153   : > { %v872_v11 = vadd.f32 %v868_v18, %v840_v22  ;;  %v764_v14 = vmax.f32 %v760_v60, 0.0  ;;  %v796_v8 = vmax.f32 %v792_v10, 0.0  ;;  %v597_v29 = vadd.f32 0.03125, %v1610_v9  ;;  %v3382_v10 = vld [vmem:[#allocation59_spill] sm:$0xff] }
 0x154   : > { %v641_v21 = vmul.f32 %v2556_v34, %v636_v16  ;;  %v673_v47 = vmul.f32 %v2568_v40, %v668_v26  ;;  %v705_v31 = vmul.f32 %v2571_v41, %v700_v17  ;;  %v828_v44 = vmax.f32 %v824_v39, 0.0  ;;  %v3383_v16 = vld [vmem:[#allocation60_spill] sm:$0xff]  ;;  %v3384_v17 = vld [vmem:[#allocation61_spill] sm:$0xff] }
 0x155   : > { %v876_v23 = vsub.f32 0.0, %v872_v11  ;;  %v737_v3 = vmul.f32 %v2574_v42, %v732_v57  ;;  %v769_v4 = vmul.f32 %v2578_v45, %v764_v14  ;;  %v801_v6 = vmul.f32 %v2581_v46, %v796_v8  ;;  %v3385_v11 = vld [vmem:[#allocation62_spill] sm:$0xff] }
 0x156   : > { %v645_v35 = vadd.f32 %v641_v21, %v2591_v50  ;;  %v842_v15 = vmul.f32 %v2469_v7, %v600_v1  ;;  %v620_v18 = vmul.f32 %v2414_v53, %v2830_v58  ;;  %v652_v9 = vmul.f32 %v2419_v54, %v2830_v58  ;;  %v3381_v1 = vld [vmem:[#allocation58_spill] sm:$0xff] }
 0x157   : > { %v883_v30 = vmul.f32 1.442695, %v876_v23  ;;  %v684_v33 = vmul.f32 %v2422_v55, %v2830_v58  ;;  %v716_v12 = vmul.f32 %v2425_v56, %v2830_v58  ;;  %v748_v43 = vmul.f32 %v3370_v62, %v2830_v58 }
 0x158   : > { %v677_v27 = vadd.f32 %v673_v47, %v645_v35  ;;  %v851_v22 = vadd.f32 %v3380_v59, %v842_v15  ;;  %v629_v60 = vadd.f32 %v3381_v1, %v620_v18  ;;  %v661_v39 = vadd.f32 %v3382_v10, %v652_v9  ;;  %v2885_v35 = vpop.permute.xlu1 %911  ;;  %v3386_v1 = vld [vmem:[#allocation63_spill] sm:$0xff] }
 0x159   : > { %1814 = vpow2.f32 %v883_v30  ;;  %v693_v26 = vadd.f32 %v3383_v16, %v684_v33  ;;  %v725_v57 = vadd.f32 %v3384_v17, %v716_v12  ;;  %v757_v14 = vadd.f32 %v3385_v11, %v748_v43 }
 0x15a   : > { %v709_v8 = vadd.f32 %v705_v31, %v677_v27  ;;  %v856_v21 = vadd.f32 %v2565_v38, %v851_v22  ;;  %v634_v23 = vadd.f32 %v2493_v13, %v629_v60  ;;  %v666_v47 = vadd.f32 %v2508_v19, %v661_v39 }
 0x15b   : > { %v698_v15 = vadd.f32 %v2511_v20, %v693_v26  ;;  %v730_v18 = vadd.f32 %v2524_v24, %v725_v57  ;;  %v762_v9 = vadd.f32 %v2539_v28, %v757_v14  ;;  %v780_v30 = vmul.f32 %v3371_v5, %v2830_v58  ;;  %v932_v57 = vpop.permute.xlu0 %931 }
 0x15c   : > { %v741_v33 = vadd.f32 %v737_v3, %v709_v8  ;;  %v860_v12 = vmax.f32 %v856_v21, 0.0  ;;  %v638_v31 = vmax.f32 %v634_v23, 0.0  ;;  %v670_v43 = vmax.f32 %v666_v47, 0.0  ;;  %v2896_v17 = vpop.permute.xlu1 %914 }
 0x15d   : > { %v702_v27 = vmax.f32 %v698_v15, 0.0  ;;  %v734_v59 = vmax.f32 %v730_v18, 0.0  ;;  %v766_v22 = vmax.f32 %v762_v9, 0.0  ;;  %v789_v60 = vadd.f32 %v3386_v1, %v780_v30 }
 0x15e   : > { %v773_v10 = vadd.f32 %v769_v4, %v741_v33  ;;  %v833_v39 = vmul.f32 %v2584_v48, %v828_v44  ;;  %v865_v16 = vmul.f32 %v2594_v52, %v860_v12  ;;  %v643_v26 = vmul.f32 %v2556_v34, %v638_v31  ;;  %v3388_v31 = vld [vmem:[#allocation65_spill] sm:$0xff] }
 0x15f   : > { %v675_v3 = vmul.f32 %v2568_v40, %v670_v43  ;;  %v707_v11 = vmul.f32 %v2571_v41, %v702_v27  ;;  %v739_v14 = vmul.f32 %v2574_v42, %v734_v59  ;;  %v794_v8 = vadd.f32 %v2559_v36, %v789_v60 }
 0x160   : > { %v805_v21 = vadd.f32 %v801_v6, %v773_v10  ;;  %v647_v4 = vadd.f32 %v643_v26, %v2591_v50  ;;  %v812_v44 = vmul.f32 %v3372_v0, %v2830_v58  ;;  %v844_v23 = vmul.f32 %v2469_v7, %v2830_v58  ;;  %v3387_v6 = vld [vmem:[#allocation64_spill] sm:$0xff]  ;;  %v3389_v10 = vld [vmem:[#allocation73_spill] sm:$0xff]  ;;  %v3390_v26 = vld [vmem:[#allocation74_spill] sm:$0xff] }
 0x161   : > { %v771_v47 = vmul.f32 %v2578_v45, %v766_v22  ;;  %v798_v15 = vmax.f32 %v794_v8, 0.0  ;;  %v601_v18 = vmul.f32 32.0, %v597_v29  ;;  %v940_v9 = vsel %vm2754_vm7, %v932_v57, %v2896_v17  ;;  %v3391_v57 = vld [vmem:[#allocation75_spill] sm:$0xff] }
 0x162   : > { %v837_v30 = vadd.f32 %v833_v39, %v805_v21  ;;  %v679_v33 = vadd.f32 %v675_v3, %v647_v4  ;;  %v821_v12 = vadd.f32 %v3387_v6, %v812_v44  ;;  %v853_v43 = vadd.f32 %v3388_v31, %v844_v23 }
 0x163   : > { %v803_v27 = vmul.f32 %v2581_v46, %v798_v15  ;;  %v619_v59 = vmul.f32 %v2414_v53, %v601_v18  ;;  %v651_v58 = vmul.f32 %v2419_v54, %v601_v18  ;;  %v683_v22 = vmul.f32 %v2422_v55, %v601_v18  ;;  %894 = vst [vmem:[%s2730_s5 + $0x8] sm:$0xff] %v601_v18 }
 0x164   : > { %v869_v29 = vadd.f32 %v865_v16, %v837_v30  ;;  %v711_v1 = vadd.f32 %v707_v11, %v679_v33  ;;  %v826_v49 = vadd.f32 %v2562_v37, %v821_v12  ;;  %v858_v60 = vadd.f32 %v2565_v38, %v853_v43 }
 0x165   : > { %v628_v39 = vadd.f32 %v3389_v10, %v619_v59  ;;  %v660_v17 = vadd.f32 %v3390_v26, %v651_v58  ;;  %v692_v3 = vadd.f32 %v3391_v57, %v683_v22  ;;  %v715_v8 = vmul.f32 %v2425_v56, %v601_v18  ;;  %v3393_v57 = vld [vmem:[#allocation77_spill] sm:$0xff] }
 0x166   : > { %v1815_v21 = vpop.eup %1814  ;;  %v873_v4 = vsub.f32 0.0, %v869_v29  ;;  %v743_v44 = vadd.f32 %v739_v14, %v711_v1  ;;  %v830_v23 = vmax.f32 %v826_v49, 0.0  ;;  %v862_v15 = vmax.f32 %v858_v60, 0.0  ;;  %v3392_v29 = vld [vmem:[#allocation76_spill] sm:$0xff] }
 0x167   : > { %v888_v6 = vadd.f32 1.0, %v1815_v21  ;;  %v633_v16 = vadd.f32 %v2493_v13, %v628_v39  ;;  %v665_v11 = vadd.f32 %v2508_v19, %v660_v17  ;;  %v697_v30 = vadd.f32 %v2511_v20, %v692_v3 }
 0x168   : > { %v877_v33 = vmul.f32 1.442695, %v873_v4  ;;  %v775_v12 = vadd.f32 %v771_v47, %v743_v44  ;;  %v835_v31 = vmul.f32 %v2584_v48, %v830_v23  ;;  %v867_v43 = vmul.f32 %v2594_v52, %v862_v15 }
 0x169   : > { %1816 = vrcp.f32 %v888_v6  ;;  %v637_v59 = vmax.f32 %v633_v16, 0.0  ;;  %v669_v58 = vmax.f32 %v665_v11, 0.0  ;;  %v701_v22 = vmax.f32 %v697_v30, 0.0  ;;  %v3395_v11 = vld [vmem:[#allocation80_spill] sm:$0xff] }
 0x16a   : > { %1818 = vpow2.f32 %v877_v33  ;;  %v807_v14 = vadd.f32 %v803_v27, %v775_v12  ;;  %v724_v1 = vadd.f32 %v3392_v29, %v715_v8  ;;  %v747_v49 = vmul.f32 %v3370_v62, %v601_v18  ;;  %v3394_v8 = vld [vmem:[#allocation78_spill] sm:$0xff] }
 0x16b   : > { %v642_v60 = vmul.f32 %v2556_v34, %v637_v59  ;;  %v674_v10 = vmul.f32 %v2568_v40, %v669_v58  ;;  %v706_v47 = vmul.f32 %v2571_v41, %v701_v22  ;;  %v779_v39 = vmul.f32 %v3371_v5, %v601_v18 }
 0x16c   : > { %v839_v26 = vadd.f32 %v835_v31, %v807_v14  ;;  %v729_v17 = vadd.f32 %v2524_v24, %v724_v1  ;;  %v756_v3 = vadd.f32 %v3393_v57, %v747_v49  ;;  %v811_v21 = vmul.f32 %v3372_v0, %v601_v18  ;;  %v3396_v31 = vld [vmem:[#allocation81_spill] sm:$0xff] }
 0x16d   : > { %v646_v27 = vadd.f32 %v642_v60, %v2591_v50  ;;  %v788_v4 = vadd.f32 %v3394_v8, %v779_v39  ;;  %v843_v44 = vmul.f32 %v2469_v7, %v601_v18  ;;  %v1620_v23 = vadd.f32 -1.0, %v940_v9 }
 0x16e   : > { %v871_v15 = vadd.f32 %v867_v43, %v839_v26  ;;  %v733_v6 = vmax.f32 %v729_v17, 0.0  ;;  %v761_v16 = vadd.f32 %v2539_v28, %v756_v3  ;;  %v820_v30 = vadd.f32 %v3395_v11, %v811_v21  ;;  %v3398_v11 = vld [vmem:[#allocation67_spill] sm:$0xff] }
 0x16f   : > { %v678_v33 = vadd.f32 %v674_v10, %v646_v27  ;;  %v793_v12 = vadd.f32 %v2559_v36, %v788_v4  ;;  %v852_v59 = vadd.f32 %v3396_v31, %v843_v44  ;;  %v953_v58 = vadd.f32 0.03125, %v1620_v23  ;;  %v3397_v23 = vld [vmem:[#allocation66_spill] sm:$0xff] }
 0x170   : > { %v875_v22 = vsub.f32 0.0, %v871_v15  ;;  %v738_v14 = vmul.f32 %v2574_v42, %v733_v6  ;;  %v765_v29 = vmax.f32 %v761_v16, 0.0  ;;  %v825_v18 = vadd.f32 %v2562_v37, %v820_v30 }
 0x171   : > { %v710_v9 = vadd.f32 %v706_v47, %v678_v33  ;;  %v797_v43 = vmax.f32 %v793_v12, 0.0  ;;  %v857_v1 = vadd.f32 %v2565_v38, %v852_v59  ;;  %v957_v49 = vmul.f32 32.0, %v953_v58  ;;  %v2956_v47 = vpop.permute.xlu1 %920  ;;  %v3399_v33 = vld [vmem:[#allocation68_spill] sm:$0xff] }
 0x172   : > { %v881_v60 = vmul.f32 1.442695, %v875_v22  ;;  %v770_v10 = vmul.f32 %v2578_v45, %v765_v29  ;;  %v829_v39 = vmax.f32 %v825_v18, 0.0  ;;  %v2951_v26 = vmul.f32 %v2400_v51, %v2440_v61  ;;  %v3400_v29 = vld [vmem:[#allocation69_spill] sm:$0xff] }
 0x173   : > { %v742_v17 = vadd.f32 %v738_v14, %v710_v9  ;;  %v802_v57 = vmul.f32 %v2581_v46, %v797_v43  ;;  %v861_v3 = vmax.f32 %v857_v1, 0.0  ;;  %v973_v21 = vmul.f32 %v957_v49, %v2414_v53  ;;  %1624 = vst [vmem:[%s2730_s5 + $0x28] sm:$0xff] %v957_v49 }
 0x174   : > { %1820 = vpow2.f32 %v881_v60  ;;  %v834_v27 = vmul.f32 %v2584_v48, %v829_v39  ;;  %v1001_v8 = vmul.f32 %v957_v49, %v2419_v54  ;;  %v1029_v4 = vmul.f32 %v957_v49, %v2422_v55  ;;  %v3401_v39 = vld [vmem:[#allocation70_spill] sm:$0xff] }
 0x175   : > { %v774_v44 = vadd.f32 %v770_v10, %v742_v17  ;;  %v866_v61 = vmul.f32 %v2594_v52, %v861_v3  ;;  %v981_v15 = vadd.f32 %v3397_v23, %v973_v21  ;;  %v1057_v6 = vmul.f32 %v957_v49, %v2425_v56  ;;  %v929_v43 = vpop.permute.xlu1 %928 }
 0x176   : > { %v1817_v16 = vpop.eup %1816  ;;  %v1009_v30 = vadd.f32 %v3398_v11, %v1001_v8  ;;  %v1037_v12 = vadd.f32 %v3399_v33, %v1029_v4  ;;  %v1085_v31 = vmul.f32 %v957_v49, %v3370_v62  ;;  %v1113_v59 = vmul.f32 %v957_v49, %v3371_v5  ;;  %v3402_v4 = vld [vmem:[#allocation71_spill] sm:$0xff]  ;;  %v3403_v33 = vld [vmem:[#allocation72_spill] sm:$0xff] }
 0x177   : > { %v1819_v58 = vpop.eup %1818  ;;  %904 = vst [vmem:[%s2969_s7 + $0x18] sm:$0xff] %v1817_v16  ;;  %v806_v22 = vadd.f32 %v802_v57, %v774_v44  ;;  %v985_v14 = vadd.f32 %v981_v15, %v2493_v13  ;;  %v1065_v18 = vadd.f32 %v3400_v29, %v1057_v6  ;;  %v1141_v9 = vmul.f32 %v957_v49, %v3372_v0 }
 0x178   : > { %v885_v1 = vadd.f32 1.0, %v1819_v58  ;;  %v1013_v60 = vadd.f32 %v1009_v30, %v2508_v19  ;;  %v1041_v10 = vadd.f32 %v1037_v12, %v2511_v20  ;;  %v1093_v17 = vadd.f32 %v3401_v39, %v1085_v31  ;;  %v3405_v39 = vld [vmem:[#allocation79_spill] sm:$0xff] }
 0x179   : > { %v838_v3 = vadd.f32 %v834_v27, %v806_v22  ;;  %v989_v21 = vmax.f32 %v985_v14, 0.0  ;;  %v1069_v8 = vadd.f32 %v1065_v18, %v2524_v24  ;;  %v1121_v57 = vadd.f32 %v3402_v4, %v1113_v59  ;;  %v935_v31 = vpop.permute.xlu1 %934 }
 0x17a   : > { %1822 = vrcp.f32 %v885_v1  ;;  %v1017_v44 = vmax.f32 %v1013_v60, 0.0  ;;  %v1097_v23 = vadd.f32 %v1093_v17, %v2539_v28  ;;  %v939_v15 = vsel %vm2701_vm5, %v929_v43, %v2885_v35 }
 0x17b   : > { %v870_v6 = vadd.f32 %v866_v61, %v838_v3  ;;  %v993_v16 = vmul.f32 %v989_v21, %v2556_v34  ;;  %v1045_v11 = vmax.f32 %v1041_v10, 0.0  ;;  %v1125_v30 = vadd.f32 %v1121_v57, %v2559_v36 }
 0x17c   : > { %v1073_v27 = vmax.f32 %v1069_v8, 0.0  ;;  %v1149_v12 = vadd.f32 %v3403_v33, %v1141_v9  ;;  %v2989_v59 = vmul.f32 %v2400_v51, %v2448_v63  ;;  %v2993_v58 = vmul.f32 %v2400_v51, %v2451_v2 }
 0x17d   : > { %v874_v32 = vsub.f32 0.0, %v870_v6  ;;  %v997_v35 = vadd.f32 %v993_v16, %v2591_v50  ;;  %v1021_v61 = vmul.f32 %v1017_v44, %v2568_v40  ;;  %v1101_v22 = vmax.f32 %v1097_v23, 0.0  ;;  %v938_v8 = vpop.permute.xlu1 %937 }
 0x17e   : > { %v1129_v14 = vmax.f32 %v1125_v30, 0.0  ;;  %v1153_v29 = vadd.f32 %v1149_v12, %v2562_v37  ;;  %v1169_v18 = vmul.f32 %v957_v49, %v2469_v7  ;;  %v1619_v9 = vadd.f32 -1.0, %v939_v15 }
 0x17f   : > { %v879_v43 = vmul.f32 1.442695, %v874_v32  ;;  %v1025_v1 = vadd.f32 %v1021_v61, %v997_v35  ;;  %v1049_v63 = vmul.f32 %v1045_v11, %v2571_v41  ;;  %v941_v2 = vsel %vm2705_vm6, %v935_v31, %v2741_v25 }
 0x180   : > { %v1157_v10 = vmax.f32 %v1153_v29, 0.0  ;;  %v1177_v17 = vadd.f32 %v3405_v39, %v1169_v18  ;;  %v952_v3 = vadd.f32 0.03125, %v1619_v9  ;;  %v1621_v21 = vadd.f32 -1.0, %v941_v2  ;;  %v3407_v18 = vld [vmem:[#allocation82_spill] sm:$0xff]  ;;  %v3409_v2 = vld [vmem:[#allocation85_spill] sm:$0xff] }
 0x181   : > { %v1821_v4 = vpop.eup %1820  ;;  %1824 = vpow2.f32 %v879_v43  ;;  %v1053_v57 = vadd.f32 %v1049_v63, %v1025_v1  ;;  %v1077_v49 = vmul.f32 %v1073_v27, %v2574_v42  ;;  %v1105_v44 = vmul.f32 %v1101_v22, %v2578_v45  ;;  %v3410_v39 = vld [vmem:[#allocation86_spill] sm:$0xff] }
 0x182   : > { %v887_v23 = vadd.f32 1.0, %v1821_v4  ;;  %v1133_v15 = vmul.f32 %v1129_v14, %v2581_v46  ;;  %v1181_v6 = vadd.f32 %v1177_v17, %v2565_v38  ;;  %v956_v25 = vmul.f32 32.0, %v952_v3  ;;  %v3411_v3 = vld [vmem:[#allocation87_spill] sm:$0xff] }
 0x183   : > { %v1081_v16 = vadd.f32 %v1077_v49, %v1053_v57  ;;  %v1161_v11 = vmul.f32 %v1157_v10, %v2584_v48  ;;  %v954_v30 = vadd.f32 0.03125, %v1621_v21  ;;  %v942_v12 = vsel %vm2456_vm4, %v938_v8, %v2956_v47  ;;  %v3408_v47 = vld [vmem:[#allocation84_spill] sm:$0xff] }
 0x184   : > { %1826 = vrcp.f32 %v887_v23  ;;  %v1185_v31 = vmax.f32 %v1181_v6, 0.0  ;;  %v972_v27 = vmul.f32 %v956_v25, %v2414_v53  ;;  %v1000_v32 = vmul.f32 %v956_v25, %v2419_v54  ;;  %1623 = vst [vmem:[%s2730_s5 + $0x20] sm:$0xff] %v956_v25  ;;  %v3412_v57 = vld [vmem:[#allocation88_spill] sm:$0xff] }
 0x185   : > { %v1109_v35 = vadd.f32 %v1105_v44, %v1081_v16  ;;  %v1028_v61 = vmul.f32 %v956_v25, %v2422_v55  ;;  %v1056_v22 = vmul.f32 %v956_v25, %v2425_v56  ;;  %v1084_v14 = vmul.f32 %v956_v25, %v3370_v62 }
 0x186   : > { %v1189_v29 = vmul.f32 %v1185_v31, %v2594_v52  ;;  %v980_v9 = vadd.f32 %v3407_v18, %v972_v27  ;;  %v1008_v43 = vadd.f32 %v3408_v47, %v1000_v32  ;;  %v1112_v1 = vmul.f32 %v956_v25, %v3371_v5  ;;  %v3413_v32 = vld [vmem:[#allocation89_spill] sm:$0xff] }
 0x187   : > { %v1823_v63 = vpop.eup %1822  ;;  %v1137_v60 = vadd.f32 %v1133_v15, %v1109_v35  ;;  %v1036_v10 = vadd.f32 %v3409_v2, %v1028_v61  ;;  %v1064_v17 = vadd.f32 %v3410_v39, %v1056_v22  ;;  %v1092_v21 = vadd.f32 %v3411_v3, %v1084_v14  ;;  %v3414_v2 = vld [vmem:[#allocation45_spill] sm:$0xff] }
 0x188   : > { %901 = vst [vmem:[%s2969_s7] sm:$0xff] %v1823_v63  ;;  %v984_v8 = vadd.f32 %v980_v9, %v2493_v13  ;;  %v1012_v4 = vadd.f32 %v1008_v43, %v2508_v19  ;;  %v1120_v49 = vadd.f32 %v3412_v57, %v1112_v1  ;;  %v1140_v44 = vmul.f32 %v956_v25, %v3372_v0 }
 0x189   : > { %v1165_v23 = vadd.f32 %v1161_v11, %v1137_v60  ;;  %v1040_v6 = vadd.f32 %v1036_v10, %v2511_v20  ;;  %v1068_v15 = vadd.f32 %v1064_v17, %v2524_v24  ;;  %v1096_v16 = vadd.f32 %v1092_v21, %v2539_v28 }
 0x18a   : > { %v988_v33 = vmax.f32 %v984_v8, 0.0  ;;  %v1016_v31 = vmax.f32 %v1012_v4, 0.0  ;;  %v1124_v27 = vadd.f32 %v1120_v49, %v2559_v36  ;;  %v1148_v35 = vadd.f32 %v3413_v32, %v1140_v44  ;;  %v3416_v32 = vld [vmem:[#allocation91_spill] sm:$0xff] }
 0x18b   : > { %v1193_v61 = vadd.f32 %v1189_v29, %v1165_v23  ;;  %v1044_v22 = vmax.f32 %v1040_v6, 0.0  ;;  %v1072_v14 = vmax.f32 %v1068_v15, 0.0  ;;  %v1100_v18 = vmax.f32 %v1096_v16, 0.0 }
 0x18c   : > { %v992_v9 = vmul.f32 %v988_v33, %v2556_v34  ;;  %v1128_v47 = vmax.f32 %v1124_v27, 0.0  ;;  %v1152_v11 = vadd.f32 %v1148_v35, %v2562_v37  ;;  %v1622_v43 = vadd.f32 -1.0, %v942_v12 }
 0x18d   : > { %v1197_v1 = vsub.f32 0.0, %v1193_v61  ;;  %v1020_v63 = vmul.f32 %v1016_v31, %v2568_v40  ;;  %v1048_v60 = vmul.f32 %v1044_v22, %v2571_v41  ;;  %v3041_v10 = vmul.f32 %v2400_v51, %v3414_v2  ;;  %v3415_v51 = vld [vmem:[#allocation90_spill] sm:$0xff]  ;;  %v3417_v61 = vld [vmem:[#allocation92_spill] sm:$0xff] }
 0x18e   : > { %v1825_v39 = vpop.eup %1824  ;;  %v996_v29 = vadd.f32 %v992_v9, %v2591_v50  ;;  %v1076_v17 = vmul.f32 %v1072_v14, %v2574_v42  ;;  %v1104_v3 = vmul.f32 %v1100_v18, %v2578_v45  ;;  %v1168_v12 = vmul.f32 %v956_v25, %v2469_v7  ;;  %v3418_v14 = vld [vmem:[#allocation93_spill] sm:$0xff] }
 0x18f   : > { %v886_v21 = vadd.f32 1.0, %v1825_v39  ;;  %v1202_v8 = vmul.f32 1.442695, %v1197_v1  ;;  %v1132_v4 = vmul.f32 %v1128_v47, %v2581_v46  ;;  %v958_v57 = vmul.f32 32.0, %v954_v30 }
 0x190   : > { %v1024_v49 = vadd.f32 %v1020_v63, %v996_v29  ;;  %v1156_v44 = vmax.f32 %v1152_v11, 0.0  ;;  %v1176_v23 = vadd.f32 %v3415_v51, %v1168_v12  ;;  %v955_v6 = vadd.f32 0.03125, %v1622_v43  ;;  %v3419_v43 = vld [vmem:[#allocation94_spill] sm:$0xff]  ;;  %v3420_v29 = vld [vmem:[#allocation95_spill] sm:$0xff] }
 0x191   : > { %v1827_v15 = vpop.eup %1826  ;;  %1828 = vrcp.f32 %v886_v21  ;;  %v974_v16 = vmul.f32 %v958_v57, %v2414_v53  ;;  %v1002_v33 = vmul.f32 %v958_v57, %v2419_v54  ;;  %v1030_v31 = vmul.f32 %v958_v57, %v2422_v55  ;;  %1625 = vst [vmem:[%s2730_s5 + $0x30] sm:$0xff] %v958_v57 }
 0x192   : > { %903 = vst [vmem:[%s2969_s7 + $0x10] sm:$0xff] %v1827_v15  ;;  %1830 = vpow2.f32 %v1202_v8  ;;  %v1052_v25 = vadd.f32 %v1048_v60, %v1024_v49  ;;  %v1180_v27 = vadd.f32 %v1176_v23, %v2565_v38  ;;  %v1058_v30 = vmul.f32 %v958_v57, %v2425_v56 }
 0x193   : > { %v982_v35 = vadd.f32 %v3416_v32, %v974_v16  ;;  %v1010_v22 = vadd.f32 %v3417_v61, %v1002_v33  ;;  %v1038_v18 = vadd.f32 %v3418_v14, %v1030_v31  ;;  %v1086_v9 = vmul.f32 %v958_v57, %v3370_v62  ;;  %v3423_v61 = vld [vmem:[#allocation49_spill] sm:$0xff] }
 0x194   : > { %v1080_v47 = vadd.f32 %v1076_v17, %v1052_v25  ;;  %v1184_v11 = vmax.f32 %v1180_v27, 0.0  ;;  %v1066_v1 = vadd.f32 %v3419_v43, %v1058_v30  ;;  %v1114_v63 = vmul.f32 %v958_v57, %v3371_v5  ;;  %v3422_v17 = vld [vmem:[#allocation96_spill] sm:$0xff] }
 0x195   : > { %v986_v60 = vadd.f32 %v982_v35, %v2493_v13  ;;  %v1014_v2 = vadd.f32 %v1010_v22, %v2508_v19  ;;  %v1042_v39 = vadd.f32 %v1038_v18, %v2511_v20  ;;  %v1094_v12 = vadd.f32 %v3420_v29, %v1086_v9  ;;  %v1846_v35 = vld [vmem:[%s3421_s8 + $0x38] sm:$0xff]  ;;  %v3424_v9 = vld [vmem:[#allocation97_spill] sm:$0xff] }
 0x196   : > { %v1108_v21 = vadd.f32 %v1104_v3, %v1080_v47  ;;  %v1160_v8 = vmul.f32 %v1156_v44, %v2584_v48  ;;  %v1070_v49 = vadd.f32 %v1066_v1, %v2524_v24  ;;  %v1122_v51 = vadd.f32 %v3422_v17, %v1114_v63 }
 0x197   : > { %v990_v23 = vmax.f32 %v986_v60, 0.0  ;;  %v1018_v15 = vmax.f32 %v1014_v2, 0.0  ;;  %v1046_v16 = vmax.f32 %v1042_v39, 0.0  ;;  %v1098_v33 = vadd.f32 %v1094_v12, %v2539_v28 }
 0x198   : > { %v1136_v31 = vadd.f32 %v1132_v4, %v1108_v21  ;;  %v1074_v25 = vmax.f32 %v1070_v49, 0.0  ;;  %v1126_v27 = vadd.f32 %v1122_v51, %v2559_v36  ;;  %v1142_v30 = vmul.f32 %v958_v57, %v3372_v0  ;;  %v3425_v21 = vld [vmem:[#allocation98_spill] sm:$0xff] }
 0x199   : > { %v1188_v32 = vmul.f32 %v1184_v11, %v2594_v52  ;;  %v994_v3 = vmul.f32 %v990_v23, %v2556_v34  ;;  %v1102_v44 = vmax.f32 %v1098_v33, 0.0  ;;  %v3076_v22 = vmul.f32 %v1846_v35, %v3423_v61 }
 0x19a   : > { %v1164_v14 = vadd.f32 %v1160_v8, %v1136_v31  ;;  %v1022_v18 = vmul.f32 %v1018_v15, %v2568_v40  ;;  %v1050_v4 = vmul.f32 %v1046_v16, %v2571_v41  ;;  %v1150_v47 = vadd.f32 %v3424_v9, %v1142_v30  ;;  %v3427_v30 = vld [vmem:[#allocation100_spill] sm:$0xff] }
 0x19b   : > { %v998_v43 = vadd.f32 %v994_v3, %v2591_v50  ;;  %v1078_v1 = vmul.f32 %v1074_v25, %v2574_v42  ;;  %v1170_v11 = vmul.f32 %v958_v57, %v2469_v7  ;;  %v959_v63 = vmul.f32 32.0, %v955_v6  ;;  %v3426_v25 = vld [vmem:[#allocation99_spill] sm:$0xff] }
 0x19c   : > { %v1192_v60 = vadd.f32 %v1188_v32, %v1164_v14  ;;  %v1106_v2 = vmul.f32 %v1102_v44, %v2578_v45  ;;  %v1130_v39 = vmax.f32 %v1126_v27, 0.0  ;;  %v1154_v29 = vadd.f32 %v1150_v47, %v2562_v37  ;;  %v3428_v44 = vld [vmem:[#allocation101_spill] sm:$0xff] }
 0x19d   : > { %v1026_v12 = vadd.f32 %v1022_v18, %v998_v43  ;;  %v1178_v8 = vadd.f32 %v3425_v21, %v1170_v11  ;;  %v975_v49 = vmul.f32 %v959_v63, %v2414_v53  ;;  %v1003_v17 = vmul.f32 %v959_v63, %v2419_v54  ;;  %1626 = vst [vmem:[%s2730_s5 + $0x38] sm:$0xff] %v959_v63 }
 0x19e   : > { %v1829_v51 = vpop.eup %1828  ;;  %v1196_v23 = vsub.f32 0.0, %v1192_v60  ;;  %v1158_v15 = vmax.f32 %v1154_v29, 0.0  ;;  %v1031_v57 = vmul.f32 %v959_v63, %v2422_v55  ;;  %v1059_v6 = vmul.f32 %v959_v63, %v2425_v56 }
 0x19f   : > { %v1831_v16 = vpop.eup %1830  ;;  %902 = vst [vmem:[%s2969_s7 + $0x8] sm:$0xff] %v1829_v51  ;;  %v1054_v33 = vadd.f32 %v1050_v4, %v1026_v12  ;;  %v1182_v31 = vadd.f32 %v1178_v8, %v2565_v38  ;;  %v983_v27 = vadd.f32 %v3426_v25, %v975_v49  ;;  %v1011_v32 = vadd.f32 %v3427_v30, %v1003_v17 }
 0x1a0   : > { %v1209_v53 = vadd.f32 1.0, %v1831_v16  ;;  %v1200_v3 = vmul.f32 1.442695, %v1196_v23  ;;  %v1134_v54 = vmul.f32 %v1130_v39, %v2581_v46  ;;  %v1039_v35 = vadd.f32 %v3428_v44, %v1031_v57 }
 0x1a1   : > { %v1082_v61 = vadd.f32 %v1078_v1, %v1054_v33  ;;  %v1186_v14 = vmax.f32 %v1182_v31, 0.0  ;;  %v987_v55 = vadd.f32 %v983_v27, %v2493_v13  ;;  %v1015_v56 = vadd.f32 %v1011_v32, %v2508_v19 }
 0x1a2   : > { %1832 = vrcp.f32 %v1209_v53  ;;  %v1043_v18 = vadd.f32 %v1039_v35, %v2511_v20  ;;  %v1067_v4 = vadd.f32 %v2951_v26, %v1059_v6  ;;  %v1087_v9 = vmul.f32 %v959_v63, %v3370_v62 }
 0x1a3   : > { %1834 = vpow2.f32 %v1200_v3  ;;  %v1110_v47 = vadd.f32 %v1106_v2, %v1082_v61  ;;  %v1162_v43 = vmul.f32 %v1158_v15, %v2584_v48  ;;  %v991_v11 = vmax.f32 %v987_v55, 0.0 }
 0x1a4   : > { %v1019_v60 = vmax.f32 %v1015_v56, 0.0  ;;  %v1047_v39 = vmax.f32 %v1043_v18, 0.0  ;;  %v1071_v1 = vadd.f32 %v1067_v4, %v2524_v24  ;;  %v1095_v13 = vadd.f32 %v2989_v59, %v1087_v9 }
 0x1a5   : > { %v1138_v29 = vadd.f32 %v1134_v54, %v1110_v47  ;;  %v995_v19 = vmul.f32 %v991_v11, %v2556_v34  ;;  %v1115_v20 = vmul.f32 %v959_v63, %v3371_v5  ;;  %v1143_v26 = vmul.f32 %v959_v63, %v3372_v0 }
 0x1a6   : > { %v1190_v62 = vmul.f32 %v1186_v14, %v2594_v52  ;;  %v1023_v2 = vmul.f32 %v1019_v60, %v2568_v40  ;;  %v1075_v12 = vmax.f32 %v1071_v1, 0.0  ;;  %v1099_v21 = vadd.f32 %v1095_v13, %v2539_v28 }
 0x1a7   : > { %v1166_v8 = vadd.f32 %v1162_v43, %v1138_v29  ;;  %v999_v49 = vadd.f32 %v995_v19, %v2591_v50  ;;  %v1123_v24 = vadd.f32 %v2993_v58, %v1115_v20  ;;  %v1151_v59 = vadd.f32 %v3041_v10, %v1143_v26 }
 0x1a8   : > { %v1051_v34 = vmul.f32 %v1047_v39, %v2571_v41  ;;  %v1103_v17 = vmax.f32 %v1099_v21, 0.0  ;;  %v1171_v5 = vmul.f32 %v959_v63, %v2469_v7  ;;  %v1079_v58 = vmul.f32 %v1075_v12, %v2574_v42 }
 0x1a9   : > { %v1194_v0 = vadd.f32 %v1190_v62, %v1166_v8  ;;  %v1027_v51 = vadd.f32 %v1023_v2, %v999_v49  ;;  %v1127_v23 = vadd.f32 %v1123_v24, %v2559_v36  ;;  %v1155_v40 = vadd.f32 %v1151_v59, %v2562_v37 }
 0x1aa   : > { %v1179_v28 = vadd.f32 %v3076_v22, %v1171_v5  ;;  %v1107_v7 = vmul.f32 %v1103_v17, %v2578_v45 }
 0x1ab   : > { %v1198_v15 = vsub.f32 0.0, %v1194_v0  ;;  %v1055_v50 = vadd.f32 %v1051_v34, %v1027_v51  ;;  %v1131_v57 = vmax.f32 %v1127_v23, 0.0  ;;  %v1159_v63 = vmax.f32 %v1155_v40, 0.0 }
 0x1ac   : > { %v1183_v10 = vadd.f32 %v1179_v28, %v2565_v38 }
 0x1ad   : > { %v1204_v41 = vmul.f32 1.442695, %v1198_v15  ;;  %v1083_v6 = vadd.f32 %v1079_v58, %v1055_v50  ;;  %v1135_v37 = vmul.f32 %v1131_v57, %v2581_v46  ;;  %v1163_v42 = vmul.f32 %v1159_v63, %v2584_v48 }
 0x1ae   : > { %v1187_v33 = vmax.f32 %v1183_v10, 0.0 }
 0x1af   : > { %v1833_v16 = vpop.eup %1832  ;;  %1836 = vpow2.f32 %v1204_v41  ;;  %v1111_v36 = vadd.f32 %v1107_v7, %v1083_v6 }
 0x1b0   : > { %v1835_v22 = vpop.eup %1834  ;;  %1632 = vst [vmem:[%s2969_s7 + $0x28] sm:$0xff] %v1833_v16  ;;  %v1191_v27 = vmul.f32 %v1187_v33, %v2594_v52 }
 0x1b1   : > { %v1208_v31 = vadd.f32 1.0, %v1835_v22  ;;  %v1139_v25 = vadd.f32 %v1135_v37, %v1111_v36 }
 0x1b3   : > { %1838 = vrcp.f32 %v1208_v31  ;;  %v1167_v38 = vadd.f32 %v1163_v42, %v1139_v25 }
 0x1b5   : > { %v1195_v45 = vadd.f32 %v1191_v27, %v1167_v38 }
 0x1b7   : > { %v1199_v30 = vsub.f32 0.0, %v1195_v45 }
 0x1b9   : > { %v1206_v32 = vmul.f32 1.442695, %v1199_v30 }
 0x1bb   : > { %1840 = vpow2.f32 %v1206_v32 }
 0x1bc   : > { %v1837_v46 = vpop.eup %1836 }
 0x1bd   : > { %v1210_v53 = vadd.f32 1.0, %v1837_v46 }
 0x1bf   : > { %1842 = vrcp.f32 %v1210_v53 }
 0x1c0   : > { %v1839_v3 = vpop.eup %1838 }
 0x1c1   : > { %1631 = vst [vmem:[%s2969_s7 + $0x20] sm:$0xff] %v1839_v3 }
 0x1c8   : > { %v1841_v54 = vpop.eup %1840 }
 0x1c9   : > { %v1211_v44 = vadd.f32 1.0, %v1841_v54 }
 0x1cb   : > { %1844 = vrcp.f32 %v1211_v44 }
 0x1cc   : > { %v1843_v48 = vpop.eup %1842 }
 0x1cd   : > { %1633 = vst [vmem:[%s2969_s7 + $0x30] sm:$0xff] %v1843_v48 }
 0x1d8   : > { %v1845_v35 = vpop.eup %1844 }
 0x1d9   : > { %1634 = vst [vmem:[%s2969_s7 + $0x38] sm:$0xff] %v1845_v35 }
 0x1da   : > { %s3432_s6 = sld [smem:[#allocation40_spill]]  ;;  %s3136_s16 = sshll.u32 %s3430_s11, 9 }
 0x1db   : > { %s1265_s19 = sshll.u32 %s2730_s5, 4  ;;  %s3433_s4 = sld [smem:[#allocation108_spill]]  ;;  %s1266_s19 = int_to_ptr.vmem [resolvable:$true] %s1265_s19 }
 0x1dc   : > { %s2013_s24 = smov 512   ;;  %s2014_s21 = smov 4096  }
 0x1dd   : > { %s2015_s0 = smov 4   ;;  %s2016_s26 = smov 128  }
 0x1de   : > { %s2017_s28 = smov 8   ;;  %s2018_s30 = smov 131072  }
 0x1df   : > { %s2019_s25 = smov 0  }
 0x1e0   : > { %p3434_p2 = scmp.ne.s32.totalorder %s3432_s6, 0 }
 0x1e1   : > { %s1254_s18 = scalar_lea.hbm %s3433_s4, %s3136_s16 }
 0x1e2   : > { %1678 = sst [smem:[#allocation21]] (%p3434_p2), %s2013_s24 }
 0x1e3   : > { %1679 = sst [smem:[#allocation21 + $0x1]] (%p3434_p2), %s2014_s21 }
 0x1e4   : > { %1680 = sst [smem:[#allocation21 + $0x2]] (%p3434_p2), %s2015_s0 }
 0x1e5   : > { %1681 = sst [smem:[#allocation21 + $0x3]] (%p3434_p2), %s2016_s26 }
 0x1e6   : > { %1682 = sst [smem:[#allocation21 + $0x4]] (%p3434_p2), %s2016_s26 }
 0x1e7   : > { %1683 = sst [smem:[#allocation21 + $0x5]] (%p3434_p2), %s2017_s28 }
 0x1e8   : > { %1684 = dma.general (%p3434_p2), %s1266_s19, 1024, %s1254_s18, %s1232_s12, %s2018_s30, [#allocation21], %s2019_s25, 0  }
 0x1e9   : > { %s3435_s20 = sld [smem:[#allocation109_spill]]  ;;  %s1304_s3 = sshll.u32 %s3421_s8, 4  ;;  %s1305_s3 = int_to_ptr.vmem [resolvable:$true] %s1304_s3 }
 0x1ea   : > { %s2020_s27 = smov 512   ;;  %s2021_s10 = smov 4096  }
 0x1eb   : > { %1685 = sst [smem:[#allocation23]] (%p3434_p2), %s2020_s27  ;;  %s2022_s17 = smov 4  }
 0x1ec   : > { %1686 = sst [smem:[#allocation23 + $0x1]] (%p3434_p2), %s2021_s10  ;;  %s2023_s2 = smov 128  }
 0x1ed   : > { %1687 = sst [smem:[#allocation23 + $0x2]] (%p3434_p2), %s2022_s17  ;;  %s2024_s5 = smov 8  }
 0x1ee   : > { %1688 = sst [smem:[#allocation23 + $0x3]] (%p3434_p2), %s2023_s2  ;;  %s2025_s9 = smov 131072  }
 0x1ef   : > { %s1293_s15 = scalar_lea.hbm %s3435_s20, %s3136_s16  ;;  %1689 = sst [smem:[#allocation23 + $0x4]] (%p3434_p2), %s2023_s2 }
 0x1f0   : > { %1690 = sst [smem:[#allocation23 + $0x5]] (%p3434_p2), %s2024_s5  ;;  %s2026_s8 = smov 0  }
 0x1f1   : > { %1691 = dma.general (%p3434_p2), %s1305_s3, 1024, %s1293_s15, %s3133_s14, %s2025_s9, [#allocation23], %s2026_s8, 0  }
 0x1f2   : > { %s3436_s13 = sld [smem:[#allocation110_spill]]  ;;  %s1343_s22 = sshll.u32 %s2969_s7, 4  ;;  %s1344_s22 = int_to_ptr.vmem [resolvable:$true] %s1343_s22 }
 0x1f3   : > { %s2027_s23 = smov 512   ;;  %s2028_s4 = smov 4096  }
 0x1f4   : > { %1692 = sst [smem:[#allocation25]] (%p3434_p2), %s2027_s23  ;;  %s2029_s18 = smov 4  }
 0x1f5   : > { %1693 = sst [smem:[#allocation25 + $0x1]] (%p3434_p2), %s2028_s4  ;;  %s2030_s24 = smov 128  }
 0x1f6   : > { %1694 = sst [smem:[#allocation25 + $0x2]] (%p3434_p2), %s2029_s18  ;;  %s2031_s21 = smov 8  }
 0x1f7   : > { %1695 = sst [smem:[#allocation25 + $0x3]] (%p3434_p2), %s2030_s24  ;;  %s2033_s7 = smov 0  }
 0x1f8   : > { %s1332_s19 = scalar_lea.hbm %s3436_s13, %s3136_s16  ;;  %1696 = sst [smem:[#allocation25 + $0x4]] (%p3434_p2), %s2030_s24 }
 0x1f9   : > { %1697 = sst [smem:[#allocation25 + $0x5]] (%p3434_p2), %s2031_s21  ;;  %s2032_s16 = smov 131072  }
 0x1fa   : > { %1698 = dma.general (%p3434_p2), %s1344_s22, 1024, %s1332_s19, %s3133_s14, %s2032_s16, [#allocation25], %s2033_s7, 0  }
 0x1fb PF: > { %s3437_s0 = sld [smem:[#allocation36_spill]] }
 0x1fc   : > { %s3438_s26 = sld [smem:[#allocation33_spill]] }
 0x1fd   : > { %s3439_s28 = sld [smem:[#allocation41_spill]] }
 0x201   : > { %p1733_p7 = scmp.ge.s32.totalorder %s3437_s0, 2 }
 0x202   : > { %s1371_s30 = sand.u32 1, %s3438_s26  }
 0x203   : > { %p3440_p4 = scmp.ne.s32.totalorder %s3439_s28, 0  ;;  %s1372_s25 = scalar_lea.sflag [#allocation5], %s1371_s30 }
 0x205   : > { %p1716_p11 = pnand %p1733_p7, %p3440_p4 }
 0x207   : > { %p1717_p12 = pneg %p1716_p11 }
 0x209   : > { %1977 = dma.done.wait (%p1717_p12), %s1372_s25, 1024  }
 0x20a   : > { %1979 = vsyncadd (%p1717_p12), %s1372_s25, 4294966272  ;;  %s3441_s1 = sadd.s32 4294967294, %s3437_s0  }
 0x20b   : > { %s1380_s29 = sand.u32 1, %s3441_s1  }
 0x20c   : > { %s1381_s20 = scalar_lea.sflag [#allocation16], %s1380_s29 }
 0x20d   : > { %1981 = dma.done.wait (%p1717_p12), %s1381_s20, 2048  }
 0x20e   : > { %1983 = vsyncadd (%p1717_p12), %s1381_s20, 4294965248  ;;  %s3442_s14 = sld [smem:[#allocation38_spill]] }
 0x20f   : > { %s3443_s11 = sld [smem:[#allocation34_spill]] }
 0x210   : > { %s3444_s12 = sld [smem:[#allocation35_spill]] }
 0x211   : > { %s3445_s13 = sld [smem:[#allocation39_spill]] }
 0x214   : > { %p30_p0 = scmp.ge.s32.totalorder %s3442_s14, 10  }
 0x216   :  { %32 = sbr.rel (!%p30_p0) target bundleno = 21 (0x15), region = 178 }
 0x21b   :  { %1395 = vsyncpa [#allocation4], 1 }
 0x21c   :  { %1397 = vsyncpa [#allocation4 + $0x1], 1 }
 0x21d   :  { %1398 = vsyncpa [#allocation8], 1 }
 0x21e   :  { %1400 = vsyncpa [#allocation8 + $0x1], 1 }
 0x21f   :  { %1401 = vsyncpa [#allocation5], 1 }
 0x220   :  { %1403 = vsyncpa [#allocation5 + $0x1], 1 }
 0x221   :  { %1404 = vsyncpa [#allocation16], 1 }
 0x222   :  { %1406 = vsyncpa [#allocation16 + $0x1], 1 }
 0x223   :  { %1407 = vsyncpa [#allocation6], 1 }
 0x224   :  { %1409 = vsyncpa [#allocation6 + $0x1], 1 }
 0x225   :  { %1410 = vsyncpa [#allocation12], 1 }

// kernel: tpu_custom_call.1
= control target key start
LH: loop header
LB: loop body
LE: loop exit
PB: predicated region body
PF: predicated region fallthrough
CT: control target
= control target key end

     0   :  { %s2857_s0 = inlined_call_operand.hbm [shape: f32[2,256,128], index: 0, kind: input, shape index: {}]   ;;  %s2858_s1 = inlined_call_operand.hbm [shape: f32[2,256,128], index: 1, kind: input, shape index: {}]   ;;  %s2859_s2 = inlined_call_operand.vmem [shape: f32[16], index: 2, kind: input, shape index: {}]   ;;  %s2860_s3 = inlined_call_operand.vmem [shape: f32[8], index: 3, kind: input, shape index: {}]   ;;  %s2861_s4 = inlined_call_operand.vmem [shape: f32[8], index: 4, kind: input, shape index: {}]   ;;  %s2862_s5 = inlined_call_operand.<no memory space> [shape: f32[1], index: 5, kind: input, shape index: {}]   ;;  %s2863_s6 = inlined_call_operand.hbm [shape: f32[2,256,128], index: 6, kind: output, shape index: {0}]   ;;  %s2864_s7 = inlined_call_operand.hbm [shape: f32[2,256,128], index: 7, kind: output, shape index: {1}]   ;;  %s2865_s8 = inlined_call_operand.hbm [shape: f32[2,256,128], index: 8, kind: output, shape index: {2}]  }
   0x1   :  { %2900 = sst [smem:[#allocation53_spill]] %s2857_s0 }
   0x2   :  { %2901 = sst [smem:[#allocation54_spill]] %s2859_s2 }
   0x3   :  { %2902 = sst [smem:[#allocation55_spill]] %s2860_s3 }
   0x4   :  { %2903 = sst [smem:[#allocation56_spill]] %s2861_s4 }
   0x5   :  { %14 = sst [smem:[#allocation2]] %s2862_s5 }
   0x6   :  { %15 = vsyncpa [#allocation4], 0 }
   0x7   :  { %17 = vsyncpa [#allocation4 + $0x1], 0 }
   0x8   :  { %18 = vsyncpa [#allocation8], 0 }
   0x9   :  { %20 = vsyncpa [#allocation8 + $0x1], 0 }
   0xa   :  { %21 = vsyncpa [#allocation6], 0 }
   0xb   :  { %22 = vsyncpa [#allocation11], 0 }
   0xc   :  { %23 = vsyncpa [#allocation5], 0 }
   0xd   :  { %25 = vsyncpa [#allocation5 + $0x1], 0 }
   0xe   :  { %26 = vsyncpa [#allocation15], 0 }
   0xf   :  { %28 = vsyncpa [#allocation15 + $0x1], 0  ;;  %s1901_s29 = smov 0   ;;  %s1903_s30 = smov 0  }
  0x10   :  { %s1905_s9 = smov 0   ;;  %s1907_s10 = smov 0  }
  0x11 LB: > { %s1922_s5 = sadd.s32 4294967295, %s1815_s10   ;;  %s2871_s11 = sadd.s32 4294967294, %s1815_s10   ;;  %s1815_s10 = sphi %s1907_s10, %s2963_s10   ;;  %s1811_s9 = sphi %s1905_s9, %s2962_s9   ;;  %s1807_s30 = sphi %s1903_s30, %s2961_s30   ;;  %s1803_s29 = sphi %s1901_s29, %s2960_s29  }
  0x12   : > { %s1926_s12 = sadd.s32 1, %s1815_s10   ;;  %s41_s13 = sadd.s32 1, %s1811_s9 }
  0x13   : > { %s38_s14 = ssub.s32 %s1815_s10, %s1926_s12  ;;  %p48_p0 = scmp.ne.s32.totalorder %s1811_s9, %s1807_s30 }
  0x14   : > { %p39_p1 = scmp.eq.s32.totalorder %s38_s14, 0  ;;  %p49_p2 = scmp.eq.s32.totalorder %s1815_s10, 0 }
  0x15   : > { %p54_p3 = scmp.ne.s32.totalorder %s1807_s30, %s1803_s29  ;;  %p2866_p4 = scmp.eq.s32.totalorder %s1922_s5, 0 }
  0x16   : > { %s1938_s15 = scalar_select %p39_p1, %s1811_s9, %s41_s13  }
  0x17   : > { %p1940_p5 = por %p49_p2, %p48_p0  ;;  %p1946_p6 = por %p2866_p4, %p54_p3 }
  0x18   : > { %2904 = sst [smem:[#allocation35_spill]] %s1938_s15  ;;  %p188_p7 = scmp.eq.s32.totalorder %s1922_s5, 7 }
  0x19   : > { %s2905_s16 = scalar_select %p1940_p5, 1, 0 }
  0x1a   : > { %s2906_s17 = scalar_select %p1946_p6, 1, 0 }
  0x1b   : > { %p194_p8 = scmp.eq.s32.totalorder %s2871_s11, 7  ;;  %p1438_p9 = scmp.ge.s32.totalorder %s1815_s10, 1 }
  0x1c   : > { %p253_p10 = scmp.lt.s32.totalorder %s1815_s10, 9  ;;  %p1955_p11 = por %p188_p7, %p48_p0 }
  0x1d   : > { %p1959_p12 = por %p194_p8, %p54_p3  ;;  %s2910_s3 = sld [smem:[#allocation55_spill]] }
  0x1e   : > { %s2907_s18 = scalar_select %p1955_p11, 1, 0 }
  0x1f   : > { %s2908_s19 = scalar_select %p1959_p12, 1, 0 }
  0x20   : > { %p1963_p13 = pnand %p1438_p9, %p253_p10  ;;  %s2911_s2 = sld [smem:[#allocation54_spill]] }
  0x21   : > { %s2913_s4 = sld [smem:[#allocation56_spill]] }
  0x22   : > { %s2909_s20 = scalar_select %p1963_p13, 1, 0 }
  0x23   : > { %s277_s23 = sshll.u32 %s2910_s3, 4  ;;  %p1589_p1 = pneg %p1963_p13  ;;  %s278_s23 = int_to_ptr.vmem [resolvable:$true] %s277_s23 }
  0x24   : > { %s1716_s21 = scalar_lea.vmem %s278_s23, 16  ;;  %p1724_p9 = scmp.lt.s32.totalorder %s278_s23, %s278_s23 }
  0x25   : > { %p1977_p0 = pnand %p1589_p1, %p2866_p4  ;;  %p1717_p2 = scmp.ne.s32.totalorder %s278_s23, %s1716_s21 }
  0x26   : > { %s266_s26 = sshll.u32 %s2911_s2, 4  ;;  %p1725_p10 = scmp.lt.s32.totalorder %s1716_s21, %s1716_s21  ;;  %s267_s26 = int_to_ptr.vmem [resolvable:$true] %s266_s26 }
  0x27   : > { %s288_s14 = sshll.u32 %s2913_s4, 4  ;;  %p1718_p3 = pneg %p1977_p0  ;;  %s1984_s14 = int_to_ptr.vmem [resolvable:$true] %s288_s14 }
  0x28   : > { %p1726_p1 = por %p1725_p10, %p1724_p9 }
  0x29   : > { %p1719_p7 = pnand %p1718_p3, %p1717_p2 }
  0x2b   : > { %p1720_p8 = pneg %p1719_p7 }
  0x2d   : > { %p1727_p4 = pnand %p1726_p1, %p1720_p8 }
  0x2f   : > { %1730 = shalt.err (!%p1727_p4)
}
  0x30   : > { %s1817_s22 = smov [#allocation10]   ;;  %s1731_s24 = scalar_lea.vmem %s267_s26, 16 }
  0x31   : > { %1595 = dma.vmem_to_smem (!%p1977_p0), %s278_s23, 16, %s1817_s22, [#allocation11]  }
  0x32   : > { %p1732_p12 = scmp.ne.s32.totalorder %s267_s26, %s1731_s24  ;;  %p1739_p13 = scmp.lt.s32.totalorder %s267_s26, %s267_s26 }
  0x33   : > { %p1740_p5 = scmp.lt.s32.totalorder %s1731_s24, %s1731_s24 }
  0x34   : > { %p1734_p11 = pnand %p1732_p12, %p1718_p3 }
  0x35   : > { %p1741_p2 = por %p1740_p5, %p1739_p13 }
  0x36   : > { %p1735_p6 = pneg %p1734_p11 }
  0x38   : > { %p1742_p7 = pnand %p1741_p2, %p1735_p6 }
  0x3a   : > { %1745 = shalt.err (!%p1742_p7)
}
  0x3b   : > { %s1818_s25 = smov [#allocation9]   ;;  %s1746_s23 = scalar_lea.vmem %s1984_s14, 16 }
  0x3c   : > { %1592 = dma.vmem_to_smem (!%p1977_p0), %s267_s26, 16, %s1818_s25, [#allocation6]  }
  0x3d   : > { %p1747_p4 = scmp.ne.s32.totalorder %s1984_s14, %s1746_s23  ;;  %p1754_p11 = scmp.lt.s32.totalorder %s1984_s14, %s1984_s14 }
  0x3e   : > { %p1755_p9 = scmp.lt.s32.totalorder %s1746_s23, %s1746_s23 }
  0x3f   : > { %p1749_p8 = pnand %p1747_p4, %p1718_p3 }
  0x40   : > { %p1756_p5 = por %p1755_p9, %p1754_p11 }
  0x41   : > { %p1750_p12 = pneg %p1749_p8 }
  0x43   : > { %p1757_p6 = pnand %p1756_p5, %p1750_p12 }
  0x45   : > { %1760 = shalt.err (!%p1757_p6)
}
  0x46   : > { %s1819_s28 = smov [#allocation12]   ;;  %p1442_p13 = scmp.ge.s32.totalorder %s1815_s10, 8 }
  0x47   : > { %1598 = dma.vmem_to_smem (!%p1977_p0), %s1984_s14, 16, %s1819_s28, [#allocation11]  }
  0x48   : > { %298 = sbr.rel (%p1442_p13) target bundleno = 104 (0x68), region = 32 }
  0x4d   : > { %s2010_s26 = sand.u32 1, %s1811_s9   ;;  %s1530_s13 = sshll.u32 %s1815_s10, 9 }
  0x4e   : > { %s1443_s21 = sshll.u32 %s2010_s26, 6  ;;  %s2914_s0 = sld [smem:[#allocation53_spill]] }
  0x4f   : > { %p2915_p0 = scmp.ne.s32.totalorder %s2905_s16, 0  ;;  %s306_s25 = scalar_lea.vmem [#allocation3], %s1443_s21 }
  0x50   : > { %s325_s23 = sshll.u32 %s306_s25, 4  ;;  %s1820_s11 = smov 4096   ;;  %s326_s23 = int_to_ptr.vmem [resolvable:$true] %s325_s23 }
  0x51   : > { %s1541_s24 = scalar_select %p2915_p0, [#allocation0], [#allocation27] }
  0x52   : > { %1542 = sst [smem:[#allocation18]] (%p2915_p0), %s1820_s11  ;;  %s1821_s2 = smov 512  }
  0x53   : > { %s317_s28 = sld [smem:[%s1541_s24]]   ;;  %s1822_s3 = smov 4  }
  0x54   : > { %s312_s14 = scalar_lea.hbm %s2914_s0, %s1530_s13  ;;  %1543 = sst [smem:[#allocation18 + $0x1]] (%p2915_p0), %s1821_s2 }
  0x55   : > { %1544 = sst [smem:[#allocation18 + $0x2]] (%p2915_p0), %s1822_s3  ;;  %s1823_s22 = smov 128  }
  0x56   : > { %1545 = sst [smem:[#allocation18 + $0x3]] (%p2915_p0), %s1823_s22  ;;  %s1824_s25 = smov 8  }
  0x57   : > { %1546 = sst [smem:[#allocation18 + $0x4]] (%p2915_p0), %s1823_s22  ;;  %s303_s0 = scalar_lea.sflag [#allocation4], %s2010_s26 }
  0x58   : > { %1547 = sst [smem:[#allocation18 + $0x5]] (%p2915_p0), %s1824_s25  ;;  %s1825_s4 = smov 131072  }
  0x59   : > { %s1446_s27 = sshll.u32 %s317_s28, 26 }
  0x5a   : > { %s1447_s24 = sadd.s32 134217728, %s1446_s27 }
  0x5b   : > { %1548 = dma.general (%p2915_p0), %s312_s14, 1024, %s326_s23, %s303_s0, %s1825_s4, [#allocation18], %s1447_s24, 0  }
  0x5c   : > { %s358_s2 = scalar_lea.hbm %s2858_s1, %s1530_s13  ;;  %s352_s28 = scalar_lea.vmem [#allocation7], %s1443_s21 }
  0x5d   : > { %s1549_s3 = scalar_select %p2915_p0, [#allocation0], [#allocation28] }
  0x5e   : > { %s371_s22 = sshll.u32 %s352_s28, 4  ;;  %s1826_s25 = smov 4096   ;;  %s372_s22 = int_to_ptr.vmem [resolvable:$true] %s371_s22 }
  0x5f   : > { %s363_s27 = sld [smem:[%s1549_s3]]   ;;  %s1827_s0 = smov 512  }
  0x60   : > { %1550 = sst [smem:[#allocation20]] (%p2915_p0), %s1826_s25  ;;  %s1828_s4 = smov 4  }
  0x61   : > { %1551 = sst [smem:[#allocation20 + $0x1]] (%p2915_p0), %s1827_s0  ;;  %s1829_s15 = smov 128  }
  0x62   : > { %1552 = sst [smem:[#allocation20 + $0x2]] (%p2915_p0), %s1828_s4  ;;  %s1830_s21 = smov 8  }
  0x63   : > { %1553 = sst [smem:[#allocation20 + $0x3]] (%p2915_p0), %s1829_s15  ;;  %s349_s23 = scalar_lea.sflag [#allocation8], %s2010_s26 }
  0x64   : > { %1554 = sst [smem:[#allocation20 + $0x4]] (%p2915_p0), %s1829_s15  ;;  %s1831_s24 = smov 131072  }
  0x65   : > { %s1451_s13 = sshll.u32 %s363_s27, 26  ;;  %1555 = sst [smem:[#allocation20 + $0x5]] (%p2915_p0), %s1830_s21 }
  0x66   : > { %s1452_s14 = sadd.s32 134217728, %s1451_s13 }
  0x67   : > { %1556 = dma.general (%p2915_p0), %s358_s2, 1024, %s372_s22, %s349_s23, %s1831_s24, [#allocation20], %s1452_s14, 0  }
  0x68 PF: > { %p2916_p3 = scmp.ne.s32.totalorder %s2909_s20, 0 }
  0x6a   : > { %396 = sbr.rel (%p2916_p3) target bundleno = 342 (0x156), region = 44 }
  0x6f   : > { %s2057_s11 = sand.u32 1, %s1807_s30   ;;  %p2917_p10 = scmp.ne.s32.totalorder %s2906_s17, 0 }
  0x70   : > { %s2060_s3 = sshll.u32 %s2057_s11, 6  ;;  %s399_s28 = scalar_lea.sflag [#allocation4], %s2057_s11 }
  0x71   : > { %s2064_s27 = scalar_lea.vmem [#allocation3], %s2060_s3 }
  0x72   : > { %1778 = dma.done.wait (%p2917_p10), %s399_s28, 1024  }
  0x73   : > { %1780 = vsyncadd (%p2917_p10), %s399_s28, 4294966272  ;;  %s408_s16 = scalar_lea.sflag [#allocation8], %s2057_s11  ;;  %s2072_s20 = scalar_lea.vmem [#allocation7], %s2060_s3 }
  0x74   : > { %1782 = dma.done.wait (%p2917_p10), %s408_s16, 1024  }
  0x75   : > { %1784 = vsyncadd (%p2917_p10), %s408_s16, 4294966272  ;;  %p2918_p1 = scmp.eq.s32.totalorder %s1922_s5, 0 }
  0x77   : > { %1786 = dma.done.wait (%p2918_p1), [#allocation6], 16   ;;  %p2919_p2 = pmov %p2918_p1 }
  0x78   : > { %p2920_p7 = pmov %p2918_p1 }
  0x79   : > { %1788 = vsyncadd (%p2919_p2), [#allocation6], 4294967280 }
  0x7a   : > { %1790 = dma.done.wait (%p2920_p7), [#allocation11], 32   ;;  %p2921_p4 = pmov %p2918_p1 }
  0x7c   : > { %1792 = vsyncadd (%p2921_p4), [#allocation11], 4294967264 }
  0x7d   : > { %428 = sfence }
  0x7e   : > { %v510_v0 = vld [vmem:[%s2064_s27] sm:$0xff]  ;;  %v511_v1 = vld [vmem:[%s2064_s27 + $0x8] sm:$0xff]  ;;  %v512_v2 = vld [vmem:[%s2064_s27 + $0x10] sm:$0xff]  ;;  %s2108_s17 = scalar_lea.vmem [#allocation13], %s2060_s3  ;;  %s477_s26 = sld [smem:[#allocation9]] }
  0x7f   : > { %v1491_v3 = vadd.f32 -1.0, %v510_v0  ;;  %v1492_v4 = vadd.f32 -1.0, %v511_v1  ;;  %v1493_v5 = vadd.f32 -1.0, %v512_v2  ;;  %v513_v6 = vld [vmem:[%s2064_s27 + $0x18] sm:$0xff]  ;;  %v514_v7 = vld [vmem:[%s2072_s20] sm:$0xff]  ;;  %v515_v8 = vld [vmem:[%s2072_s20 + $0x8] sm:$0xff] }
  0x80   : > { %v1494_v9 = vadd.f32 -1.0, %v513_v6  ;;  %v530_v10 = vmul.f32 0.02, %v514_v7  ;;  %v531_v11 = vmul.f32 0.02, %v515_v8  ;;  %v516_v12 = vld [vmem:[%s2072_s20 + $0x10] sm:$0xff] }
  0x81   : > { %v522_v13 = vadd.f32 0.03125, %v1491_v3  ;;  %v523_v14 = vadd.f32 0.03125, %v1492_v4  ;;  %v524_v15 = vadd.f32 0.03125, %v1493_v5  ;;  %v532_v16 = vmul.f32 0.02, %v516_v12  ;;  %v517_v20 = vld [vmem:[%s2072_s20 + $0x18] sm:$0xff] }
  0x82   : > { %v525_v17 = vadd.f32 0.03125, %v1494_v9  ;;  %v534_v18 = vmax.f32 %v530_v10, 1e-05  ;;  %v535_v19 = vmax.f32 %v531_v11, 1e-05  ;;  %v1495_v25 = vld [vmem:[%s2064_s27 + $0x20] sm:$0xff] }
  0x83   : > { %v2094_v21 = vmul.f32 32.0, %v522_v13  ;;  %v2096_v22 = vmul.f32 32.0, %v523_v14  ;;  %v2098_v23 = vmul.f32 32.0, %v524_v15  ;;  %v536_v24 = vmax.f32 %v532_v16, 1e-05  ;;  %s2121_s2 = scalar_lea.vmem [#allocation14], %s2060_s3 }
  0x84   : > { %v2101_v26 = vmul.f32 32.0, %v525_v17  ;;  %v2103_v27 = vmin.f32 %v534_v18, 0.99999  ;;  %v2105_v28 = vmin.f32 %v535_v19, 0.99999  ;;  %v1503_v29 = vadd.f32 -1.0, %v1495_v25 }
  0x85   : > { %819 = vst [vmem:[%s2108_s17] sm:$0xff] %v2094_v21  ;;  %820 = vst [vmem:[%s2108_s17 + $0x8] sm:$0xff] %v2096_v22  ;;  %v2116_v30 = vmin.f32 %v536_v24, 0.99999  ;;  %v533_v31 = vmul.f32 0.02, %v517_v20  ;;  %s2127_s22 = sld [smem:[#allocation9 + $0x2]]  ;;  %v2156_v48 = vstv %s477_s26 }
  0x86   : > { %821 = vst [vmem:[%s2108_s17 + $0x10] sm:$0xff] %v2098_v23  ;;  %822 = vst [vmem:[%s2108_s17 + $0x18] sm:$0xff] %v2101_v26  ;;  %v845_v32 = vadd.f32 0.03125, %v1503_v29  ;;  %v1496_v33 = vld [vmem:[%s2064_s27 + $0x28] sm:$0xff]  ;;  %v1497_v34 = vld [vmem:[%s2064_s27 + $0x30] sm:$0xff]  ;;  %s1463_s25 = sld [smem:[#allocation9 + $0x4]]  ;;  %v544_v52 = vmul.f32 %v2156_v48, %v2094_v21  ;;  %v545_v54 = vmul.f32 %v2156_v48, %v2096_v22  ;;  %v2175_v55 = vmul.f32 %v2156_v48, %v2098_v23 }
  0x87   : > { %823 = vst [vmem:[%s2121_s2] sm:$0xff] %v2103_v27  ;;  %824 = vst [vmem:[%s2121_s2 + $0x8] sm:$0xff] %v2105_v28  ;;  %v1498_v35 = vld [vmem:[%s2064_s27 + $0x38] sm:$0xff]  ;;  %v537_v36 = vmax.f32 %v533_v31, 1e-05  ;;  %v1504_v37 = vadd.f32 -1.0, %v1496_v33  ;;  %v1505_v38 = vadd.f32 -1.0, %v1497_v34 }
  0x88   : > { %825 = vst [vmem:[%s2121_s2 + $0x10] sm:$0xff] %v2116_v30  ;;  %s2134_s0 = sld [smem:[#allocation9 + $0x6]]  ;;  %v2136_v39 = vmul.f32 32.0, %v845_v32  ;;  %v1506_v40 = vadd.f32 -1.0, %v1498_v35  ;;  %v1499_v41 = vld [vmem:[%s2072_s20 + $0x20] sm:$0xff]  ;;  %v1500_v42 = vld [vmem:[%s2072_s20 + $0x28] sm:$0xff] }
  0x89   : > { %v2140_v43 = vmin.f32 %v537_v36, 0.99999  ;;  %s2142_s4 = sld [smem:[#allocation9 + $0x8]]  ;;  %v846_v44 = vadd.f32 0.03125, %v1504_v37  ;;  %v847_v45 = vadd.f32 0.03125, %v1505_v38 }
  0x8a   : > { %2922 = vst [vmem:[#allocation36_spill] sm:$0xff] %v2136_v39  ;;  %s2144_s15 = sld [smem:[#allocation9 + $0xa]]  ;;  %1507 = vst [vmem:[%s2108_s17 + $0x20] sm:$0xff] %v2136_v39  ;;  %v2148_v46 = vadd.f32 0.03125, %v1506_v40  ;;  %v2150_v47 = vmul.f32 0.02, %v1499_v41 }
  0x8b   : > { %2923 = vst [vmem:[#allocation37_spill] sm:$0xff] %v2140_v43  ;;  %826 = vst [vmem:[%s2121_s2 + $0x18] sm:$0xff] %v2140_v43  ;;  %s2154_s13 = sld [smem:[#allocation9 + $0xc]]  ;;  %v2158_v49 = vmul.f32 32.0, %v846_v44  ;;  %v2160_v50 = vmul.f32 32.0, %v847_v45  ;;  %v2169_v53 = vstv %s2127_s22 }
  0x8c   : > { %2924 = vst [vmem:[#allocation38_spill] sm:$0xff] %v2148_v46  ;;  %2925 = vst [vmem:[#allocation39_spill] sm:$0xff] %v2150_v47  ;;  %v2162_v51 = vmul.f32 0.02, %v1500_v42  ;;  %s2164_s21 = sld [smem:[#allocation9 + $0xe]]  ;;  %v576_v56 = vmul.f32 %v2169_v53, %v2094_v21  ;;  %v2181_v57 = vstv %s1463_s25  ;;  %v577_v58 = vmul.f32 %v2169_v53, %v2096_v22 }
  0x8d   : > { %2926 = vst [vmem:[#allocation40_spill] sm:$0xff] %v2158_v49  ;;  %2927 = vst [vmem:[#allocation41_spill] sm:$0xff] %v2160_v50  ;;  %s2177_s14 = sld [smem:[#allocation9 + $0x1]]  ;;  %v2187_v59 = vmul.f32 %v2169_v53, %v2098_v23  ;;  %v608_v60 = vmul.f32 %v2181_v57, %v2094_v21  ;;  %v609_v62 = vmul.f32 %v2181_v57, %v2096_v22 }
  0x8e   : > { %2928 = vst [vmem:[#allocation42_spill] sm:$0xff] %v2162_v51  ;;  %2929 = vst [vmem:[#allocation43_spill] sm:$0xff] %v2169_v53  ;;  %s2193_s23 = sld [smem:[#allocation9 + $0x3]]  ;;  %v2198_v61 = vstv %s2134_s0  ;;  %v2204_v63 = vmul.f32 %v2181_v57, %v2098_v23 }
  0x8f   : > { %2930 = vst [vmem:[#allocation44_spill] sm:$0xff] %v2181_v57  ;;  %1508 = vst [vmem:[%s2108_s17 + $0x28] sm:$0xff] %v2158_v49  ;;  %s2206_s24 = sld [smem:[#allocation9 + $0x5]]  ;;  %v640_v0 = vmul.f32 %v2198_v61, %v2094_v21  ;;  %v2211_v1 = vstv %s2142_s4  ;;  %v641_v2 = vmul.f32 %v2198_v61, %v2096_v22  ;;  %v2217_v3 = vmul.f32 %v2198_v61, %v2098_v23 }
  0x90   : > { %1509 = vst [vmem:[%s2108_s17 + $0x30] sm:$0xff] %v2160_v50  ;;  %2931 = vst [vmem:[#allocation45_spill] sm:$0xff] %v2198_v61  ;;  %s2219_s28 = sld [smem:[#allocation9 + $0x7]]  ;;  %v672_v4 = vmul.f32 %v2211_v1, %v2094_v21  ;;  %v2224_v5 = vstv %s2144_s15  ;;  %v2228_v6 = vmul.f32 %v2211_v1, %v2096_v22  ;;  %v2232_v7 = vmul.f32 %v2211_v1, %v2098_v23 }
  0x91   : > { %2932 = vst [vmem:[#allocation46_spill] sm:$0xff] %v2211_v1  ;;  %2933 = vst [vmem:[#allocation47_spill] sm:$0xff] %v2224_v5  ;;  %s2234_s27 = sld [smem:[#allocation9 + $0x9]]  ;;  %v704_v8 = vmul.f32 %v2224_v5, %v2094_v21  ;;  %v2239_v9 = vstv %s2154_s13  ;;  %v2243_v10 = vmul.f32 %v2224_v5, %v2096_v22  ;;  %v2247_v11 = vmul.f32 %v2224_v5, %v2098_v23 }
  0x92   : > { %2934 = vst [vmem:[#allocation48_spill] sm:$0xff] %v2239_v9  ;;  %s2249_s16 = sld [smem:[#allocation9 + $0xb]]  ;;  %v736_v12 = vmul.f32 %v2239_v9, %v2094_v21  ;;  %v2254_v13 = vstv %s2164_s21  ;;  %v2258_v14 = vmul.f32 %v2239_v9, %v2096_v22  ;;  %v2262_v15 = vmul.f32 %v2239_v9, %v2098_v23 }
  0x93   : > { %2935 = vst [vmem:[#allocation49_spill] sm:$0xff] %v2254_v13  ;;  %s2264_s26 = sld [smem:[#allocation9 + $0xd]]  ;;  %v2267_v16 = vstv %s2177_s14  ;;  %v768_v17 = vmul.f32 %v2254_v13, %v2094_v21  ;;  %v2273_v18 = vmul.f32 %v2254_v13, %v2096_v22  ;;  %v2277_v19 = vmul.f32 %v2254_v13, %v2098_v23 }
  0x94   : > { %2936 = vst [vmem:[#allocation50_spill] sm:$0xff] %v2267_v16  ;;  %s2279_s22 = sld [smem:[#allocation9 + $0xf]]  ;;  %v549_v20 = vmul.f32 %v2267_v16, %v2103_v27  ;;  %v2284_v24 = vstv %s2193_s23  ;;  %v550_v21 = vmul.f32 %v2267_v16, %v2105_v28  ;;  %v2290_v25 = vmul.f32 %v2267_v16, %v2116_v30 }
  0x95   : > { %2937 = vst [vmem:[#allocation51_spill] sm:$0xff] %v2284_v24  ;;  %s2292_s25 = sld [smem:[#allocation10]]  ;;  %v581_v22 = vmul.f32 %v2284_v24, %v2103_v27  ;;  %v2297_v23 = vstv %s2206_s24  ;;  %v582_v29 = vmul.f32 %v2284_v24, %v2105_v28  ;;  %v2303_v31 = vmul.f32 %v2284_v24, %v2116_v30 }
  0x96   : > { %s2305_s0 = sld [smem:[#allocation10 + $0x1]]  ;;  %v553_v32 = vadd.f32 %v549_v20, %v544_v52  ;;  %v613_v33 = vmul.f32 %v2297_v23, %v2103_v27  ;;  %v2310_v34 = vstv %s2219_s28  ;;  %v554_v35 = vadd.f32 %v550_v21, %v545_v54 }
  0x97   : > { %s2312_s4 = sld [smem:[#allocation10 + $0x2]]  ;;  %v585_v36 = vadd.f32 %v581_v22, %v576_v56  ;;  %v645_v37 = vmul.f32 %v2310_v34, %v2103_v27  ;;  %v2317_v38 = vstv %s2234_s27  ;;  %v586_v40 = vadd.f32 %v582_v29, %v577_v58 }
  0x98   : > { %s2319_s15 = sld [smem:[#allocation10 + $0x3]]  ;;  %v617_v41 = vadd.f32 %v613_v33, %v608_v60  ;;  %v677_v42 = vmul.f32 %v2317_v38, %v2103_v27  ;;  %v2324_v44 = vstv %s2249_s16  ;;  %v614_v45 = vmul.f32 %v2297_v23, %v2105_v28 }
  0x99   : > { %s2328_s13 = sld [smem:[#allocation10 + $0x4]]  ;;  %v649_v52 = vadd.f32 %v645_v37, %v640_v0  ;;  %v709_v54 = vmul.f32 %v2324_v44, %v2103_v27  ;;  %v2333_v56 = vstv %s2264_s26  ;;  %v646_v58 = vmul.f32 %v2310_v34, %v2105_v28 }
  0x9a   : > { %s2337_s21 = sld [smem:[#allocation10 + $0x5]]  ;;  %v681_v60 = vadd.f32 %v677_v42, %v672_v4  ;;  %v741_v20 = vmul.f32 %v2333_v56, %v2103_v27  ;;  %v2342_v21 = vstv %s2279_s22  ;;  %v618_v22 = vadd.f32 %v614_v45, %v609_v62 }
  0x9b   : > { %s2344_s14 = sld [smem:[#allocation10 + $0x6]]  ;;  %v2347_v0 = vstv %s2292_s25  ;;  %v713_v29 = vadd.f32 %v709_v54, %v704_v8  ;;  %v773_v33 = vmul.f32 %v2342_v21, %v2103_v27  ;;  %v650_v37 = vadd.f32 %v646_v58, %v641_v2 }
  0x9c   : > { %s2351_s23 = sld [smem:[#allocation10 + $0x7]]  ;;  %v558_v4 = vadd.f32 %v2347_v0, %v553_v32  ;;  %v2355_v42 = vstv %s2305_s0  ;;  %v745_v50 = vadd.f32 %v741_v20, %v736_v12  ;;  %v559_v62 = vadd.f32 %v2347_v0, %v554_v35 }
  0x9d   : > { %s2358_s24 = sld [smem:[#allocation12]]  ;;  %v590_v45 = vadd.f32 %v2355_v42, %v585_v36  ;;  %v2362_v8 = vstv %s2312_s4  ;;  %v777_v54 = vadd.f32 %v773_v33, %v768_v17  ;;  %v591_v27 = vadd.f32 %v2355_v42, %v586_v40 }
  0x9e   : > { %s2365_s28 = sld [smem:[#allocation12 + $0x1]]  ;;  %v562_v2 = vmax.f32 %v558_v4, 0.0  ;;  %v622_v32 = vadd.f32 %v2362_v8, %v617_v41  ;;  %v2369_v58 = vstv %s2319_s15  ;;  %v563_v12 = vmax.f32 %v559_v62, 0.0  ;;  %s1129_s15 = sand.u32 1, %s1922_s5  }
  0x9f   : > { %s2371_s27 = sld [smem:[#allocation12 + $0x2]]  ;;  %v594_v35 = vmax.f32 %v590_v45, 0.0  ;;  %v654_v36 = vadd.f32 %v2369_v58, %v649_v52  ;;  %v2375_v20 = vstv %s2328_s13  ;;  %v595_v17 = vmax.f32 %v591_v27, 0.0  ;;  %s2774_s13 = scalar_lea.sflag [#allocation15], %s1129_s15 }
  0xa0   : > { %s2377_s16 = sld [smem:[#allocation12 + $0x3]]  ;;  %v626_v40 = vmax.f32 %v622_v32, 0.0  ;;  %v686_v33 = vadd.f32 %v2375_v20, %v681_v60  ;;  %v2381_v41 = vstv %s2337_s21  ;;  %v623_v4 = vadd.f32 %v2362_v8, %v618_v22 }
  0xa1   : > { %s1487_s26 = sld [smem:[#allocation12 + $0x4]]  ;;  %v658_v62 = vmax.f32 %v654_v36, 0.0  ;;  %v718_v45 = vadd.f32 %v2381_v41, %v713_v29  ;;  %v2386_v52 = vstv %s2344_s14  ;;  %v655_v49 = vadd.f32 %v2369_v58, %v650_v37 }
  0xa2   : > { %s1488_s22 = sld [smem:[#allocation12 + $0x5]]  ;;  %v690_v27 = vmax.f32 %v686_v33, 0.0  ;;  %v750_v32 = vadd.f32 %v2386_v52, %v745_v50  ;;  %v2391_v39 = vstv %s2351_s23  ;;  %v627_v60 = vmax.f32 %v623_v4, 0.0 }
  0xa3   : > { %2938 = vst [vmem:[#allocation52_spill] sm:$0xff] %v2391_v39  ;;  %s1489_s25 = sld [smem:[#allocation12 + $0x6]]  ;;  %v2394_v22 = vstv %s2358_s24  ;;  %v722_v36 = vmax.f32 %v718_v45, 0.0  ;;  %v782_v51 = vadd.f32 %v2391_v39, %v777_v54  ;;  %v659_v29 = vmax.f32 %v655_v49, 0.0 }
  0xa4   : > { %s1490_s0 = sld [smem:[#allocation12 + $0x7]]  ;;  %v567_v47 = vmul.f32 %v2394_v22, %v562_v2  ;;  %v2399_v37 = vstv %s2365_s28  ;;  %v754_v33 = vmax.f32 %v750_v32, 0.0  ;;  %v568_v46 = vmul.f32 %v2394_v22, %v563_v12 }
  0xa5   : > { %s509_s4 = sld [smem:[#allocation2]]  ;;  %v599_v50 = vmul.f32 %v2399_v37, %v594_v35  ;;  %v2404_v4 = vstv %s2371_s27  ;;  %v786_v13 = vmax.f32 %v782_v51, 0.0  ;;  %v600_v9 = vmul.f32 %v2399_v37, %v595_v17 }
  0xa6   : > { %v631_v45 = vmul.f32 %v2404_v4, %v626_v40  ;;  %v2409_v54 = vstv %s2377_s16  ;;  %v632_v49 = vmul.f32 %v2404_v4, %v627_v60  ;;  %v678_v2 = vmul.f32 %v2317_v38, %v2105_v28 }
  0xa7   : > { %v663_v32 = vmul.f32 %v2409_v54, %v658_v62  ;;  %v2415_v12 = vstv %s1487_s26  ;;  %v664_v35 = vmul.f32 %v2409_v54, %v659_v29  ;;  %v710_v51 = vmul.f32 %v2324_v44, %v2105_v28 }
  0xa8   : > { %v695_v17 = vmul.f32 %v2415_v12, %v690_v27  ;;  %v2421_v5 = vstv %s1488_s22  ;;  %v682_v40 = vadd.f32 %v678_v2, %v2228_v6  ;;  %v742_v60 = vmul.f32 %v2333_v56, %v2105_v28 }
  0xa9   : > { %v727_v1 = vmul.f32 %v2421_v5, %v722_v36  ;;  %v2427_v61 = vstv %s1489_s25  ;;  %v714_v62 = vadd.f32 %v710_v51, %v2243_v10  ;;  %v774_v29 = vmul.f32 %v2342_v21, %v2105_v28 }
  0xaa   : > { %v759_v57 = vmul.f32 %v2427_v61, %v754_v33  ;;  %v2433_v24 = vstv %s1490_s0  ;;  %v687_v27 = vadd.f32 %v2375_v20, %v682_v40  ;;  %v746_v6 = vadd.f32 %v742_v60, %v2258_v14 }
  0xab   : > { %v2437_v2 = vstv %s509_s4  ;;  %v791_v53 = vmul.f32 %v2433_v24, %v786_v13  ;;  %v719_v36 = vadd.f32 %v2381_v41, %v714_v62  ;;  %v778_v16 = vadd.f32 %v774_v29, %v2273_v18 }
  0xac   : > { %v571_v10 = vadd.f32 %v567_v47, %v2437_v2  ;;  %v572_v28 = vadd.f32 %v568_v46, %v2437_v2  ;;  %v691_v51 = vmax.f32 %v687_v27, 0.0  ;;  %v751_v33 = vadd.f32 %v2386_v52, %v746_v6 }
  0xad   : > { %v723_v43 = vmax.f32 %v719_v36, 0.0  ;;  %v783_v40 = vadd.f32 %v2391_v39, %v778_v16  ;;  %v555_v14 = vadd.f32 %v2290_v25, %v2175_v55  ;;  %v587_v13 = vadd.f32 %v2303_v31, %v2187_v59 }
  0xae   : > { %v603_v60 = vadd.f32 %v599_v50, %v571_v10  ;;  %v604_v62 = vadd.f32 %v600_v9, %v572_v28  ;;  %v696_v18 = vmul.f32 %v2415_v12, %v691_v51  ;;  %v755_v29 = vmax.f32 %v751_v33, 0.0 }
  0xaf   : > { %v728_v47 = vmul.f32 %v2421_v5, %v723_v43  ;;  %v787_v46 = vmax.f32 %v783_v40, 0.0  ;;  %v560_v27 = vadd.f32 %v2347_v0, %v555_v14  ;;  %v592_v6 = vadd.f32 %v2355_v42, %v587_v13 }
  0xb0   : > { %v635_v36 = vadd.f32 %v631_v45, %v603_v60  ;;  %v636_v16 = vadd.f32 %v632_v49, %v604_v62  ;;  %v760_v39 = vmul.f32 %v2427_v61, %v755_v29  ;;  %v615_v55 = vmul.f32 %v2297_v23, %v2116_v30 }
  0xb1   : > { %v792_v59 = vmul.f32 %v2433_v24, %v787_v46  ;;  %v564_v9 = vmax.f32 %v560_v27, 0.0  ;;  %v596_v25 = vmax.f32 %v592_v6, 0.0  ;;  %v647_v31 = vmul.f32 %v2310_v34, %v2116_v30 }
  0xb2   : > { %v667_v43 = vadd.f32 %v663_v32, %v635_v36  ;;  %v668_v50 = vadd.f32 %v664_v35, %v636_v16  ;;  %v619_v10 = vadd.f32 %v615_v55, %v2204_v63  ;;  %v679_v45 = vmul.f32 %v2317_v38, %v2116_v30 }
  0xb3   : > { %v569_v49 = vmul.f32 %v2394_v22, %v564_v9  ;;  %v601_v28 = vmul.f32 %v2399_v37, %v596_v25  ;;  %v651_v51 = vadd.f32 %v647_v31, %v2217_v3  ;;  %v711_v33 = vmul.f32 %v2324_v44, %v2116_v30 }
  0xb4   : > { %v699_v40 = vadd.f32 %v695_v17, %v667_v43  ;;  %v700_v14 = vadd.f32 %v696_v18, %v668_v50  ;;  %v624_v32 = vadd.f32 %v2362_v8, %v619_v10  ;;  %v683_v35 = vadd.f32 %v679_v45, %v2232_v7 }
  0xb5   : > { %v573_v63 = vadd.f32 %v569_v49, %v2437_v2  ;;  %v656_v13 = vadd.f32 %v2369_v58, %v651_v51  ;;  %v715_v60 = vadd.f32 %v711_v33, %v2247_v11  ;;  %v743_v62 = vmul.f32 %v2333_v56, %v2116_v30  ;;  %v2939_v33 = vld [vmem:[#allocation37_spill] sm:$0xff] }
  0xb6   : > { %v731_v3 = vadd.f32 %v727_v1, %v699_v40  ;;  %v732_v29 = vadd.f32 %v728_v47, %v700_v14  ;;  %v628_v46 = vmax.f32 %v624_v32, 0.0  ;;  %v688_v17 = vadd.f32 %v2375_v20, %v683_v35  ;;  %v2940_v40 = vld [vmem:[#allocation50_spill] sm:$0xff]  ;;  %v2942_v32 = vld [vmem:[#allocation43_spill] sm:$0xff] }
  0xb7   : > { %v605_v27 = vadd.f32 %v601_v28, %v573_v63  ;;  %v660_v18 = vmax.f32 %v656_v13, 0.0  ;;  %v720_v6 = vadd.f32 %v2381_v41, %v715_v60  ;;  %v747_v7 = vadd.f32 %v743_v62, %v2262_v15  ;;  %v2943_v63 = vld [vmem:[#allocation51_spill] sm:$0xff] }
  0xb8   : > { %v763_v36 = vadd.f32 %v759_v57, %v731_v3  ;;  %v764_v16 = vadd.f32 %v760_v39, %v732_v29  ;;  %v633_v55 = vmul.f32 %v2404_v4, %v628_v46  ;;  %v692_v11 = vmax.f32 %v688_v17, 0.0  ;;  %v2944_v17 = vld [vmem:[#allocation44_spill] sm:$0xff] }
  0xb9   : > { %v665_v9 = vmul.f32 %v2409_v54, %v660_v18  ;;  %v724_v25 = vmax.f32 %v720_v6, 0.0  ;;  %v752_v1 = vadd.f32 %v2386_v52, %v747_v7  ;;  %v775_v47 = vmul.f32 %v2342_v21, %v2116_v30 }
  0xba   : > { %v795_v31 = vadd.f32 %v791_v53, %v763_v36  ;;  %v796_v43 = vadd.f32 %v792_v59, %v764_v16  ;;  %v637_v50 = vadd.f32 %v633_v55, %v605_v27  ;;  %v697_v10 = vmul.f32 %v2415_v12, %v692_v11  ;;  %v2941_v53 = vld [vmem:[#allocation52_spill] sm:$0xff]  ;;  %v2945_v36 = vld [vmem:[#allocation45_spill] sm:$0xff] }
  0xbb   : > { %v729_v15 = vmul.f32 %v2421_v5, %v724_v25  ;;  %v756_v57 = vmax.f32 %v752_v1, 0.0  ;;  %v779_v39 = vadd.f32 %v775_v47, %v2277_v19  ;;  %v547_v45 = vmul.f32 %v2156_v48, %v2101_v26 }
  0xbc   : > { %v799_v49 = vsub.f32 0.0, %v795_v31  ;;  %v800_v28 = vsub.f32 0.0, %v796_v43  ;;  %v669_v51 = vadd.f32 %v665_v9, %v637_v50  ;;  %v552_v14 = vmul.f32 %v2940_v40, %v2939_v33  ;;  %v2946_v31 = vld [vmem:[#allocation46_spill] sm:$0xff] }
  0xbd   : > { %v761_v30 = vmul.f32 %v2427_v61, %v756_v57  ;;  %v784_v59 = vadd.f32 %v2941_v53, %v779_v39  ;;  %v579_v35 = vmul.f32 %v2942_v32, %v2101_v26  ;;  %v584_v13 = vmul.f32 %v2943_v63, %v2939_v33  ;;  %v2947_v57 = vld [vmem:[#allocation47_spill] sm:$0xff] }
  0xbe   : > { %v803_v19 = vmul.f32 1.442695, %v799_v49  ;;  %v805_v60 = vmul.f32 1.442695, %v800_v28  ;;  %v701_v62 = vadd.f32 %v697_v10, %v669_v51  ;;  %v556_v3 = vadd.f32 %v552_v14, %v547_v45 }
  0xbf   : > { %v788_v29 = vmax.f32 %v784_v59, 0.0  ;;  %v588_v46 = vadd.f32 %v584_v13, %v579_v35  ;;  %v611_v27 = vmul.f32 %v2944_v17, %v2101_v26  ;;  %v616_v18 = vmul.f32 %v2297_v23, %v2939_v33  ;;  %v2948_v35 = vld [vmem:[#allocation48_spill] sm:$0xff] }
  0xc0   : > { %1684 = vpow2.f32 %v803_v19  ;;  %v733_v6 = vadd.f32 %v729_v15, %v701_v62  ;;  %v561_v7 = vadd.f32 %v2347_v0, %v556_v3  ;;  %v643_v16 = vmul.f32 %v2945_v36, %v2101_v26 }
  0xc1   : > { %1686 = vpow2.f32 %v805_v60  ;;  %v793_v55 = vmul.f32 %v2433_v24, %v788_v29  ;;  %v593_v11 = vadd.f32 %v2355_v42, %v588_v46  ;;  %v620_v9 = vadd.f32 %v616_v18, %v611_v27  ;;  %v2949_v18 = vld [vmem:[#allocation49_spill] sm:$0xff] }
  0xc2   : > { %v765_v25 = vadd.f32 %v761_v30, %v733_v6  ;;  %v565_v1 = vmax.f32 %v561_v7, 0.0  ;;  %v648_v47 = vmul.f32 %v2310_v34, %v2939_v33  ;;  %v675_v43 = vmul.f32 %v2946_v31, %v2101_v26 }
  0xc3   : > { %v597_v50 = vmax.f32 %v593_v11, 0.0  ;;  %v625_v10 = vadd.f32 %v2362_v8, %v620_v9  ;;  %v680_v15 = vmul.f32 %v2317_v38, %v2939_v33  ;;  %v707_v39 = vmul.f32 %v2947_v57, %v2101_v26 }
  0xc4   : > { %v797_v45 = vadd.f32 %v793_v55, %v765_v25  ;;  %v570_v49 = vmul.f32 %v2394_v22, %v565_v1  ;;  %v652_v28 = vadd.f32 %v648_v47, %v643_v16  ;;  %v712_v51 = vmul.f32 %v2324_v44, %v2939_v33  ;;  %v2950_v47 = vld [vmem:[#allocation38_spill] sm:$0xff] }
  0xc5   : > { %v602_v14 = vmul.f32 %v2399_v37, %v597_v50  ;;  %v629_v30 = vmax.f32 %v625_v10, 0.0  ;;  %v684_v59 = vadd.f32 %v680_v15, %v675_v43  ;;  %v739_v13 = vmul.f32 %v2948_v35, %v2101_v26  ;;  %v1501_v50 = vld [vmem:[%s2072_s20 + $0x30] sm:$0xff] }
  0xc6   : > { %v801_v19 = vsub.f32 0.0, %v797_v45  ;;  %v574_v60 = vadd.f32 %v570_v49, %v2437_v2  ;;  %v657_v62 = vadd.f32 %v2369_v58, %v652_v28  ;;  %v716_v3 = vadd.f32 %v712_v51, %v707_v39  ;;  %v1502_v39 = vld [vmem:[%s2072_s20 + $0x38] sm:$0xff]  ;;  %s2613_s20 = scalar_lea.vmem [#allocation16], %s2060_s3  ;;  %s1125_s3 = scalar_lea.sflag [#allocation5], %s2057_s11 }
  0xc7   : > { %v634_v29 = vmul.f32 %v2404_v4, %v629_v30  ;;  %v689_v46 = vadd.f32 %v2375_v20, %v684_v59  ;;  %v744_v27 = vmul.f32 %v2333_v56, %v2939_v33  ;;  %v771_v6 = vmul.f32 %v2949_v18, %v2101_v26  ;;  %v2951_v51 = vld [vmem:[#allocation39_spill] sm:$0xff]  ;;  %v2952_v59 = vld [vmem:[#allocation42_spill] sm:$0xff] }
  0xc8   : > { %v807_v7 = vmul.f32 1.442695, %v801_v19  ;;  %v606_v16 = vadd.f32 %v602_v14, %v574_v60  ;;  %v661_v55 = vmax.f32 %v657_v62, 0.0  ;;  %v721_v11 = vadd.f32 %v2381_v41, %v716_v3 }
  0xc9   : > { %v693_v9 = vmax.f32 %v689_v46, 0.0  ;;  %v748_v25 = vadd.f32 %v744_v27, %v739_v13  ;;  %v776_v1 = vmul.f32 %v2342_v21, %v2939_v33  ;;  %v2533_v43 = vmul.f32 32.0, %v2950_v47 }
  0xca   : > { %1688 = vpow2.f32 %v807_v7  ;;  %v638_v10 = vadd.f32 %v634_v29, %v606_v16  ;;  %v666_v15 = vmul.f32 %v2409_v54, %v661_v55  ;;  %v725_v26 = vmax.f32 %v721_v11, 0.0 }
  0xcb   : > { %v698_v45 = vmul.f32 %v2415_v12, %v693_v9  ;;  %v753_v49 = vadd.f32 %v2386_v52, %v748_v25  ;;  %v780_v28 = vadd.f32 %v776_v1, %v771_v6  ;;  %1510 = vst [vmem:[%s2108_s17 + $0x38] sm:$0xff] %v2533_v43  ;;  %v857_v14 = vmax.f32 %v2951_v51, 1e-05 }
  0xcc   : > { %v670_v33 = vadd.f32 %v666_v15, %v638_v10  ;;  %v730_v30 = vmul.f32 %v2421_v5, %v725_v26  ;;  %v858_v13 = vmax.f32 %v2952_v59, 1e-05  ;;  %v855_v19 = vmul.f32 0.02, %v1501_v50  ;;  %v2953_v10 = vld [vmem:[#allocation36_spill] sm:$0xff] }
  0xcd   : > { %v1685_v60 = vpop.eup %1684  ;;  %v757_v62 = vmax.f32 %v753_v49, 0.0  ;;  %v785_v3 = vadd.f32 %v2941_v53, %v780_v28  ;;  %v2546_v29 = vmin.f32 %v857_v14, 0.99999  ;;  %v856_v46 = vmul.f32 0.02, %v1502_v39 }
  0xce   : > { %v1687_v27 = vpop.eup %1686  ;;  %v811_v6 = vadd.f32 1.0, %v1685_v60  ;;  %v702_v7 = vadd.f32 %v698_v45, %v670_v33  ;;  %v2548_v16 = vmin.f32 %v858_v13, 0.99999  ;;  %v859_v55 = vmax.f32 %v855_v19, 1e-05 }
  0xcf   : > { %v812_v11 = vadd.f32 1.0, %v1687_v27  ;;  %v762_v9 = vmul.f32 %v2427_v61, %v757_v62  ;;  %v789_v25 = vmax.f32 %v785_v3, 0.0  ;;  %1511 = vst [vmem:[%s2121_s2 + $0x20] sm:$0xff] %v2546_v29  ;;  %v860_v1 = vmax.f32 %v856_v46, 1e-05 }
  0xd0   : > { %1690 = vrcp.f32 %v811_v6  ;;  %v734_v47 = vadd.f32 %v730_v30, %v702_v7  ;;  %1512 = vst [vmem:[%s2121_s2 + $0x28] sm:$0xff] %v2548_v16  ;;  %v2555_v50 = vmin.f32 %v859_v55, 0.99999  ;;  %v865_v15 = vmul.f32 %v2953_v10, %v2156_v48 }
  0xd1   : > { %1692 = vrcp.f32 %v812_v11  ;;  %v794_v26 = vmul.f32 %v2433_v24, %v789_v25  ;;  %v2560_v39 = vmin.f32 %v860_v1, 0.99999  ;;  %v869_v45 = vmul.f32 %v2546_v29, %v2940_v40 }
  0xd2   : > { %v766_v49 = vadd.f32 %v762_v9, %v734_v47  ;;  %1513 = vst [vmem:[%s2121_s2 + $0x30] sm:$0xff] %v2555_v50  ;;  %v893_v28 = vmul.f32 %v2953_v10, %v2942_v32  ;;  %v897_v51 = vmul.f32 %v2546_v29, %v2943_v63  ;;  %v921_v14 = vmul.f32 %v2953_v10, %v2944_v17 }
  0xd3   : > { %1514 = vst [vmem:[%s2121_s2 + $0x38] sm:$0xff] %v2560_v39  ;;  %v873_v33 = vadd.f32 %v869_v45, %v865_v15  ;;  %v925_v30 = vmul.f32 %v2546_v29, %v2297_v23  ;;  %v949_v59 = vmul.f32 %v2953_v10, %v2945_v36  ;;  %v953_v13 = vmul.f32 %v2546_v29, %v2310_v34 }
  0xd4   : > { %v798_v19 = vadd.f32 %v794_v26, %v766_v49  ;;  %v901_v60 = vadd.f32 %v897_v51, %v893_v28  ;;  %v977_v62 = vmul.f32 %v2953_v10, %v2946_v31  ;;  %v981_v3 = vmul.f32 %v2546_v29, %v2317_v38 }
  0xd5   : > { %v877_v46 = vadd.f32 %v873_v33, %v2347_v0  ;;  %v929_v27 = vadd.f32 %v925_v30, %v921_v14  ;;  %v957_v6 = vadd.f32 %v953_v13, %v949_v59  ;;  %v1005_v7 = vmul.f32 %v2953_v10, %v2947_v57 }
  0xd6   : > { %v802_v55 = vsub.f32 0.0, %v798_v19  ;;  %v905_v11 = vadd.f32 %v901_v60, %v2355_v42  ;;  %v985_v9 = vadd.f32 %v981_v3, %v977_v62  ;;  %v1009_v25 = vmul.f32 %v2546_v29, %v2324_v44 }
  0xd7   : > { %v1689_v1 = vpop.eup %1688  ;;  %v881_v47 = vmax.f32 %v877_v46, 0.0  ;;  %v933_v15 = vadd.f32 %v929_v27, %v2362_v8  ;;  %v961_v26 = vadd.f32 %v957_v6, %v2369_v58  ;;  %v1033_v45 = vmul.f32 %v2953_v10, %v2948_v35 }
  0xd8   : > { %v813_v49 = vadd.f32 1.0, %v1689_v1  ;;  %v809_v28 = vmul.f32 1.442695, %v802_v55  ;;  %v909_v51 = vmax.f32 %v905_v11, 0.0  ;;  %v989_v14 = vadd.f32 %v985_v9, %v2375_v20 }
  0xd9   : > { %v885_v33 = vmul.f32 %v881_v47, %v2394_v22  ;;  %v937_v30 = vmax.f32 %v933_v15, 0.0  ;;  %v965_v59 = vmax.f32 %v961_v26, 0.0  ;;  %v1013_v13 = vadd.f32 %v1009_v25, %v1005_v7  ;;  %v2954_v47 = vld [vmem:[#allocation40_spill] sm:$0xff] }
  0xda   : > { %1694 = vrcp.f32 %v813_v49  ;;  %v913_v19 = vmul.f32 %v909_v51, %v2399_v37  ;;  %v993_v60 = vmax.f32 %v989_v14, 0.0  ;;  %v1037_v62 = vmul.f32 %v2546_v29, %v2333_v56 }
  0xdb   : > { %1696 = vpow2.f32 %v809_v28  ;;  %v889_v3 = vadd.f32 %v885_v33, %v2437_v2  ;;  %v941_v46 = vmul.f32 %v937_v30, %v2404_v4  ;;  %v969_v27 = vmul.f32 %v965_v59, %v2409_v54 }
  0xdc   : > { %v997_v6 = vmul.f32 %v993_v60, %v2415_v12  ;;  %v1017_v55 = vadd.f32 %v1013_v13, %v2381_v41  ;;  %v1041_v7 = vadd.f32 %v1037_v62, %v1033_v45  ;;  %v1061_v11 = vmul.f32 %v2953_v10, %v2949_v18 }
  0xdd   : > { %v1691_v9 = vpop.eup %1690  ;;  %v917_v25 = vadd.f32 %v913_v19, %v889_v3  ;;  %v1065_v1 = vmul.f32 %v2546_v29, %v2342_v21  ;;  %v866_v15 = vmul.f32 %v2954_v47, %v2156_v48  ;;  %v870_v26 = vmul.f32 %v2548_v16, %v2940_v40 }
  0xde   : > { %v1693_v49 = vpop.eup %1692  ;;  %827 = vst [vmem:[%s2613_s20] sm:$0xff] %v1691_v9  ;;  %v1021_v45 = vmax.f32 %v1017_v55, 0.0  ;;  %v1045_v10 = vadd.f32 %v1041_v7, %v2386_v52  ;;  %v894_v28 = vmul.f32 %v2954_v47, %v2942_v32  ;;  %v898_v29 = vmul.f32 %v2548_v16, %v2943_v63 }
  0xdf   : > { %828 = vst [vmem:[%s2613_s20 + $0x8] sm:$0xff] %v1693_v49  ;;  %v945_v51 = vadd.f32 %v941_v46, %v917_v25  ;;  %v1069_v14 = vadd.f32 %v1065_v1, %v1061_v11  ;;  %v874_v33 = vadd.f32 %v870_v26, %v866_v15  ;;  %v922_v30 = vmul.f32 %v2954_v47, %v2944_v17 }
  0xe0   : > { %v1025_v59 = vmul.f32 %v1021_v45, %v2421_v5  ;;  %v1049_v13 = vmax.f32 %v1045_v10, 0.0  ;;  %v902_v19 = vadd.f32 %v898_v29, %v894_v28  ;;  %v926_v60 = vmul.f32 %v2548_v16, %v2297_v23 }
  0xe1   : > { %v973_v62 = vadd.f32 %v969_v27, %v945_v51  ;;  %v1073_v3 = vadd.f32 %v1069_v14, %v2941_v53  ;;  %v878_v55 = vadd.f32 %v874_v33, %v2347_v0  ;;  %v950_v46 = vmul.f32 %v2954_v47, %v2945_v36 }
  0xe2   : > { %v1053_v7 = vmul.f32 %v1049_v13, %v2427_v61  ;;  %v906_v11 = vadd.f32 %v902_v19, %v2355_v42  ;;  %v930_v9 = vadd.f32 %v926_v60, %v922_v30  ;;  %v954_v25 = vmul.f32 %v2548_v16, %v2310_v34 }
  0xe3   : > { %v1001_v1 = vadd.f32 %v997_v6, %v973_v62  ;;  %v1077_v15 = vmax.f32 %v1073_v3, 0.0  ;;  %v882_v26 = vmax.f32 %v878_v55, 0.0  ;;  %v978_v27 = vmul.f32 %v2954_v47, %v2946_v31 }
  0xe4   : > { %v910_v49 = vmax.f32 %v906_v11, 0.0  ;;  %v934_v45 = vadd.f32 %v930_v9, %v2362_v8  ;;  %v958_v10 = vadd.f32 %v954_v25, %v950_v46  ;;  %v982_v28 = vmul.f32 %v2548_v16, %v2317_v38 }
  0xe5   : > { %v1029_v29 = vadd.f32 %v1025_v59, %v1001_v1  ;;  %v1081_v51 = vmul.f32 %v1077_v15, %v2433_v24  ;;  %v886_v14 = vmul.f32 %v882_v26, %v2394_v22  ;;  %v1006_v6 = vmul.f32 %v2954_v47, %v2947_v57 }
  0xe6   : > { %v914_v33 = vmul.f32 %v910_v49, %v2399_v37  ;;  %v938_v30 = vmax.f32 %v934_v45, 0.0  ;;  %v962_v13 = vadd.f32 %v958_v10, %v2369_v58  ;;  %v986_v19 = vadd.f32 %v982_v28, %v978_v27 }
  0xe7   : > { %v1695_v60 = vpop.eup %1694  ;;  %v1057_v62 = vadd.f32 %v1053_v7, %v1029_v29  ;;  %v890_v3 = vadd.f32 %v886_v14, %v2437_v2  ;;  %v1010_v59 = vmul.f32 %v2548_v16, %v2324_v44  ;;  %v1034_v55 = vmul.f32 %v2954_v47, %v2948_v35 }
  0xe8   : > { %v1697_v46 = vpop.eup %1696  ;;  %829 = vst [vmem:[%s2613_s20 + $0x10] sm:$0xff] %v1695_v60  ;;  %v942_v11 = vmul.f32 %v938_v30, %v2404_v4  ;;  %v966_v9 = vmax.f32 %v962_v13, 0.0  ;;  %v990_v25 = vadd.f32 %v986_v19, %v2375_v20  ;;  %v1038_v1 = vmul.f32 %v2548_v16, %v2333_v56 }
  0xe9   : > { %v814_v15 = vadd.f32 1.0, %v1697_v46  ;;  %v1085_v7 = vadd.f32 %v1081_v51, %v1057_v62  ;;  %v918_v26 = vadd.f32 %v914_v33, %v890_v3  ;;  %v1014_v27 = vadd.f32 %v1010_v59, %v1006_v6  ;;  %v2955_v6 = vld [vmem:[#allocation41_spill] sm:$0xff] }
  0xea   : > { %v970_v49 = vmul.f32 %v966_v9, %v2409_v54  ;;  %v994_v45 = vmax.f32 %v990_v25, 0.0  ;;  %v1042_v10 = vadd.f32 %v1038_v1, %v1034_v55  ;;  %v1062_v28 = vmul.f32 %v2954_v47, %v2949_v18 }
  0xeb   : > { %1698 = vrcp.f32 %v814_v15  ;;  %v1089_v29 = vsub.f32 0.0, %v1085_v7  ;;  %v946_v14 = vadd.f32 %v942_v11, %v918_v26  ;;  %v1018_v30 = vadd.f32 %v1014_v27, %v2381_v41 }
  0xec   : > { %v998_v13 = vmul.f32 %v994_v45, %v2415_v12  ;;  %v1046_v19 = vadd.f32 %v1042_v10, %v2386_v52  ;;  %v1066_v51 = vmul.f32 %v2548_v16, %v2342_v21  ;;  %v867_v33 = vmul.f32 %v2955_v6, %v2156_v48 }
  0xed   : > { %v1093_v60 = vmul.f32 1.442695, %v1089_v29  ;;  %v974_v62 = vadd.f32 %v970_v49, %v946_v14  ;;  %v1022_v3 = vmax.f32 %v1018_v30, 0.0  ;;  %v871_v47 = vmul.f32 %v2555_v50, %v2940_v40 }
  0xee   : > { %v1050_v59 = vmax.f32 %v1046_v19, 0.0  ;;  %v1070_v55 = vadd.f32 %v1066_v51, %v1062_v28  ;;  %v895_v46 = vmul.f32 %v2955_v6, %v2942_v32  ;;  %v899_v11 = vmul.f32 %v2555_v50, %v2943_v63 }
  0xef   : > { %1700 = vpow2.f32 %v1093_v60  ;;  %v1002_v9 = vadd.f32 %v998_v13, %v974_v62  ;;  %v1026_v16 = vmul.f32 %v1022_v3, %v2421_v5  ;;  %v875_v25 = vadd.f32 %v871_v47, %v867_v33 }
  0xf0   : > { %v1054_v1 = vmul.f32 %v1050_v59, %v2427_v61  ;;  %v1074_v15 = vadd.f32 %v1070_v55, %v2941_v53  ;;  %v903_v7 = vadd.f32 %v899_v11, %v895_v46  ;;  %v923_v26 = vmul.f32 %v2955_v6, %v2944_v17 }
  0xf1   : > { %v1030_v27 = vadd.f32 %v1026_v16, %v1002_v9  ;;  %v879_v49 = vadd.f32 %v875_v25, %v2347_v0  ;;  %v927_v45 = vmul.f32 %v2555_v50, %v2297_v23  ;;  %v951_v10 = vmul.f32 %v2955_v6, %v2945_v36 }
  0xf2   : > { %v1078_v28 = vmax.f32 %v1074_v15, 0.0  ;;  %v907_v29 = vadd.f32 %v903_v7, %v2355_v42  ;;  %v955_v14 = vmul.f32 %v2555_v50, %v2310_v34  ;;  %v979_v30 = vmul.f32 %v2955_v6, %v2946_v31 }
  0xf3   : > { %v1058_v13 = vadd.f32 %v1054_v1, %v1030_v27  ;;  %v883_v19 = vmax.f32 %v879_v49, 0.0  ;;  %v931_v51 = vadd.f32 %v927_v45, %v923_v26  ;;  %v983_v33 = vmul.f32 %v2555_v50, %v2317_v38 }
  0xf4   : > { %v1082_v60 = vmul.f32 %v1078_v28, %v2433_v24  ;;  %v911_v62 = vmax.f32 %v907_v29, 0.0  ;;  %v959_v3 = vadd.f32 %v955_v14, %v951_v10  ;;  %v1007_v47 = vmul.f32 %v2955_v6, %v2947_v57 }
  0xf5   : > { %v887_v59 = vmul.f32 %v883_v19, %v2394_v22  ;;  %v935_v55 = vadd.f32 %v931_v51, %v2362_v8  ;;  %v987_v46 = vadd.f32 %v983_v33, %v979_v30  ;;  %v1011_v11 = vmul.f32 %v2555_v50, %v2324_v44 }
  0xf6   : > { %v1086_v9 = vadd.f32 %v1082_v60, %v1058_v13  ;;  %v915_v16 = vmul.f32 %v911_v62, %v2399_v37  ;;  %v963_v25 = vadd.f32 %v959_v3, %v2369_v58  ;;  %v1035_v1 = vmul.f32 %v2955_v6, %v2948_v35 }
  0xf7   : > { %v891_v15 = vadd.f32 %v887_v59, %v2437_v2  ;;  %v939_v7 = vmax.f32 %v935_v55, 0.0  ;;  %v991_v26 = vadd.f32 %v987_v46, %v2375_v20  ;;  %v1015_v27 = vadd.f32 %v1011_v11, %v1007_v47 }
  0xf8   : > { %v1699_v49 = vpop.eup %1698  ;;  %v1090_v45 = vsub.f32 0.0, %v1086_v9  ;;  %v967_v10 = vmax.f32 %v963_v25, 0.0  ;;  %v1039_v28 = vmul.f32 %v2555_v50, %v2333_v56  ;;  %v1063_v29 = vmul.f32 %v2955_v6, %v2949_v18 }
  0xf9   : > { %830 = vst [vmem:[%s2613_s20 + $0x18] sm:$0xff] %v1699_v49  ;;  %v919_v14 = vadd.f32 %v915_v16, %v891_v15  ;;  %v943_v30 = vmul.f32 %v939_v7, %v2404_v4  ;;  %v995_v13 = vmax.f32 %v991_v26, 0.0  ;;  %v1019_v19 = vadd.f32 %v1015_v27, %v2381_v41 }
  0xfa   : > { %v1095_v51 = vmul.f32 1.442695, %v1090_v45  ;;  %v971_v33 = vmul.f32 %v967_v10, %v2409_v54  ;;  %v1043_v60 = vadd.f32 %v1039_v28, %v1035_v1  ;;  %v1067_v62 = vmul.f32 %v2555_v50, %v2342_v21 }
  0xfb   : > { %v947_v3 = vadd.f32 %v943_v30, %v919_v14  ;;  %v999_v47 = vmul.f32 %v995_v13, %v2415_v12  ;;  %v1023_v59 = vmax.f32 %v1019_v19, 0.0  ;;  %v868_v6 = vmul.f32 %v2533_v43, %v2156_v48 }
  0xfc   : > { %v1701_v55 = vpop.eup %1700  ;;  %1702 = vpow2.f32 %v1095_v51  ;;  %v1047_v46 = vadd.f32 %v1043_v60, %v2386_v52  ;;  %v1071_v11 = vadd.f32 %v1067_v62, %v1063_v29  ;;  %v872_v9 = vmul.f32 %v2560_v39, %v2940_v40 }
  0xfd   : > { %v1101_v16 = vadd.f32 1.0, %v1701_v55  ;;  %v975_v25 = vadd.f32 %v971_v33, %v947_v3  ;;  %v1027_v1 = vmul.f32 %v1023_v59, %v2421_v5  ;;  %v896_v50 = vmul.f32 %v2533_v43, %v2942_v32 }
  0xfe   : > { %v1051_v15 = vmax.f32 %v1047_v46, 0.0  ;;  %v1075_v7 = vadd.f32 %v1071_v11, %v2941_v53  ;;  %v876_v26 = vadd.f32 %v872_v9, %v868_v6  ;;  %v900_v48 = vmul.f32 %v2560_v39, %v2943_v63 }
  0xff   : > { %1704 = vrcp.f32 %v1101_v16  ;;  %v1003_v27 = vadd.f32 %v999_v47, %v975_v25  ;;  %v924_v49 = vmul.f32 %v2533_v43, %v2944_v17  ;;  %v928_v40 = vmul.f32 %v2560_v39, %v2297_v23 }
 0x100   : > { %v1055_v45 = vmul.f32 %v1051_v15, %v2427_v61  ;;  %v1079_v10 = vmax.f32 %v1075_v7, 0.0  ;;  %v880_v32 = vadd.f32 %v876_v26, %v2347_v0  ;;  %v904_v28 = vadd.f32 %v900_v48, %v896_v50 }
 0x101   : > { %v1031_v29 = vadd.f32 %v1027_v1, %v1003_v27  ;;  %v932_v14 = vadd.f32 %v928_v40, %v924_v49  ;;  %v952_v30 = vmul.f32 %v2533_v43, %v2945_v36  ;;  %v956_v63 = vmul.f32 %v2560_v39, %v2310_v34 }
 0x102   : > { %v1083_v13 = vmul.f32 %v1079_v10, %v2433_v24  ;;  %v884_v17 = vmax.f32 %v880_v32, 0.0  ;;  %v908_v19 = vadd.f32 %v904_v28, %v2355_v42  ;;  %v980_v23 = vmul.f32 %v2533_v43, %v2946_v31 }
 0x103   : > { %v1059_v51 = vadd.f32 %v1055_v45, %v1031_v29  ;;  %v936_v0 = vadd.f32 %v932_v14, %v2362_v8  ;;  %v960_v33 = vadd.f32 %v956_v63, %v952_v30  ;;  %v984_v60 = vmul.f32 %v2560_v39, %v2317_v38 }
 0x104   : > { %v888_v36 = vmul.f32 %v884_v17, %v2394_v22  ;;  %v912_v62 = vmax.f32 %v908_v19, 0.0  ;;  %v1008_v34 = vmul.f32 %v2533_v43, %v2947_v57  ;;  %v1012_v3 = vmul.f32 %v2560_v39, %v2324_v44 }
 0x105   : > { %v1087_v42 = vadd.f32 %v1083_v13, %v1059_v51  ;;  %v940_v47 = vmax.f32 %v936_v0, 0.0  ;;  %v964_v31 = vadd.f32 %v960_v33, %v2369_v58  ;;  %v988_v59 = vadd.f32 %v984_v60, %v980_v23 }
 0x106   : > { %v892_v8 = vadd.f32 %v888_v36, %v2437_v2  ;;  %v916_v6 = vmul.f32 %v912_v62, %v2399_v37  ;;  %v1016_v55 = vadd.f32 %v1012_v3, %v1008_v34  ;;  %v1036_v38 = vmul.f32 %v2533_v43, %v2948_v35 }
 0x107   : > { %v1091_v22 = vsub.f32 0.0, %v1087_v42  ;;  %v944_v46 = vmul.f32 %v940_v47, %v2404_v4  ;;  %v968_v57 = vmax.f32 %v964_v31, 0.0  ;;  %v992_v11 = vadd.f32 %v988_v59, %v2375_v20 }
 0x108   : > { %v920_v44 = vadd.f32 %v916_v6, %v892_v8  ;;  %v1020_v9 = vadd.f32 %v1016_v55, %v2381_v41  ;;  %v1040_v58 = vmul.f32 %v2560_v39, %v2333_v56  ;;  %v1064_v2 = vmul.f32 %v2533_v43, %v2949_v18 }
 0x109   : > { %v1703_v37 = vpop.eup %1702  ;;  %v1097_v16 = vmul.f32 1.442695, %v1091_v22  ;;  %v972_v35 = vmul.f32 %v968_v57, %v2409_v54  ;;  %v996_v25 = vmax.f32 %v992_v11, 0.0  ;;  %v1068_v4 = vmul.f32 %v2560_v39, %v2342_v21 }
 0x10a   : > { %v1102_v1 = vadd.f32 1.0, %v1703_v37  ;;  %v948_v20 = vadd.f32 %v944_v46, %v920_v44  ;;  %v1024_v50 = vmax.f32 %v1020_v9, 0.0  ;;  %v1044_v15 = vadd.f32 %v1040_v58, %v1036_v38 }
 0x10b   : > { %1706 = vpow2.f32 %v1097_v16  ;;  %v1000_v41 = vmul.f32 %v996_v25, %v2415_v12  ;;  %v1072_v56 = vadd.f32 %v1068_v4, %v1064_v2 }
 0x10c   : > { %v1705_v7 = vpop.eup %1704  ;;  %1708 = vrcp.f32 %v1102_v1  ;;  %v976_v18 = vadd.f32 %v972_v35, %v948_v20  ;;  %v1028_v43 = vmul.f32 %v1024_v50, %v2421_v5  ;;  %v1048_v26 = vadd.f32 %v1044_v15, %v2386_v52 }
 0x10d   : > { %1515 = vst [vmem:[%s2613_s20 + $0x20] sm:$0xff] %v1705_v7  ;;  %v1076_v54 = vadd.f32 %v1072_v56, %v2941_v53 }
 0x10e   : > { %v1004_v21 = vadd.f32 %v1000_v41, %v976_v18  ;;  %v1052_v39 = vmax.f32 %v1048_v26, 0.0 }
 0x10f   : > { %v1080_v48 = vmax.f32 %v1076_v54, 0.0 }
 0x110   : > { %v1032_v27 = vadd.f32 %v1028_v43, %v1004_v21  ;;  %v1056_v49 = vmul.f32 %v1052_v39, %v2427_v61 }
 0x111   : > { %v1084_v12 = vmul.f32 %v1080_v48, %v2433_v24 }
 0x112   : > { %v1060_v40 = vadd.f32 %v1056_v49, %v1032_v27 }
 0x114   : > { %v1088_v45 = vadd.f32 %v1084_v12, %v1060_v40 }
 0x116   : > { %v1092_v5 = vsub.f32 0.0, %v1088_v45 }
 0x118   : > { %v1707_v52 = vpop.eup %1706  ;;  %v1099_v10 = vmul.f32 1.442695, %v1092_v5 }
 0x119   : > { %v1709_v32 = vpop.eup %1708  ;;  %v1103_v28 = vadd.f32 1.0, %v1707_v52 }
 0x11a   : > { %1516 = vst [vmem:[%s2613_s20 + $0x28] sm:$0xff] %v1709_v32  ;;  %1710 = vpow2.f32 %v1099_v10 }
 0x11b   : > { %1712 = vrcp.f32 %v1103_v28 }
 0x127   : > { %v1711_v53 = vpop.eup %1710 }
 0x128   : > { %v1713_v29 = vpop.eup %1712  ;;  %v1104_v14 = vadd.f32 1.0, %v1711_v53 }
 0x129   : > { %1517 = vst [vmem:[%s2613_s20 + $0x30] sm:$0xff] %v1713_v29 }
 0x12a   : > { %1714 = vrcp.f32 %v1104_v14 }
 0x137   : > { %v1715_v61 = vpop.eup %1714 }
 0x138   : > { %1518 = vst [vmem:[%s2613_s20 + $0x38] sm:$0xff] %v1715_v61 }
 0x139   : > { %s2777_s21 = sshll.u32 %s1922_s5, 9  ;;  %s1158_s14 = sshll.u32 %s2108_s17, 4  ;;  %s1159_s14 = int_to_ptr.vmem [resolvable:$true] %s1158_s14 }
 0x13a   : > { %s1147_s11 = scalar_lea.hbm %s2863_s6, %s2777_s21  ;;  %s1832_s28 = smov 512  }
 0x13b   : > { %p2956_p8 = scmp.ne.s32.totalorder %s2907_s18, 0  ;;  %s1833_s27 = smov 4096  }
 0x13c   : > { %s1834_s16 = smov 4   ;;  %s1835_s26 = smov 128  }
 0x13d   : > { %1565 = sst [smem:[#allocation22]] (%p2956_p8), %s1832_s28  ;;  %s1836_s5 = smov 8  }
 0x13e   : > { %1566 = sst [smem:[#allocation22 + $0x1]] (%p2956_p8), %s1833_s27  ;;  %s1837_s17 = smov 131072  }
 0x13f   : > { %1567 = sst [smem:[#allocation22 + $0x2]] (%p2956_p8), %s1834_s16  ;;  %s1838_s22 = smov 0  }
 0x140   : > { %1568 = sst [smem:[#allocation22 + $0x3]] (%p2956_p8), %s1835_s26 }
 0x141   : > { %1569 = sst [smem:[#allocation22 + $0x4]] (%p2956_p8), %s1835_s26 }
 0x142   : > { %1570 = sst [smem:[#allocation22 + $0x5]] (%p2956_p8), %s1836_s5 }
 0x143   : > { %1571 = dma.general (%p2956_p8), %s1159_s14, 1024, %s1147_s11, %s1125_s3, %s1837_s17, [#allocation22], %s1838_s22, 0  }
 0x144   : > { %s1186_s4 = scalar_lea.hbm %s2864_s7, %s2777_s21  ;;  %s1197_s15 = sshll.u32 %s2121_s2, 4  ;;  %s1198_s15 = int_to_ptr.vmem [resolvable:$true] %s1197_s15 }
 0x145   : > { %s1839_s23 = smov 512   ;;  %s1840_s3 = smov 4096  }
 0x146   : > { %1572 = sst [smem:[#allocation24]] (%p2956_p8), %s1839_s23  ;;  %s1841_s14 = smov 4  }
 0x147   : > { %1573 = sst [smem:[#allocation24 + $0x1]] (%p2956_p8), %s1840_s3  ;;  %s1842_s24 = smov 128  }
 0x148   : > { %1574 = sst [smem:[#allocation24 + $0x2]] (%p2956_p8), %s1841_s14  ;;  %s1843_s11 = smov 8  }
 0x149   : > { %1575 = sst [smem:[#allocation24 + $0x3]] (%p2956_p8), %s1842_s24  ;;  %s1844_s28 = smov 131072  }
 0x14a   : > { %1576 = sst [smem:[#allocation24 + $0x4]] (%p2956_p8), %s1842_s24  ;;  %s1845_s2 = smov 0  }
 0x14b   : > { %1577 = sst [smem:[#allocation24 + $0x5]] (%p2956_p8), %s1843_s11 }
 0x14c   : > { %1578 = dma.general (%p2956_p8), %s1198_s15, 1024, %s1186_s4, %s2774_s13, %s1844_s28, [#allocation24], %s1845_s2, 0  }
 0x14d   : > { %s1225_s26 = scalar_lea.hbm %s2865_s8, %s2777_s21  ;;  %s1236_s5 = sshll.u32 %s2613_s20, 4  ;;  %s1237_s5 = int_to_ptr.vmem [resolvable:$true] %s1236_s5 }
 0x14e   : > { %s1846_s17 = smov 512   ;;  %s1847_s22 = smov 4096  }
 0x14f   : > { %1579 = sst [smem:[#allocation26]] (%p2956_p8), %s1846_s17  ;;  %s1848_s25 = smov 4  }
 0x150   : > { %1580 = sst [smem:[#allocation26 + $0x1]] (%p2956_p8), %s1847_s22  ;;  %s1849_s0 = smov 128  }
 0x151   : > { %1581 = sst [smem:[#allocation26 + $0x2]] (%p2956_p8), %s1848_s25  ;;  %s1850_s4 = smov 8  }
 0x152   : > { %1582 = sst [smem:[#allocation26 + $0x3]] (%p2956_p8), %s1849_s0  ;;  %s1851_s21 = smov 131072  }
 0x153   : > { %1583 = sst [smem:[#allocation26 + $0x4]] (%p2956_p8), %s1849_s0  ;;  %s1852_s20 = smov 0  }
 0x154   : > { %1584 = sst [smem:[#allocation26 + $0x5]] (%p2956_p8), %s1850_s4 }
 0x155   : > { %1585 = dma.general (%p2956_p8), %s1237_s5, 1024, %s1225_s26, %s2774_s13, %s1851_s21, [#allocation26], %s1852_s20, 0  }
 0x156 PF: > { %p1615_p12 = scmp.ge.s32.totalorder %s1815_s10, 2  ;;  %s1264_s15 = sand.u32 1, %s1803_s29  }
 0x157   : > { %p2957_p11 = scmp.ne.s32.totalorder %s2908_s19, 0  ;;  %s1265_s23 = scalar_lea.sflag [#allocation5], %s1264_s15 }
 0x159   : > { %p1600_p9 = pnand %p1615_p12, %p2957_p11 }
 0x15b   : > { %p1601_p5 = pneg %p1600_p9 }
 0x15d   : > { %1794 = dma.done.wait (%p1601_p5), %s1265_s23, 1024  }
 0x15e   : > { %1796 = vsyncadd (%p1601_p5), %s1265_s23, 4294966272  ;;  %s2958_s3 = sadd.s32 4294967294, %s1815_s10  }
 0x15f   : > { %s1273_s14 = sand.u32 1, %s2958_s3  }
 0x160   : > { %s1274_s24 = scalar_lea.sflag [#allocation15], %s1273_s14 }
 0x161   : > { %1798 = dma.done.wait (%p1601_p5), %s1274_s24, 2048  }
 0x162   : > { %1800 = vsyncadd (%p1601_p5), %s1274_s24, 4294965248  ;;  %s2959_s18 = sld [smem:[#allocation35_spill]]  ;;  %p31_p6 = scmp.ge.s32.totalorder %s1926_s12, 10  }
 0x163   : > { %s2960_s29 = smov %s1807_s30  ;;  %s2961_s30 = smov %s1811_s9 }
 0x164   : > { %s2963_s10 = smov %s1926_s12  ;;  %33 = sbr.rel (!%p31_p6) target bundleno = 17 (0x11), region = 177 }
 0x168   : > { %s2962_s9 = smov %s2959_s18 }
 0x169   :  { %1288 = vsyncpa [#allocation4], 1 }
 0x16a   :  { %1290 = vsyncpa [#allocation4 + $0x1], 1 }
 0x16b   :  { %1291 = vsyncpa [#allocation8], 1 }
 0x16c   :  { %1293 = vsyncpa [#allocation8 + $0x1], 1 }
 0x16d   :  { %1294 = vsyncpa [#allocation5], 1 }
 0x16e   :  { %1296 = vsyncpa [#allocation5 + $0x1], 1 }
 0x16f   :  { %1297 = vsyncpa [#allocation15], 1 }
 0x170   :  { %1299 = vsyncpa [#allocation15 + $0x1], 1 }
 0x171   :  { %1300 = vsyncpa [#allocation6], 1 }
 0x172   :  { %1302 = vsyncpa [#allocation6 + $0x1], 1 }
 0x173   :  { %1303 = vsyncpa [#allocation11], 1 }

</bundles_post_ra>
